<compile_context>
chip_gen: v7x
topology: tpu7x:2x2x1
jax: 0.10.0
libtpu: 0.0.40
codegen_flags: <defaults>
</compile_context>

<pallas_src>
import math

import jax
import jax.numpy as jnp
from jax.experimental import pallas as pl
from jax.experimental.pallas import tpu as pltpu

_SQRT2_INV = 1.0 / math.sqrt(2.0)


def _erf(x):
    # Abramowitz & Stegun 7.1.26 polynomial (|err| < 1.5e-7): exact-GELU (erf) semantics
    # within f32 precision, using only ops guaranteed to lower in Mosaic (exp/mul/add).
    s = jnp.where(x >= 0.0, 1.0, -1.0)
    a = jnp.abs(x)
    t = 1.0 / (1.0 + 0.3275911 * a)
    poly = ((((1.061405429 * t - 1.453152027) * t + 1.421413741) * t
             - 0.284496736) * t + 0.254829592) * t
    return s * (1.0 - poly * jnp.exp(-a * a))


def _gelu(x):
    # nn.GELU() default (exact / erf form)
    return 0.5 * x * (1.0 + _erf(x * _SQRT2_INV))


def _layernorm(h, w, b, eps=1e-5):
    mu = jnp.mean(h, axis=-1, keepdims=True)
    d = h - mu
    var = jnp.mean(d * d, axis=-1, keepdims=True)
    return d * jax.lax.rsqrt(var + eps) * w + b


def _tscnn_kernel(x2_ref, mprev_ref, mnext_ref,
                  wb_ref, bb_ref, w3_ref, b3_ref, w4_ref, b4_ref, seg_ref,
                  wl1_ref, bl1_ref, ln1w_ref, ln1b_ref,
                  wl2_ref, bl2_ref, ln2w_ref, ln2b_ref,
                  out_ref):
    x2 = x2_ref[...]                                   # (N, 2*Cp), N = B_TILE * Lp
    n = x2.shape[0]
    mprev = mprev_ref[...]                             # (N, 1) 0/1: previous row same sample
    mnext = mnext_ref[...]                             # (N, 1) 0/1: next row same sample

    def neighbor_rows(v):
        # prev[i] = v[i-1], nxt[i] = v[i+1], zeroed across sample boundaries
        # (== Conv1d zero padding of each sample's sequence).
        z = jnp.zeros((1, v.shape[1]), jnp.float32)
        vp = jnp.concatenate([z, v, z], axis=0)        # (N+2, C)
        return vp[0:n, :] * mprev, vp[2:n + 2, :] * mnext

    # ----- branch1 + branch2 + BN(folded) + GELU + MaxPool1d(2) + concat : one matmul.
    xm1, xp1 = neighbor_rows(x2)
    patches = jnp.concatenate([xm1, x2, xp1], axis=-1)                       # (N, 6*Cp)
    y = jnp.dot(patches, wb_ref[...], preferred_element_type=jnp.float32) + bb_ref[...]
    half = y.shape[1] // 2                                                   # 128
    # lanes of y: [b1_even | b2_even | b1_odd | b2_odd]; maxpool(2) = max(even, odd)
    fused = jnp.maximum(_gelu(y[:, :half]), _gelu(y[:, half:]))              # (N, 128)

    # ----- res_block: conv3 (128->256) + BN(folded) + GELU
    # Three accumulated K=128 dots (aligned row-slices of the prepacked (384,256) weight)
    # instead of building a (N,384) im2col buffer.
    w3 = w3_ref[...]
    c3 = w3.shape[0] // 3                                                    # 128
    fm1, fp1 = neighbor_rows(fused)
    r = jnp.dot(fm1, w3[0:c3, :], preferred_element_type=jnp.float32)
    r = r + jnp.dot(fused, w3[c3:2 * c3, :], preferred_element_type=jnp.float32)
    r = r + jnp.dot(fp1, w3[2 * c3:3 * c3, :], preferred_element_type=jnp.float32)
    r = _gelu(r + b3_ref[...])                                               # (N, 256)

    # ----- res_block: conv4 (256->128) + BN(folded) + GELU, same 3-dot scheme
    w4 = w4_ref[...]
    c4 = w4.shape[0] // 3                                                    # 256
    rm1, rp1 = neighbor_rows(r)
    r2 = jnp.dot(rm1, w4[0:c4, :], preferred_element_type=jnp.float32)
    r2 = r2 + jnp.dot(r, w4[c4:2 * c4, :], preferred_element_type=jnp.float32)
    r2 = r2 + jnp.dot(rp1, w4[2 * c4:3 * c4, :], preferred_element_type=jnp.float32)
    r2 = _gelu(r2 + b4_ref[...])                                             # (N, 128)

    # ----- AdaptiveAvgPool1d(1) + residual.mean(dim=-1): per-sample mean via one matmul
    pooled = jnp.dot(seg_ref[...], r2 + fused,
                     preferred_element_type=jnp.float32)                     # (B_TILE, 128)

    # ----- dim_adapter: Linear -> LayerNorm -> GELU -> Linear -> LayerNorm
    h = jnp.dot(pooled, wl1_ref[...], preferred_element_type=jnp.float32) + bl1_ref[...]
    h = _gelu(_layernorm(h, ln1w_ref[...], ln1b_ref[...]))
    h = jnp.dot(h, wl2_ref[...], preferred_element_type=jnp.float32) + bl2_ref[...]
    h = _layernorm(h, ln2w_ref[...], ln2b_ref[...])

    # ----- F.normalize(p=2, dim=-1), eps = 1e-12, via rsqrt (EUP)
    ss = jnp.sum(h * h, axis=-1, keepdims=True)
    out_ref[...] = (h * jax.lax.rsqrt(jnp.maximum(ss, 1e-24))).astype(out_ref.dtype)


# --------------------------------------------------------------------------------------
# Parameter construction (PyTorch-equivalent init) and host-side packing for the kernel.
# --------------------------------------------------------------------------------------

def init_params(key, input_dim=7, output_dim=256):
    ks = jax.random.split(key, 6)

    def conv_w(k, K, cin, cout):
        std = math.sqrt(2.0 / (cout * K))        # kaiming_normal_, mode='fan_out', relu
        return std * jax.random.normal(k, (K, cin, cout), jnp.float32)

    def lin_w(k, fin, fout):
        std = math.sqrt(2.0 / (fin + fout))      # xavier_normal_
        return std * jax.random.normal(k, (fin, fout), jnp.float32)

    def bn(c):  # eval-mode BatchNorm1d defaults
        return dict(gamma=jnp.ones((c,), jnp.float32), beta=jnp.zeros((c,), jnp.float32),
                    mean=jnp.zeros((c,), jnp.float32), var=jnp.ones((c,), jnp.float32))

    return dict(
        conv1_w=conv_w(ks[0], 3, input_dim, 64), conv1_b=jnp.zeros((64,), jnp.float32), bn1=bn(64),
        conv2_w=conv_w(ks[1], 5, input_dim, 64), conv2_b=jnp.zeros((64,), jnp.float32), bn2=bn(64),
        conv3_w=conv_w(ks[2], 3, 128, 256), conv3_b=jnp.zeros((256,), jnp.float32), bn3=bn(256),
        conv4_w=conv_w(ks[3], 3, 256, 128), conv4_b=jnp.zeros((128,), jnp.float32), bn4=bn(128),
        lin1_w=lin_w(ks[4], 128, 512), lin1_b=jnp.zeros((512,), jnp.float32),
        ln1_w=jnp.ones((512,), jnp.float32), ln1_b=jnp.zeros((512,), jnp.float32),
        lin2_w=lin_w(ks[5], 512, output_dim), lin2_b=jnp.zeros((output_dim,), jnp.float32),
        ln2_w=jnp.ones((output_dim,), jnp.float32), ln2_b=jnp.zeros((output_dim,), jnp.float32),
    )


def pack_params(p, input_dim):
    """Fold eval-mode BN into convs, pad Cin to a sublane multiple, and build packed weights."""
    cp = max(8, ((input_dim + 7) // 8) * 8)

    def fold(w, b, bn, eps=1e-5):
        s = bn["gamma"] / jnp.sqrt(bn["var"] + eps)
        return w * s[None, None, :], (b - bn["mean"]) * s + bn["beta"]

    w1, b1 = fold(p["conv1_w"], p["conv1_b"], p["bn1"])
    w2, b2 = fold(p["conv2_w"], p["conv2_b"], p["bn2"])
    w3, b3 = fold(p["conv3_w"], p["conv3_b"], p["bn3"])
    w4, b4 = fold(p["conv4_w"], p["conv4_b"], p["bn4"])

    # pad input channels (7 -> 8) with zero rows
    w1 = jnp.pad(w1, ((0, 0), (0, cp - input_dim), (0, 0)))
    w2 = jnp.pad(w2, ((0, 0), (0, cp - input_dim), (0, 0)))

    # Fused branch weight (6*cp, 256): patch row layout is 6 consecutive time steps
    # t = 2i'-2 .. 2i'+3 (cp lanes each); columns are [b1_even|b2_even|b1_odd|b2_odd].
    wb = jnp.zeros((6 * cp, 256), jnp.float32)
    for j in range(3):                                   # conv1, k=3, pad=1
        wb = wb.at[(j + 1) * cp:(j + 2) * cp, 0:64].set(w1[j])      # even output (t = 2i')
        wb = wb.at[(j + 2) * cp:(j + 3) * cp, 128:192].set(w1[j])   # odd output  (t = 2i'+1)
    for j in range(5):                                   # conv2, k=5, pad=2
        wb = wb.at[j * cp:(j + 1) * cp, 64:128].set(w2[j])          # even output
        wb = wb.at[(j + 1) * cp:(j + 2) * cp, 192:256].set(w2[j])   # odd output
    bb = jnp.concatenate([b1, b2, b1, b2])[None, :]      # (1, 256)

    return dict(
        wb=wb, bb=bb,
        w3=w3.reshape(3 * 128, 256), b3=b3[None, :],     # stacked taps (K*Cin, Cout)
        w4=w4.reshape(3 * 256, 128), b4=b4[None, :],
        wl1=p["lin1_w"], bl1=p["lin1_b"][None, :],
        ln1_w=p["ln1_w"][None, :], ln1_b=p["ln1_b"][None, :],
        wl2=p["lin2_w"], bl2=p["lin2_b"][None, :],
        ln2_w=p["ln2_w"][None, :], ln2_b=p["ln2_b"][None, :],
    )


def timeseries_cnn_forward(x, kp, *, b_tile=64):
    """x: (B, seq_len, input_dim) -> (B, output_dim) L2-normalized embeddings."""
    B, L, cin = x.shape
    assert L % 2 == 0, "MaxPool1d(2) layout packing requires an even sequence length"
    assert b_tile % 8 == 0
    Lp = L // 2
    cp = kp["wb"].shape[0] // 6
    out_dim = kp["ln2_w"].shape[-1]

    # Batch tiling: one grid step processes bt samples (bt*Lp rows folded into matmul M).
    bt = B if B <= b_tile else b_tile
    Bp = ((B + bt - 1) // bt) * bt
    xf = x.astype(jnp.float32)
    if Bp != B:
        xf = jnp.concatenate([xf, jnp.zeros((Bp - B, L, cin), jnp.float32)], axis=0)

    # Host-side packing: pad Cin -> cp, pack time-step pairs along lanes: (Bp*Lp, 2*cp).
    xpad = jnp.pad(xf, ((0, 0), (0, 0), (0, cp - cin)))
    x2 = xpad.reshape(Bp * Lp, 2 * cp)

    n = bt * Lp
    pos = jnp.arange(n) % Lp
    mprev = (pos != 0).astype(jnp.float32)[:, None]          # (n, 1)
    mnext = (pos != Lp - 1).astype(jnp.float32)[:, None]     # (n, 1)
    # Segment-mean matrix: pooled[b] = mean over that sample's Lp rows.
    seg = (jnp.arange(n)[None, :] // Lp == jnp.arange(bt)[:, None]).astype(jnp.float32) / Lp

    operands = [x2, mprev, mnext,
                kp["wb"], kp["bb"], kp["w3"], kp["b3"], kp["w4"], kp["b4"], seg,
                kp["wl1"], kp["bl1"], kp["ln1_w"], kp["ln1_b"],
                kp["wl2"], kp["bl2"], kp["ln2_w"], kp["ln2_b"]]

    def rep(a):  # full-array block, replicated across all grid steps (DMA skipped after step 0)
        return pl.BlockSpec(a.shape, lambda i, _nd=a.ndim: (0,) * _nd)

    in_specs = ([pl.BlockSpec((n, 2 * cp), lambda i: (i, 0))]
                + [rep(a) for a in operands[1:]])

    out = pl.pallas_call(
        _tscnn_kernel,
        out_shape=jax.ShapeDtypeStruct((Bp, out_dim), jnp.float32),
        grid_spec=pltpu.PrefetchScalarGridSpec(
            num_scalar_prefetch=0,
            grid=(Bp // bt,),
            in_specs=in_specs,
            out_specs=pl.BlockSpec((bt, out_dim), lambda i: (i, 0))),
        compiler_params=pltpu.CompilerParams(
            dimension_semantics=("parallel",)),
    )(*operands)

    return out[:B]


if __name__ == "__main__":
    key = jax.random.PRNGKey(0)
    kx, kparam = jax.random.split(key)
    batch, seq_len, input_dim, output_dim = 2, 30, 7, 256

    x = jax.random.normal(kx, (batch, seq_len, input_dim), jnp.float32)
    raw = init_params(kparam, input_dim=input_dim, output_dim=output_dim)
    packed = pack_params(raw, input_dim=input_dim)

    out = timeseries_cnn_forward(x, packed)
    jax.block_until_ready(out)

    assert out.shape == (batch, output_dim), out.shape
    assert bool(jnp.all(jnp.isfinite(out)))
    norms = jnp.linalg.norm(out, axis=-1)
    assert bool(jnp.all(jnp.abs(norms - 1.0) < 1e-3)), norms
    print("KERNEL_OK")
</pallas_src>

<mosaic_0001>
module attributes {stable_mosaic.version = 11 : i64} {
  func.func @_tscnn_kernel(%arg0: i32, %arg1: memref<30x16xf32, #tpu.memory_space<vmem>>, %arg2: memref<30x1xf32, #tpu.memory_space<vmem>>, %arg3: memref<30x1xf32, #tpu.memory_space<vmem>>, %arg4: memref<48x256xf32, #tpu.memory_space<vmem>>, %arg5: memref<1x256xf32, #tpu.memory_space<vmem>>, %arg6: memref<384x256xf32, #tpu.memory_space<vmem>>, %arg7: memref<1x256xf32, #tpu.memory_space<vmem>>, %arg8: memref<768x128xf32, #tpu.memory_space<vmem>>, %arg9: memref<1x128xf32, #tpu.memory_space<vmem>>, %arg10: memref<2x30xf32, #tpu.memory_space<vmem>>, %arg11: memref<128x512xf32, #tpu.memory_space<vmem>>, %arg12: memref<1x512xf32, #tpu.memory_space<vmem>>, %arg13: memref<1x512xf32, #tpu.memory_space<vmem>>, %arg14: memref<1x512xf32, #tpu.memory_space<vmem>>, %arg15: memref<512x256xf32, #tpu.memory_space<vmem>>, %arg16: memref<1x256xf32, #tpu.memory_space<vmem>>, %arg17: memref<1x256xf32, #tpu.memory_space<vmem>>, %arg18: memref<1x256xf32, #tpu.memory_space<vmem>>, %arg19: memref<2x256xf32, #tpu.memory_space<vmem>>) attributes {dimension_semantics = [#tpu.dimension_semantics<parallel>], iteration_bounds = array<i64: 1>, scalar_prefetch = 0 : i64, scratch_operands = 0 : i64, tpu.core_type = #tpu.core_type<tc>, window_params = [{transform_indices = @transform_0, window_bounds = array<i64: 30, 16>}, {pipeline_mode = #tpu.pipeline_mode<synchronous>, transform_indices = @transform_1, window_bounds = array<i64: 30, 1>}, {pipeline_mode = #tpu.pipeline_mode<synchronous>, transform_indices = @transform_2, window_bounds = array<i64: 30, 1>}, {pipeline_mode = #tpu.pipeline_mode<synchronous>, transform_indices = @transform_3, window_bounds = array<i64: 48, 256>}, {pipeline_mode = #tpu.pipeline_mode<synchronous>, transform_indices = @transform_4, window_bounds = array<i64: 1, 256>}, {pipeline_mode = #tpu.pipeline_mode<synchronous>, transform_indices = @transform_5, window_bounds = array<i64: 384, 256>}, {pipeline_mode = #tpu.pipeline_mode<synchronous>, transform_indices = @transform_6, window_bounds = array<i64: 1, 256>}, {pipeline_mode = #tpu.pipeline_mode<synchronous>, transform_indices = @transform_7, window_bounds = array<i64: 768, 128>}, {pipeline_mode = #tpu.pipeline_mode<synchronous>, transform_indices = @transform_8, window_bounds = array<i64: 1, 128>}, {pipeline_mode = #tpu.pipeline_mode<synchronous>, transform_indices = @transform_9, window_bounds = array<i64: 2, 30>}, {pipeline_mode = #tpu.pipeline_mode<synchronous>, transform_indices = @transform_10, window_bounds = array<i64: 128, 512>}, {pipeline_mode = #tpu.pipeline_mode<synchronous>, transform_indices = @transform_11, window_bounds = array<i64: 1, 512>}, {pipeline_mode = #tpu.pipeline_mode<synchronous>, transform_indices = @transform_12, window_bounds = array<i64: 1, 512>}, {pipeline_mode = #tpu.pipeline_mode<synchronous>, transform_indices = @transform_13, window_bounds = array<i64: 1, 512>}, {pipeline_mode = #tpu.pipeline_mode<synchronous>, transform_indices = @transform_14, window_bounds = array<i64: 512, 256>}, {pipeline_mode = #tpu.pipeline_mode<synchronous>, transform_indices = @transform_15, window_bounds = array<i64: 1, 256>}, {pipeline_mode = #tpu.pipeline_mode<synchronous>, transform_indices = @transform_16, window_bounds = array<i64: 1, 256>}, {pipeline_mode = #tpu.pipeline_mode<synchronous>, transform_indices = @transform_17, window_bounds = array<i64: 1, 256>}, {transform_indices = @transform_18, window_bounds = array<i64: 2, 256>}]} {
    %c0 = arith.constant 0 : index
    %c0_0 = arith.constant 0 : index
    %0 = vector.load %arg1[%c0, %c0_0] : memref<30x16xf32, #tpu.memory_space<vmem>>, vector<30x16xf32>
    %c0_1 = arith.constant 0 : index
    %c0_2 = arith.constant 0 : index
    %1 = vector.load %arg2[%c0_1, %c0_2] : memref<30x1xf32, #tpu.memory_space<vmem>>, vector<30x1xf32>
    %c0_3 = arith.constant 0 : index
    %c0_4 = arith.constant 0 : index
    %2 = vector.load %arg3[%c0_3, %c0_4] : memref<30x1xf32, #tpu.memory_space<vmem>>, vector<30x1xf32>
    %cst = arith.constant 0.000000e+00 : f32
    %3 = vector.broadcast %cst : f32 to vector<1x16xf32>
    %4 = tpu.concatenate %3, %0, %3 in 0 : vector<1x16xf32>, vector<30x16xf32>, vector<1x16xf32> -> vector<32x16xf32>
    %5 = vector.extract_strided_slice %4 {offsets = [0, 0], sizes = [30, 16], strides = [1, 1]} : vector<32x16xf32> to vector<30x16xf32>
    %6 = vector.broadcast %1 : vector<30x1xf32> to vector<30x16xf32>
    %7 = arith.mulf %5, %6 : vector<30x16xf32>
    %8 = vector.extract_strided_slice %4 {offsets = [2, 0], sizes = [30, 16], strides = [1, 1]} : vector<32x16xf32> to vector<30x16xf32>
    %9 = vector.broadcast %2 : vector<30x1xf32> to vector<30x16xf32>
    %10 = arith.mulf %8, %9 : vector<30x16xf32>
    %11 = tpu.concatenate %7, %0, %10 in 1 : vector<30x16xf32>, vector<30x16xf32>, vector<30x16xf32> -> vector<30x48xf32>
    %c0_5 = arith.constant 0 : index
    %c0_6 = arith.constant 0 : index
    %12 = vector.load %arg4[%c0_5, %c0_6] : memref<48x256xf32, #tpu.memory_space<vmem>>, vector<48x256xf32>
    %cst_7 = arith.constant dense<0.000000e+00> : vector<30x256xf32>
    %13 = tpu.matmul %11, %12, %cst_7 {dimension_numbers = #tpu.dot_dimension_numbers<[1], [0], [0], [1], [0, 0, 1, 1], [], []>} : vector<30x48xf32>, vector<48x256xf32>, vector<30x256xf32> -> vector<30x256xf32>
    %c0_8 = arith.constant 0 : index
    %c0_9 = arith.constant 0 : index
    %14 = vector.load %arg5[%c0_8, %c0_9] : memref<1x256xf32, #tpu.memory_space<vmem>>, vector<1x256xf32>
    %15 = vector.broadcast %14 : vector<1x256xf32> to vector<30x256xf32>
    %16 = arith.addf %13, %15 : vector<30x256xf32>
    %17 = vector.extract_strided_slice %16 {offsets = [0, 0], sizes = [30, 128], strides = [1, 1]} : vector<30x256xf32> to vector<30x128xf32>
    %cst_10 = arith.constant 5.000000e-01 : f32
    %18 = vector.broadcast %cst_10 : f32 to vector<30x128xf32>
    %19 = arith.mulf %18, %17 : vector<30x128xf32>
    %cst_11 = arith.constant 0.707106769 : f32
    %20 = vector.broadcast %cst_11 : f32 to vector<30x128xf32>
    %21 = arith.mulf %17, %20 : vector<30x128xf32>
    %cst_12 = arith.constant 0.000000e+00 : f32
    %22 = vector.broadcast %cst_12 : f32 to vector<30x128xf32>
    %23 = arith.cmpf oge, %21, %22 : vector<30x128xf32>
    %cst_13 = arith.constant 1.000000e+00 : f32
    %cst_14 = arith.constant -1.000000e+00 : f32
    %24 = vector.broadcast %cst_13 : f32 to vector<30x128xf32>
    %25 = vector.broadcast %cst_14 : f32 to vector<30x128xf32>
    %26 = arith.select %23, %24, %25 : vector<30x128xi1>, vector<30x128xf32>
    %27 = math.absf %21 : vector<30x128xf32>
    %cst_15 = arith.constant 0.327591091 : f32
    %28 = vector.broadcast %cst_15 : f32 to vector<30x128xf32>
    %29 = arith.mulf %28, %27 : vector<30x128xf32>
    %cst_16 = arith.constant 1.000000e+00 : f32
    %30 = vector.broadcast %cst_16 : f32 to vector<30x128xf32>
    %31 = arith.addf %30, %29 : vector<30x128xf32>
    %cst_17 = arith.constant 1.000000e+00 : f32
    %32 = vector.broadcast %cst_17 : f32 to vector<30x128xf32>
    %33 = arith.divf %32, %31 : vector<30x128xf32>
    %cst_18 = arith.constant 1.06140542 : f32
    %34 = vector.broadcast %cst_18 : f32 to vector<30x128xf32>
    %35 = arith.mulf %34, %33 : vector<30x128xf32>
    %cst_19 = arith.constant 1.45315206 : f32
    %36 = vector.broadcast %cst_19 : f32 to vector<30x128xf32>
    %37 = arith.subf %35, %36 : vector<30x128xf32>
    %38 = arith.mulf %37, %33 : vector<30x128xf32>
    %cst_20 = arith.constant 1.42141378 : f32
    %39 = vector.broadcast %cst_20 : f32 to vector<30x128xf32>
    %40 = arith.addf %38, %39 : vector<30x128xf32>
    %41 = arith.mulf %40, %33 : vector<30x128xf32>
    %cst_21 = arith.constant 0.284496725 : f32
    %42 = vector.broadcast %cst_21 : f32 to vector<30x128xf32>
    %43 = arith.subf %41, %42 : vector<30x128xf32>
    %44 = arith.mulf %43, %33 : vector<30x128xf32>
    %cst_22 = arith.constant 0.254829586 : f32
    %45 = vector.broadcast %cst_22 : f32 to vector<30x128xf32>
    %46 = arith.addf %44, %45 : vector<30x128xf32>
    %47 = arith.mulf %46, %33 : vector<30x128xf32>
    %cst_23 = arith.constant 0.000000e+00 : f32
    %48 = vector.broadcast %cst_23 : f32 to vector<30x128xf32>
    %49 = arith.subf %48, %27 : vector<30x128xf32>
    %50 = arith.mulf %49, %27 : vector<30x128xf32>
    %51 = math.exp %50 : vector<30x128xf32>
    %52 = arith.mulf %47, %51 : vector<30x128xf32>
    %cst_24 = arith.constant 1.000000e+00 : f32
    %53 = vector.broadcast %cst_24 : f32 to vector<30x128xf32>
    %54 = arith.subf %53, %52 : vector<30x128xf32>
    %55 = arith.mulf %26, %54 : vector<30x128xf32>
    %cst_25 = arith.constant 1.000000e+00 : f32
    %56 = vector.broadcast %cst_25 : f32 to vector<30x128xf32>
    %57 = arith.addf %56, %55 : vector<30x128xf32>
    %58 = arith.mulf %19, %57 : vector<30x128xf32>
    %59 = vector.extract_strided_slice %16 {offsets = [0, 128], sizes = [30, 128], strides = [1, 1]} : vector<30x256xf32> to vector<30x128xf32>
    %cst_26 = arith.constant 5.000000e-01 : f32
    %60 = vector.broadcast %cst_26 : f32 to vector<30x128xf32>
    %61 = arith.mulf %60, %59 : vector<30x128xf32>
    %cst_27 = arith.constant 0.707106769 : f32
    %62 = vector.broadcast %cst_27 : f32 to vector<30x128xf32>
    %63 = arith.mulf %59, %62 : vector<30x128xf32>
    %cst_28 = arith.constant 0.000000e+00 : f32
    %64 = vector.broadcast %cst_28 : f32 to vector<30x128xf32>
    %65 = arith.cmpf oge, %63, %64 : vector<30x128xf32>
    %cst_29 = arith.constant 1.000000e+00 : f32
    %cst_30 = arith.constant -1.000000e+00 : f32
    %66 = vector.broadcast %cst_29 : f32 to vector<30x128xf32>
    %67 = vector.broadcast %cst_30 : f32 to vector<30x128xf32>
    %68 = arith.select %65, %66, %67 : vector<30x128xi1>, vector<30x128xf32>
    %69 = math.absf %63 : vector<30x128xf32>
    %cst_31 = arith.constant 0.327591091 : f32
    %70 = vector.broadcast %cst_31 : f32 to vector<30x128xf32>
    %71 = arith.mulf %70, %69 : vector<30x128xf32>
    %cst_32 = arith.constant 1.000000e+00 : f32
    %72 = vector.broadcast %cst_32 : f32 to vector<30x128xf32>
    %73 = arith.addf %72, %71 : vector<30x128xf32>
    %cst_33 = arith.constant 1.000000e+00 : f32
    %74 = vector.broadcast %cst_33 : f32 to vector<30x128xf32>
    %75 = arith.divf %74, %73 : vector<30x128xf32>
    %cst_34 = arith.constant 1.06140542 : f32
    %76 = vector.broadcast %cst_34 : f32 to vector<30x128xf32>
    %77 = arith.mulf %76, %75 : vector<30x128xf32>
    %cst_35 = arith.constant 1.45315206 : f32
    %78 = vector.broadcast %cst_35 : f32 to vector<30x128xf32>
    %79 = arith.subf %77, %78 : vector<30x128xf32>
    %80 = arith.mulf %79, %75 : vector<30x128xf32>
    %cst_36 = arith.constant 1.42141378 : f32
    %81 = vector.broadcast %cst_36 : f32 to vector<30x128xf32>
    %82 = arith.addf %80, %81 : vector<30x128xf32>
    %83 = arith.mulf %82, %75 : vector<30x128xf32>
    %cst_37 = arith.constant 0.284496725 : f32
    %84 = vector.broadcast %cst_37 : f32 to vector<30x128xf32>
    %85 = arith.subf %83, %84 : vector<30x128xf32>
    %86 = arith.mulf %85, %75 : vector<30x128xf32>
    %cst_38 = arith.constant 0.254829586 : f32
    %87 = vector.broadcast %cst_38 : f32 to vector<30x128xf32>
    %88 = arith.addf %86, %87 : vector<30x128xf32>
    %89 = arith.mulf %88, %75 : vector<30x128xf32>
    %cst_39 = arith.constant 0.000000e+00 : f32
    %90 = vector.broadcast %cst_39 : f32 to vector<30x128xf32>
    %91 = arith.subf %90, %69 : vector<30x128xf32>
    %92 = arith.mulf %91, %69 : vector<30x128xf32>
    %93 = math.exp %92 : vector<30x128xf32>
    %94 = arith.mulf %89, %93 : vector<30x128xf32>
    %cst_40 = arith.constant 1.000000e+00 : f32
    %95 = vector.broadcast %cst_40 : f32 to vector<30x128xf32>
    %96 = arith.subf %95, %94 : vector<30x128xf32>
    %97 = arith.mulf %68, %96 : vector<30x128xf32>
    %cst_41 = arith.constant 1.000000e+00 : f32
    %98 = vector.broadcast %cst_41 : f32 to vector<30x128xf32>
    %99 = arith.addf %98, %97 : vector<30x128xf32>
    %100 = arith.mulf %61, %99 : vector<30x128xf32>
    %101 = arith.maximumf %58, %100 : vector<30x128xf32>
    %c0_42 = arith.constant 0 : index
    %c0_43 = arith.constant 0 : index
    %102 = vector.load %arg6[%c0_42, %c0_43] : memref<384x256xf32, #tpu.memory_space<vmem>>, vector<384x256xf32>
    %cst_44 = arith.constant 0.000000e+00 : f32
    %103 = vector.broadcast %cst_44 : f32 to vector<1x128xf32>
    %104 = tpu.concatenate %103, %101, %103 in 0 : vector<1x128xf32>, vector<30x128xf32>, vector<1x128xf32> -> vector<32x128xf32>
    %105 = vector.extract_strided_slice %104 {offsets = [0, 0], sizes = [30, 128], strides = [1, 1]} : vector<32x128xf32> to vector<30x128xf32>
    %106 = vector.broadcast %1 : vector<30x1xf32> to vector<30x128xf32>
    %107 = arith.mulf %105, %106 : vector<30x128xf32>
    %108 = vector.extract_strided_slice %104 {offsets = [2, 0], sizes = [30, 128], strides = [1, 1]} : vector<32x128xf32> to vector<30x128xf32>
    %109 = vector.broadcast %2 : vector<30x1xf32> to vector<30x128xf32>
    %110 = arith.mulf %108, %109 : vector<30x128xf32>
    %111 = vector.extract_strided_slice %102 {offsets = [0, 0], sizes = [128, 256], strides = [1, 1]} : vector<384x256xf32> to vector<128x256xf32>
    %cst_45 = arith.constant dense<0.000000e+00> : vector<30x256xf32>
    %112 = tpu.matmul %107, %111, %cst_45 {dimension_numbers = #tpu.dot_dimension_numbers<[1], [0], [0], [1], [0, 0, 1, 1], [], []>} : vector<30x128xf32>, vector<128x256xf32>, vector<30x256xf32> -> vector<30x256xf32>
    %113 = vector.extract_strided_slice %102 {offsets = [128, 0], sizes = [128, 256], strides = [1, 1]} : vector<384x256xf32> to vector<128x256xf32>
    %cst_46 = arith.constant dense<0.000000e+00> : vector<30x256xf32>
    %114 = tpu.matmul %101, %113, %cst_46 {dimension_numbers = #tpu.dot_dimension_numbers<[1], [0], [0], [1], [0, 0, 1, 1], [], []>} : vector<30x128xf32>, vector<128x256xf32>, vector<30x256xf32> -> vector<30x256xf32>
    %115 = arith.addf %112, %114 : vector<30x256xf32>
    %116 = vector.extract_strided_slice %102 {offsets = [256, 0], sizes = [128, 256], strides = [1, 1]} : vector<384x256xf32> to vector<128x256xf32>
    %cst_47 = arith.constant dense<0.000000e+00> : vector<30x256xf32>
    %117 = tpu.matmul %110, %116, %cst_47 {dimension_numbers = #tpu.dot_dimension_numbers<[1], [0], [0], [1], [0, 0, 1, 1], [], []>} : vector<30x128xf32>, vector<128x256xf32>, vector<30x256xf32> -> vector<30x256xf32>
    %118 = arith.addf %115, %117 : vector<30x256xf32>
    %c0_48 = arith.constant 0 : index
    %c0_49 = arith.constant 0 : index
    %119 = vector.load %arg7[%c0_48, %c0_49] : memref<1x256xf32, #tpu.memory_space<vmem>>, vector<1x256xf32>
    %120 = vector.broadcast %119 : vector<1x256xf32> to vector<30x256xf32>
    %121 = arith.addf %118, %120 : vector<30x256xf32>
    %cst_50 = arith.constant 5.000000e-01 : f32
    %122 = vector.broadcast %cst_50 : f32 to vector<30x256xf32>
    %123 = arith.mulf %122, %121 : vector<30x256xf32>
    %cst_51 = arith.constant 0.707106769 : f32
    %124 = vector.broadcast %cst_51 : f32 to vector<30x256xf32>
    %125 = arith.mulf %121, %124 : vector<30x256xf32>
    %cst_52 = arith.constant 0.000000e+00 : f32
    %126 = vector.broadcast %cst_52 : f32 to vector<30x256xf32>
    %127 = arith.cmpf oge, %125, %126 : vector<30x256xf32>
    %cst_53 = arith.constant 1.000000e+00 : f32
    %cst_54 = arith.constant -1.000000e+00 : f32
    %128 = vector.broadcast %cst_53 : f32 to vector<30x256xf32>
    %129 = vector.broadcast %cst_54 : f32 to vector<30x256xf32>
    %130 = arith.select %127, %128, %129 : vector<30x256xi1>, vector<30x256xf32>
    %131 = math.absf %125 : vector<30x256xf32>
    %cst_55 = arith.constant 0.327591091 : f32
    %132 = vector.broadcast %cst_55 : f32 to vector<30x256xf32>
    %133 = arith.mulf %132, %131 : vector<30x256xf32>
    %cst_56 = arith.constant 1.000000e+00 : f32
    %134 = vector.broadcast %cst_56 : f32 to vector<30x256xf32>
    %135 = arith.addf %134, %133 : vector<30x256xf32>
    %cst_57 = arith.constant 1.000000e+00 : f32
    %136 = vector.broadcast %cst_57 : f32 to vector<30x256xf32>
    %137 = arith.divf %136, %135 : vector<30x256xf32>
    %cst_58 = arith.constant 1.06140542 : f32
    %138 = vector.broadcast %cst_58 : f32 to vector<30x256xf32>
    %139 = arith.mulf %138, %137 : vector<30x256xf32>
    %cst_59 = arith.constant 1.45315206 : f32
    %140 = vector.broadcast %cst_59 : f32 to vector<30x256xf32>
    %141 = arith.subf %139, %140 : vector<30x256xf32>
    %142 = arith.mulf %141, %137 : vector<30x256xf32>
    %cst_60 = arith.constant 1.42141378 : f32
    %143 = vector.broadcast %cst_60 : f32 to vector<30x256xf32>
    %144 = arith.addf %142, %143 : vector<30x256xf32>
    %145 = arith.mulf %144, %137 : vector<30x256xf32>
    %cst_61 = arith.constant 0.284496725 : f32
    %146 = vector.broadcast %cst_61 : f32 to vector<30x256xf32>
    %147 = arith.subf %145, %146 : vector<30x256xf32>
    %148 = arith.mulf %147, %137 : vector<30x256xf32>
    %cst_62 = arith.constant 0.254829586 : f32
    %149 = vector.broadcast %cst_62 : f32 to vector<30x256xf32>
    %150 = arith.addf %148, %149 : vector<30x256xf32>
    %151 = arith.mulf %150, %137 : vector<30x256xf32>
    %cst_63 = arith.constant 0.000000e+00 : f32
    %152 = vector.broadcast %cst_63 : f32 to vector<30x256xf32>
    %153 = arith.subf %152, %131 : vector<30x256xf32>
    %154 = arith.mulf %153, %131 : vector<30x256xf32>
    %155 = math.exp %154 : vector<30x256xf32>
    %156 = arith.mulf %151, %155 : vector<30x256xf32>
    %cst_64 = arith.constant 1.000000e+00 : f32
    %157 = vector.broadcast %cst_64 : f32 to vector<30x256xf32>
    %158 = arith.subf %157, %156 : vector<30x256xf32>
    %159 = arith.mulf %130, %158 : vector<30x256xf32>
    %cst_65 = arith.constant 1.000000e+00 : f32
    %160 = vector.broadcast %cst_65 : f32 to vector<30x256xf32>
    %161 = arith.addf %160, %159 : vector<30x256xf32>
    %162 = arith.mulf %123, %161 : vector<30x256xf32>
    %c0_66 = arith.constant 0 : index
    %c0_67 = arith.constant 0 : index
    %163 = vector.load %arg8[%c0_66, %c0_67] : memref<768x128xf32, #tpu.memory_space<vmem>>, vector<768x128xf32>
    %cst_68 = arith.constant 0.000000e+00 : f32
    %164 = vector.broadcast %cst_68 : f32 to vector<1x256xf32>
    %165 = tpu.concatenate %164, %162, %164 in 0 : vector<1x256xf32>, vector<30x256xf32>, vector<1x256xf32> -> vector<32x256xf32>
    %166 = vector.extract_strided_slice %165 {offsets = [0, 0], sizes = [30, 256], strides = [1, 1]} : vector<32x256xf32> to vector<30x256xf32>
    %167 = vector.broadcast %1 : vector<30x1xf32> to vector<30x256xf32>
    %168 = arith.mulf %166, %167 : vector<30x256xf32>
    %169 = vector.extract_strided_slice %165 {offsets = [2, 0], sizes = [30, 256], strides = [1, 1]} : vector<32x256xf32> to vector<30x256xf32>
    %170 = vector.broadcast %2 : vector<30x1xf32> to vector<30x256xf32>
    %171 = arith.mulf %169, %170 : vector<30x256xf32>
    %172 = vector.extract_strided_slice %163 {offsets = [0, 0], sizes = [256, 128], strides = [1, 1]} : vector<768x128xf32> to vector<256x128xf32>
    %cst_69 = arith.constant dense<0.000000e+00> : vector<30x128xf32>
    %173 = tpu.matmul %168, %172, %cst_69 {dimension_numbers = #tpu.dot_dimension_numbers<[1], [0], [0], [1], [0, 0, 1, 1], [], []>} : vector<30x256xf32>, vector<256x128xf32>, vector<30x128xf32> -> vector<30x128xf32>
    %174 = vector.extract_strided_slice %163 {offsets = [256, 0], sizes = [256, 128], strides = [1, 1]} : vector<768x128xf32> to vector<256x128xf32>
    %cst_70 = arith.constant dense<0.000000e+00> : vector<30x128xf32>
    %175 = tpu.matmul %162, %174, %cst_70 {dimension_numbers = #tpu.dot_dimension_numbers<[1], [0], [0], [1], [0, 0, 1, 1], [], []>} : vector<30x256xf32>, vector<256x128xf32>, vector<30x128xf32> -> vector<30x128xf32>
    %176 = arith.addf %173, %175 : vector<30x128xf32>
    %177 = vector.extract_strided_slice %163 {offsets = [512, 0], sizes = [256, 128], strides = [1, 1]} : vector<768x128xf32> to vector<256x128xf32>
    %cst_71 = arith.constant dense<0.000000e+00> : vector<30x128xf32>
    %178 = tpu.matmul %171, %177, %cst_71 {dimension_numbers = #tpu.dot_dimension_numbers<[1], [0], [0], [1], [0, 0, 1, 1], [], []>} : vector<30x256xf32>, vector<256x128xf32>, vector<30x128xf32> -> vector<30x128xf32>
    %179 = arith.addf %176, %178 : vector<30x128xf32>
    %c0_72 = arith.constant 0 : index
    %c0_73 = arith.constant 0 : index
    %180 = vector.load %arg9[%c0_72, %c0_73] : memref<1x128xf32, #tpu.memory_space<vmem>>, vector<1x128xf32>
    %181 = vector.broadcast %180 : vector<1x128xf32> to vector<30x128xf32>
    %182 = arith.addf %179, %181 : vector<30x128xf32>
    %cst_74 = arith.constant 5.000000e-01 : f32
    %183 = vector.broadcast %cst_74 : f32 to vector<30x128xf32>
    %184 = arith.mulf %183, %182 : vector<30x128xf32>
    %cst_75 = arith.constant 0.707106769 : f32
    %185 = vector.broadcast %cst_75 : f32 to vector<30x128xf32>
    %186 = arith.mulf %182, %185 : vector<30x128xf32>
    %cst_76 = arith.constant 0.000000e+00 : f32
    %187 = vector.broadcast %cst_76 : f32 to vector<30x128xf32>
    %188 = arith.cmpf oge, %186, %187 : vector<30x128xf32>
    %cst_77 = arith.constant 1.000000e+00 : f32
    %cst_78 = arith.constant -1.000000e+00 : f32
    %189 = vector.broadcast %cst_77 : f32 to vector<30x128xf32>
    %190 = vector.broadcast %cst_78 : f32 to vector<30x128xf32>
    %191 = arith.select %188, %189, %190 : vector<30x128xi1>, vector<30x128xf32>
    %192 = math.absf %186 : vector<30x128xf32>
    %cst_79 = arith.constant 0.327591091 : f32
    %193 = vector.broadcast %cst_79 : f32 to vector<30x128xf32>
    %194 = arith.mulf %193, %192 : vector<30x128xf32>
    %cst_80 = arith.constant 1.000000e+00 : f32
    %195 = vector.broadcast %cst_80 : f32 to vector<30x128xf32>
    %196 = arith.addf %195, %194 : vector<30x128xf32>
    %cst_81 = arith.constant 1.000000e+00 : f32
    %197 = vector.broadcast %cst_81 : f32 to vector<30x128xf32>
    %198 = arith.divf %197, %196 : vector<30x128xf32>
    %cst_82 = arith.constant 1.06140542 : f32
    %199 = vector.broadcast %cst_82 : f32 to vector<30x128xf32>
    %200 = arith.mulf %199, %198 : vector<30x128xf32>
    %cst_83 = arith.constant 1.45315206 : f32
    %201 = vector.broadcast %cst_83 : f32 to vector<30x128xf32>
    %202 = arith.subf %200, %201 : vector<30x128xf32>
    %203 = arith.mulf %202, %198 : vector<30x128xf32>
    %cst_84 = arith.constant 1.42141378 : f32
    %204 = vector.broadcast %cst_84 : f32 to vector<30x128xf32>
    %205 = arith.addf %203, %204 : vector<30x128xf32>
    %206 = arith.mulf %205, %198 : vector<30x128xf32>
    %cst_85 = arith.constant 0.284496725 : f32
    %207 = vector.broadcast %cst_85 : f32 to vector<30x128xf32>
    %208 = arith.subf %206, %207 : vector<30x128xf32>
    %209 = arith.mulf %208, %198 : vector<30x128xf32>
    %cst_86 = arith.constant 0.254829586 : f32
    %210 = vector.broadcast %cst_86 : f32 to vector<30x128xf32>
    %211 = arith.addf %209, %210 : vector<30x128xf32>
    %212 = arith.mulf %211, %198 : vector<30x128xf32>
    %cst_87 = arith.constant 0.000000e+00 : f32
    %213 = vector.broadcast %cst_87 : f32 to vector<30x128xf32>
    %214 = arith.subf %213, %192 : vector<30x128xf32>
    %215 = arith.mulf %214, %192 : vector<30x128xf32>
    %216 = math.exp %215 : vector<30x128xf32>
    %217 = arith.mulf %212, %216 : vector<30x128xf32>
    %cst_88 = arith.constant 1.000000e+00 : f32
    %218 = vector.broadcast %cst_88 : f32 to vector<30x128xf32>
    %219 = arith.subf %218, %217 : vector<30x128xf32>
    %220 = arith.mulf %191, %219 : vector<30x128xf32>
    %cst_89 = arith.constant 1.000000e+00 : f32
    %221 = vector.broadcast %cst_89 : f32 to vector<30x128xf32>
    %222 = arith.addf %221, %220 : vector<30x128xf32>
    %223 = arith.mulf %184, %222 : vector<30x128xf32>
    %c0_90 = arith.constant 0 : index
    %c0_91 = arith.constant 0 : index
    %224 = vector.load %arg10[%c0_90, %c0_91] : memref<2x30xf32, #tpu.memory_space<vmem>>, vector<2x30xf32>
    %225 = arith.addf %223, %101 : vector<30x128xf32>
    %cst_92 = arith.constant dense<0.000000e+00> : vector<2x128xf32>
    %226 = tpu.matmul %224, %225, %cst_92 {dimension_numbers = #tpu.dot_dimension_numbers<[1], [0], [0], [1], [0, 0, 1, 1], [], []>} : vector<2x30xf32>, vector<30x128xf32>, vector<2x128xf32> -> vector<2x128xf32>
    %c0_93 = arith.constant 0 : index
    %c0_94 = arith.constant 0 : index
    %227 = vector.load %arg11[%c0_93, %c0_94] : memref<128x512xf32, #tpu.memory_space<vmem>>, vector<128x512xf32>
    %cst_95 = arith.constant dense<0.000000e+00> : vector<2x512xf32>
    %228 = tpu.matmul %226, %227, %cst_95 {dimension_numbers = #tpu.dot_dimension_numbers<[1], [0], [0], [1], [0, 0, 1, 1], [], []>} : vector<2x128xf32>, vector<128x512xf32>, vector<2x512xf32> -> vector<2x512xf32>
    %c0_96 = arith.constant 0 : index
    %c0_97 = arith.constant 0 : index
    %229 = vector.load %arg12[%c0_96, %c0_97] : memref<1x512xf32, #tpu.memory_space<vmem>>, vector<1x512xf32>
    %230 = vector.broadcast %229 : vector<1x512xf32> to vector<2x512xf32>
    %231 = arith.addf %228, %230 : vector<2x512xf32>
    %c0_98 = arith.constant 0 : index
    %c0_99 = arith.constant 0 : index
    %232 = vector.load %arg13[%c0_98, %c0_99] : memref<1x512xf32, #tpu.memory_space<vmem>>, vector<1x512xf32>
    %c0_100 = arith.constant 0 : index
    %c0_101 = arith.constant 0 : index
    %233 = vector.load %arg14[%c0_100, %c0_101] : memref<1x512xf32, #tpu.memory_space<vmem>>, vector<1x512xf32>
    %cst_102 = arith.constant dense<0.000000e+00> : vector<2xf32>
    %234 = vector.multi_reduction <add>, %231, %cst_102 [1] : vector<2x512xf32> to vector<2xf32>
    %235 = vector.shape_cast %234 : vector<2xf32> to vector<2x1xf32>
    %cst_103 = arith.constant 5.120000e+02 : f32
    %236 = vector.broadcast %cst_103 : f32 to vector<2x1xf32>
    %237 = arith.divf %235, %236 : vector<2x1xf32>
    %238 = vector.broadcast %237 : vector<2x1xf32> to vector<2x512xf32>
    %239 = arith.subf %231, %238 : vector<2x512xf32>
    %240 = arith.mulf %239, %239 : vector<2x512xf32>
    %cst_104 = arith.constant dense<0.000000e+00> : vector<2xf32>
    %241 = vector.multi_reduction <add>, %240, %cst_104 [1] : vector<2x512xf32> to vector<2xf32>
    %242 = vector.shape_cast %241 : vector<2xf32> to vector<2x1xf32>
    %cst_105 = arith.constant 5.120000e+02 : f32
    %243 = vector.broadcast %cst_105 : f32 to vector<2x1xf32>
    %244 = arith.divf %242, %243 : vector<2x1xf32>
    %cst_106 = arith.constant 9.99999974E-6 : f32
    %245 = vector.broadcast %cst_106 : f32 to vector<2x1xf32>
    %246 = arith.addf %244, %245 : vector<2x1xf32>
    %247 = math.rsqrt %246 : vector<2x1xf32>
    %248 = vector.broadcast %247 : vector<2x1xf32> to vector<2x512xf32>
    %249 = arith.mulf %239, %248 : vector<2x512xf32>
    %250 = vector.broadcast %232 : vector<1x512xf32> to vector<2x512xf32>
    %251 = arith.mulf %249, %250 : vector<2x512xf32>
    %252 = vector.broadcast %233 : vector<1x512xf32> to vector<2x512xf32>
    %253 = arith.addf %251, %252 : vector<2x512xf32>
    %cst_107 = arith.constant 5.000000e-01 : f32
    %254 = vector.broadcast %cst_107 : f32 to vector<2x512xf32>
    %255 = arith.mulf %254, %253 : vector<2x512xf32>
    %cst_108 = arith.constant 0.707106769 : f32
    %256 = vector.broadcast %cst_108 : f32 to vector<2x512xf32>
    %257 = arith.mulf %253, %256 : vector<2x512xf32>
    %cst_109 = arith.constant 0.000000e+00 : f32
    %258 = vector.broadcast %cst_109 : f32 to vector<2x512xf32>
    %259 = arith.cmpf oge, %257, %258 : vector<2x512xf32>
    %cst_110 = arith.constant 1.000000e+00 : f32
    %cst_111 = arith.constant -1.000000e+00 : f32
    %260 = vector.broadcast %cst_110 : f32 to vector<2x512xf32>
    %261 = vector.broadcast %cst_111 : f32 to vector<2x512xf32>
    %262 = arith.select %259, %260, %261 : vector<2x512xi1>, vector<2x512xf32>
    %263 = math.absf %257 : vector<2x512xf32>
    %cst_112 = arith.constant 0.327591091 : f32
    %264 = vector.broadcast %cst_112 : f32 to vector<2x512xf32>
    %265 = arith.mulf %264, %263 : vector<2x512xf32>
    %cst_113 = arith.constant 1.000000e+00 : f32
    %266 = vector.broadcast %cst_113 : f32 to vector<2x512xf32>
    %267 = arith.addf %266, %265 : vector<2x512xf32>
    %cst_114 = arith.constant 1.000000e+00 : f32
    %268 = vector.broadcast %cst_114 : f32 to vector<2x512xf32>
    %269 = arith.divf %268, %267 : vector<2x512xf32>
    %cst_115 = arith.constant 1.06140542 : f32
    %270 = vector.broadcast %cst_115 : f32 to vector<2x512xf32>
    %271 = arith.mulf %270, %269 : vector<2x512xf32>
    %cst_116 = arith.constant 1.45315206 : f32
    %272 = vector.broadcast %cst_116 : f32 to vector<2x512xf32>
    %273 = arith.subf %271, %272 : vector<2x512xf32>
    %274 = arith.mulf %273, %269 : vector<2x512xf32>
    %cst_117 = arith.constant 1.42141378 : f32
    %275 = vector.broadcast %cst_117 : f32 to vector<2x512xf32>
    %276 = arith.addf %274, %275 : vector<2x512xf32>
    %277 = arith.mulf %276, %269 : vector<2x512xf32>
    %cst_118 = arith.constant 0.284496725 : f32
    %278 = vector.broadcast %cst_118 : f32 to vector<2x512xf32>
    %279 = arith.subf %277, %278 : vector<2x512xf32>
    %280 = arith.mulf %279, %269 : vector<2x512xf32>
    %cst_119 = arith.constant 0.254829586 : f32
    %281 = vector.broadcast %cst_119 : f32 to vector<2x512xf32>
    %282 = arith.addf %280, %281 : vector<2x512xf32>
    %283 = arith.mulf %282, %269 : vector<2x512xf32>
    %cst_120 = arith.constant 0.000000e+00 : f32
    %284 = vector.broadcast %cst_120 : f32 to vector<2x512xf32>
    %285 = arith.subf %284, %263 : vector<2x512xf32>
    %286 = arith.mulf %285, %263 : vector<2x512xf32>
    %287 = math.exp %286 : vector<2x512xf32>
    %288 = arith.mulf %283, %287 : vector<2x512xf32>
    %cst_121 = arith.constant 1.000000e+00 : f32
    %289 = vector.broadcast %cst_121 : f32 to vector<2x512xf32>
    %290 = arith.subf %289, %288 : vector<2x512xf32>
    %291 = arith.mulf %262, %290 : vector<2x512xf32>
    %cst_122 = arith.constant 1.000000e+00 : f32
    %292 = vector.broadcast %cst_122 : f32 to vector<2x512xf32>
    %293 = arith.addf %292, %291 : vector<2x512xf32>
    %294 = arith.mulf %255, %293 : vector<2x512xf32>
    %c0_123 = arith.constant 0 : index
    %c0_124 = arith.constant 0 : index
    %295 = vector.load %arg15[%c0_123, %c0_124] : memref<512x256xf32, #tpu.memory_space<vmem>>, vector<512x256xf32>
    %cst_125 = arith.constant dense<0.000000e+00> : vector<2x256xf32>
    %296 = tpu.matmul %294, %295, %cst_125 {dimension_numbers = #tpu.dot_dimension_numbers<[1], [0], [0], [1], [0, 0, 1, 1], [], []>} : vector<2x512xf32>, vector<512x256xf32>, vector<2x256xf32> -> vector<2x256xf32>
    %c0_126 = arith.constant 0 : index
    %c0_127 = arith.constant 0 : index
    %297 = vector.load %arg16[%c0_126, %c0_127] : memref<1x256xf32, #tpu.memory_space<vmem>>, vector<1x256xf32>
    %298 = vector.broadcast %297 : vector<1x256xf32> to vector<2x256xf32>
    %299 = arith.addf %296, %298 : vector<2x256xf32>
    %c0_128 = arith.constant 0 : index
    %c0_129 = arith.constant 0 : index
    %300 = vector.load %arg17[%c0_128, %c0_129] : memref<1x256xf32, #tpu.memory_space<vmem>>, vector<1x256xf32>
    %c0_130 = arith.constant 0 : index
    %c0_131 = arith.constant 0 : index
    %301 = vector.load %arg18[%c0_130, %c0_131] : memref<1x256xf32, #tpu.memory_space<vmem>>, vector<1x256xf32>
    %cst_132 = arith.constant dense<0.000000e+00> : vector<2xf32>
    %302 = vector.multi_reduction <add>, %299, %cst_132 [1] : vector<2x256xf32> to vector<2xf32>
    %303 = vector.shape_cast %302 : vector<2xf32> to vector<2x1xf32>
    %cst_133 = arith.constant 2.560000e+02 : f32
    %304 = vector.broadcast %cst_133 : f32 to vector<2x1xf32>
    %305 = arith.divf %303, %304 : vector<2x1xf32>
    %306 = vector.broadcast %305 : vector<2x1xf32> to vector<2x256xf32>
    %307 = arith.subf %299, %306 : vector<2x256xf32>
    %308 = arith.mulf %307, %307 : vector<2x256xf32>
    %cst_134 = arith.constant dense<0.000000e+00> : vector<2xf32>
    %309 = vector.multi_reduction <add>, %308, %cst_134 [1] : vector<2x256xf32> to vector<2xf32>
    %310 = vector.shape_cast %309 : vector<2xf32> to vector<2x1xf32>
    %cst_135 = arith.constant 2.560000e+02 : f32
    %311 = vector.broadcast %cst_135 : f32 to vector<2x1xf32>
    %312 = arith.divf %310, %311 : vector<2x1xf32>
    %cst_136 = arith.constant 9.99999974E-6 : f32
    %313 = vector.broadcast %cst_136 : f32 to vector<2x1xf32>
    %314 = arith.addf %312, %313 : vector<2x1xf32>
    %315 = math.rsqrt %314 : vector<2x1xf32>
    %316 = vector.broadcast %315 : vector<2x1xf32> to vector<2x256xf32>
    %317 = arith.mulf %307, %316 : vector<2x256xf32>
    %318 = vector.broadcast %300 : vector<1x256xf32> to vector<2x256xf32>
    %319 = arith.mulf %317, %318 : vector<2x256xf32>
    %320 = vector.broadcast %301 : vector<1x256xf32> to vector<2x256xf32>
    %321 = arith.addf %319, %320 : vector<2x256xf32>
    %322 = arith.mulf %321, %321 : vector<2x256xf32>
    %cst_137 = arith.constant dense<0.000000e+00> : vector<2xf32>
    %323 = vector.multi_reduction <add>, %322, %cst_137 [1] : vector<2x256xf32> to vector<2xf32>
    %324 = vector.shape_cast %323 : vector<2xf32> to vector<2x1xf32>
    %cst_138 = arith.constant 1.000000e-24 : f32
    %325 = vector.broadcast %cst_138 : f32 to vector<2x1xf32>
    %326 = arith.maximumf %324, %325 : vector<2x1xf32>
    %327 = math.rsqrt %326 : vector<2x1xf32>
    %328 = vector.broadcast %327 : vector<2x1xf32> to vector<2x256xf32>
    %329 = arith.mulf %321, %328 : vector<2x256xf32>
    %c0_139 = arith.constant 0 : index
    %c0_140 = arith.constant 0 : index
    %330 = vector.load %arg19[%c0_139, %c0_140] : memref<2x256xf32, #tpu.memory_space<vmem>>, vector<2x256xf32>
    tpu.vector_store %arg19[%c0_139, %c0_140], %329 {strides = array<i32>} : memref<2x256xf32, #tpu.memory_space<vmem>>, vector<2x256xf32>,
    return
  }
  func.func @transform_0(%arg0: i32) -> (i32, i32) {
    %c0_i32 = arith.constant 0 : i32
    %c0_i32_0 = arith.constant 0 : i32
    return %arg0, %c0_i32 : i32, i32
  }
  func.func @transform_1(%arg0: i32) -> (i32, i32) {
    %c0_i32 = arith.constant 0 : i32
    %c0_i32_0 = arith.constant 0 : i32
    %c0_i32_1 = arith.constant 0 : i32
    return %c0_i32, %c0_i32_0 : i32, i32
  }
  func.func @transform_2(%arg0: i32) -> (i32, i32) {
    %c0_i32 = arith.constant 0 : i32
    %c0_i32_0 = arith.constant 0 : i32
    %c0_i32_1 = arith.constant 0 : i32
    return %c0_i32, %c0_i32_0 : i32, i32
  }
  func.func @transform_3(%arg0: i32) -> (i32, i32) {
    %c0_i32 = arith.constant 0 : i32
    %c0_i32_0 = arith.constant 0 : i32
    %c0_i32_1 = arith.constant 0 : i32
    return %c0_i32, %c0_i32_0 : i32, i32
  }
  func.func @transform_4(%arg0: i32) -> (i32, i32) {
    %c0_i32 = arith.constant 0 : i32
    %c0_i32_0 = arith.constant 0 : i32
    %c0_i32_1 = arith.constant 0 : i32
    return %c0_i32, %c0_i32_0 : i32, i32
  }
  func.func @transform_5(%arg0: i32) -> (i32, i32) {
    %c0_i32 = arith.constant 0 : i32
    %c0_i32_0 = arith.constant 0 : i32
    %c0_i32_1 = arith.constant 0 : i32
    return %c0_i32, %c0_i32_0 : i32, i32
  }
  func.func @transform_6(%arg0: i32) -> (i32, i32) {
    %c0_i32 = arith.constant 0 : i32
    %c0_i32_0 = arith.constant 0 : i32
    %c0_i32_1 = arith.constant 0 : i32
    return %c0_i32, %c0_i32_0 : i32, i32
  }
  func.func @transform_7(%arg0: i32) -> (i32, i32) {
    %c0_i32 = arith.constant 0 : i32
    %c0_i32_0 = arith.constant 0 : i32
    %c0_i32_1 = arith.constant 0 : i32
    return %c0_i32, %c0_i32_0 : i32, i32
  }
  func.func @transform_8(%arg0: i32) -> (i32, i32) {
    %c0_i32 = arith.constant 0 : i32
    %c0_i32_0 = arith.constant 0 : i32
    %c0_i32_1 = arith.constant 0 : i32
    return %c0_i32, %c0_i32_0 : i32, i32
  }
  func.func @transform_9(%arg0: i32) -> (i32, i32) {
    %c0_i32 = arith.constant 0 : i32
    %c0_i32_0 = arith.constant 0 : i32
    %c0_i32_1 = arith.constant 0 : i32
    return %c0_i32, %c0_i32_0 : i32, i32
  }
  func.func @transform_10(%arg0: i32) -> (i32, i32) {
    %c0_i32 = arith.constant 0 : i32
    %c0_i32_0 = arith.constant 0 : i32
    %c0_i32_1 = arith.constant 0 : i32
    return %c0_i32, %c0_i32_0 : i32, i32
  }
  func.func @transform_11(%arg0: i32) -> (i32, i32) {
    %c0_i32 = arith.constant 0 : i32
    %c0_i32_0 = arith.constant 0 : i32
    %c0_i32_1 = arith.constant 0 : i32
    return %c0_i32, %c0_i32_0 : i32, i32
  }
  func.func @transform_12(%arg0: i32) -> (i32, i32) {
    %c0_i32 = arith.constant 0 : i32
    %c0_i32_0 = arith.constant 0 : i32
    %c0_i32_1 = arith.constant 0 : i32
    return %c0_i32, %c0_i32_0 : i32, i32
  }
  func.func @transform_13(%arg0: i32) -> (i32, i32) {
    %c0_i32 = arith.constant 0 : i32
    %c0_i32_0 = arith.constant 0 : i32
    %c0_i32_1 = arith.constant 0 : i32
    return %c0_i32, %c0_i32_0 : i32, i32
  }
  func.func @transform_14(%arg0: i32) -> (i32, i32) {
    %c0_i32 = arith.constant 0 : i32
    %c0_i32_0 = arith.constant 0 : i32
    %c0_i32_1 = arith.constant 0 : i32
    return %c0_i32, %c0_i32_0 : i32, i32
  }
  func.func @transform_15(%arg0: i32) -> (i32, i32) {
    %c0_i32 = arith.constant 0 : i32
    %c0_i32_0 = arith.constant 0 : i32
    %c0_i32_1 = arith.constant 0 : i32
    return %c0_i32, %c0_i32_0 : i32, i32
  }
  func.func @transform_16(%arg0: i32) -> (i32, i32) {
    %c0_i32 = arith.constant 0 : i32
    %c0_i32_0 = arith.constant 0 : i32
    %c0_i32_1 = arith.constant 0 : i32
    return %c0_i32, %c0_i32_0 : i32, i32
  }
  func.func @transform_17(%arg0: i32) -> (i32, i32) {
    %c0_i32 = arith.constant 0 : i32
    %c0_i32_0 = arith.constant 0 : i32
    %c0_i32_1 = arith.constant 0 : i32
    return %c0_i32, %c0_i32_0 : i32, i32
  }
  func.func @transform_18(%arg0: i32) -> (i32, i32) {
    %c0_i32 = arith.constant 0 : i32
    %c0_i32_0 = arith.constant 0 : i32
    return %arg0, %c0_i32 : i32, i32
  }
}

</mosaic_0001>

<bundles_post_ra>
// kernel: tpu_custom_call.1
= control target key start
LH: loop header
LB: loop body
LE: loop exit
PB: predicated region body
PF: predicated region fallthrough
CT: control target
= control target key end

     0   :  { %s4638_s0 = inlined_call_operand.vmem [shape: f32[30,16], index: 0, kind: input, shape index: {}]   ;;  %s4639_s1 = inlined_call_operand.vmem [shape: f32[30,1], index: 1, kind: input, shape index: {}]   ;;  %s4640_s2 = inlined_call_operand.vmem [shape: f32[30,1], index: 2, kind: input, shape index: {}]   ;;  %s4641_s3 = inlined_call_operand.vmem [shape: f32[48,256], index: 3, kind: input, shape index: {}]   ;;  %s4642_s4 = inlined_call_operand.vmem [shape: f32[1,256], index: 4, kind: input, shape index: {}]   ;;  %s4643_s5 = inlined_call_operand.hbm [shape: f32[384,256], index: 5, kind: input, shape index: {}]   ;;  %s4644_s6 = inlined_call_operand.vmem [shape: f32[1,256], index: 6, kind: input, shape index: {}]   ;;  %s4645_s7 = inlined_call_operand.hbm [shape: f32[768,128], index: 7, kind: input, shape index: {}]   ;;  %s4646_s8 = inlined_call_operand.vmem [shape: f32[1,128], index: 8, kind: input, shape index: {}]   ;;  %s4647_s9 = inlined_call_operand.vmem [shape: f32[2,30], index: 9, kind: input, shape index: {}]   ;;  %s4648_s10 = inlined_call_operand.hbm [shape: f32[128,512], index: 10, kind: input, shape index: {}]   ;;  %s4649_s11 = inlined_call_operand.vmem [shape: f32[1,512], index: 11, kind: input, shape index: {}]   ;;  %s4650_s12 = inlined_call_operand.vmem [shape: f32[1,512], index: 12, kind: input, shape index: {}]   ;;  %s4651_s13 = inlined_call_operand.vmem [shape: f32[1,512], index: 13, kind: input, shape index: {}]   ;;  %s4652_s14 = inlined_call_operand.hbm [shape: f32[512,256], index: 14, kind: input, shape index: {}]   ;;  %s4653_s15 = inlined_call_operand.vmem [shape: f32[1,256], index: 15, kind: input, shape index: {}]   ;;  %s4654_s16 = inlined_call_operand.vmem [shape: f32[1,256], index: 16, kind: input, shape index: {}]   ;;  %s4655_s17 = inlined_call_operand.vmem [shape: f32[1,256], index: 17, kind: input, shape index: {}]   ;;  %s4656_s18 = inlined_call_operand.hbm [shape: f32[2,256], index: 18, kind: output, shape index: {}]  }
   0x1   :  { %4689 = sst [smem:[#allocation32_spill]] %s4638_s0 }
   0x2   :  { %4690 = sst [smem:[#allocation33_spill]] %s4639_s1 }
   0x3   :  { %4691 = sst [smem:[#allocation34_spill]] %s4640_s2 }
   0x4   :  { %23 = vsyncpa [#allocation3], 0 }
   0x5   :  { %24 = vsyncpa [#allocation6], 0 }
   0x6   :  { %25 = vsyncpa [#allocation9], 0 }
   0x7   :  { %26 = vsyncpa [#allocation4], 0  ;;  %s3537_s27 = smov [#allocation5]   ;;  %s3419_s0 = scalar_lea.hbm %s4645_s7, 12288 }
   0x8   :  { %s56_s28 = sshll.u32 %s3537_s27, 4  ;;  %p3420_p0 = scmp.ne.s32.totalorder %s4645_s7, %s3419_s0  ;;  %s57_s28 = int_to_ptr.vmem [resolvable:$true] %s56_s28 }
   0x9   :  { %p3423_p1 = scmp.lt.u32.totalorder %s3419_s0, %s4645_s7 }
   0xb   :  { %p3425_p2 = pnand %p3423_p1, %p3420_p0 }
   0xd   :  { %3428 = shalt.err (!%p3425_p2)
}
   0xe   :  { %s3429_s22 = scalar_lea.vmem %s57_s28, 12288  ;;  %p3434_p4 = scmp.lt.s32.totalorder %s57_s28, %s57_s28 }
   0xf   :  { %p3430_p3 = scmp.ne.s32.totalorder %s57_s28, %s3429_s22  ;;  %p3435_p5 = scmp.lt.s32.totalorder %s3429_s22, %s3429_s22 }
  0x11   :  { %p3436_p6 = por %p3435_p5, %p3434_p4 }
  0x13   :  { %p3437_p7 = pnand %p3436_p6, %p3430_p3 }
  0x15   :  { %3440 = shalt.err (!%p3437_p7)
}
  0x16   :  { %s3538_s2 = smov 128   ;;  %s3539_s23 = smov 8  }
  0x17   :  { %62 = dma.hbm_to_vmem [thread:$0]  %s4645_s7, 12288, %s57_s28, [#allocation6], %s3538_s2, %s3538_s2, %s3539_s23  }
  0x18   :  { %s3540_s26 = smov [#allocation2]   ;;  %s3441_s0 = scalar_lea.hbm %s4643_s5, 12288 }
  0x19   :  { %s42_s27 = sshll.u32 %s3540_s26, 4  ;;  %p3442_p8 = scmp.ne.s32.totalorder %s4643_s5, %s3441_s0  ;;  %s43_s27 = int_to_ptr.vmem [resolvable:$true] %s42_s27 }
  0x1a   :  { %p3445_p9 = scmp.lt.u32.totalorder %s3441_s0, %s4643_s5 }
  0x1c   :  { %p3447_p10 = pnand %p3445_p9, %p3442_p8 }
  0x1e   :  { %3450 = shalt.err (!%p3447_p10)
}
  0x1f   :  { %s3451_s22 = scalar_lea.vmem %s43_s27, 12288  ;;  %p3456_p12 = scmp.lt.s32.totalorder %s43_s27, %s43_s27 }
  0x20   :  { %p3452_p11 = scmp.ne.s32.totalorder %s43_s27, %s3451_s22  ;;  %p3457_p13 = scmp.lt.s32.totalorder %s3451_s22, %s3451_s22 }
  0x22   :  { %p3458_p0 = por %p3457_p13, %p3456_p12 }
  0x24   :  { %p3459_p1 = pnand %p3458_p0, %p3452_p11 }
  0x26   :  { %3462 = shalt.err (!%p3459_p1)
}
  0x27   :  { %s3541_s7 = smov 256   ;;  %s3542_s28 = smov 16  }
  0x28   :  { %48 = dma.hbm_to_vmem [thread:$0]  %s4643_s5, 12288, %s43_s27, [#allocation3], %s3541_s7, %s3541_s7, %s3542_s28  }
  0x29   :  { %s3543_s24 = smov [#allocation7]   ;;  %s3463_s30 = scalar_lea.hbm %s4648_s10, 8192 }
  0x2a   :  { %s72_s25 = sshll.u32 %s3543_s24, 4  ;;  %p3464_p2 = scmp.ne.s32.totalorder %s4648_s10, %s3463_s30  ;;  %s73_s25 = int_to_ptr.vmem [resolvable:$true] %s72_s25 }
  0x2b   :  { %p3467_p3 = scmp.lt.u32.totalorder %s3463_s30, %s4648_s10 }
  0x2d   :  { %p3469_p4 = pnand %p3467_p3, %p3464_p2 }
  0x2f   :  { %3472 = shalt.err (!%p3469_p4)
}
  0x30   :  { %s3473_s21 = scalar_lea.vmem %s73_s25, 8192  ;;  %p3478_p6 = scmp.lt.s32.totalorder %s73_s25, %s73_s25 }
  0x31   :  { %p3474_p5 = scmp.ne.s32.totalorder %s73_s25, %s3473_s21  ;;  %p3479_p7 = scmp.lt.s32.totalorder %s3473_s21, %s3473_s21 }
  0x33   :  { %p3480_p8 = por %p3479_p7, %p3478_p6 }
  0x35   :  { %p3481_p9 = pnand %p3480_p8, %p3474_p5 }
  0x37   :  { %3484 = shalt.err (!%p3481_p9)
}
  0x38   :  { %s3544_s5 = smov 512   ;;  %s3545_s27 = smov 32  }
  0x39   :  { %78 = dma.hbm_to_vmem [thread:$0]  %s4648_s10, 8192, %s73_s25, [#allocation6], %s3544_s5, %s3544_s5, %s3545_s27  }
  0x3a   :  { %s3546_s23 = smov [#allocation8]   ;;  %s3485_s30 = scalar_lea.hbm %s4652_s14, 16384 }
  0x3b   :  { %s90_s24 = sshll.u32 %s3546_s23, 4  ;;  %p3486_p10 = scmp.ne.s32.totalorder %s4652_s14, %s3485_s30  ;;  %s91_s24 = int_to_ptr.vmem [resolvable:$true] %s90_s24 }
  0x3c   :  { %p3489_p11 = scmp.lt.u32.totalorder %s3485_s30, %s4652_s14 }
  0x3e   :  { %p3491_p12 = pnand %p3489_p11, %p3486_p10 }
  0x40   :  { %3494 = shalt.err (!%p3491_p12)
}
  0x41   :  { %s3495_s21 = scalar_lea.vmem %s91_s24, 16384  ;;  %p3500_p0 = scmp.lt.s32.totalorder %s91_s24, %s91_s24 }
  0x42   :  { %p3496_p13 = scmp.ne.s32.totalorder %s91_s24, %s3495_s21  ;;  %p3501_p1 = scmp.lt.s32.totalorder %s3495_s21, %s3495_s21 }
  0x44   :  { %p3502_p2 = por %p3501_p1, %p3500_p0 }
  0x46   :  { %p3503_p3 = pnand %p3502_p2, %p3496_p13 }
  0x48   :  { %3506 = shalt.err (!%p3503_p3)
}
  0x49   :  { %96 = dma.hbm_to_vmem [thread:$0]  %s4652_s14, 16384, %s91_s24, [#allocation9], %s3541_s7, %s3541_s7, %s3542_s28  }
  0x4a   :  { %3529 = dma.done.wait [#allocation3], 12288  }
  0x4b   :  { %3530 = vsyncadd [#allocation3], 4294955008 }
  0x4c   :  { %3531 = dma.done.wait [#allocation6], 20480  }
  0x4d   :  { %3532 = vsyncadd [#allocation6], 4294946816 }
  0x4e   :  { %3533 = dma.done.wait [#allocation9], 16384  }
  0x4f   :  { %3534 = vsyncadd [#allocation9], 4294950912  ;;  %v3547_v0 = vmov 0   ;;  %s4692_s2 = sld [smem:[#allocation34_spill]]  ;;  %s4693_s19 = sld [smem:[#allocation33_spill]]  ;;  %v249_v9 = vld [vmem:[%s4641_s3 + $0x8] sm:$0xff] }
  0x50   :  { %3316 = vset.pattern.permute.xlu1 %v3547_v0  ;;  %3315 = vset.pattern.permute.xlu0 %v3547_v0  ;;  %s4694_s21 = sld [smem:[#allocation32_spill]]  ;;  %v251_v10 = vld [vmem:[%s4641_s3 + $0x18] sm:$0xff]  ;;  %v248_v11 = vld [vmem:[%s4641_s3] sm:$0xff]  ;;  %v250_v13 = vld [vmem:[%s4641_s3 + $0x10] sm:$0xff]  ;;  %vm131_vm0 = vcmask 1040384   ;;  %v4660_v36 = vmov 0.0  }
  0x51   :  { %v2875_v12 = vpack.c.bf16 %v251_v10, %v249_v9  ;;  %v253_v14 = vld [vmem:[%s4641_s3 + $0x28] sm:$0xff]  ;;  %v255_v15 = vld [vmem:[%s4641_s3 + $0x38] sm:$0xff]  ;;  %v2877_v16 = vpack.c.bf16 %v250_v13, %v248_v11  ;;  %v252_v18 = vld [vmem:[%s4641_s3 + $0x20] sm:$0xff]  ;;  %349 = vmatprep.mubr.f32.mxu0 %v4660_v36  ;;  %779 = vmatprep.mubr.f32.mxu1 %v4660_v36  ;;  %vm144_vm1 = vcmask 1046528   ;;  %vm186_vm2 = vcmask 1041408  }
  0x52   :  { %v2879_v17 = vpack.c.bf16 %v255_v15, %v253_v14  ;;  %v254_v19 = vld [vmem:[%s4641_s3 + $0x30] sm:$0xff]  ;;  %v257_v20 = vld [vmem:[%s4641_s3 + $0x48] sm:$0xff]  ;;  %v259_v21 = vld [vmem:[%s4641_s3 + $0x58] sm:$0xff]  ;;  %vm218_vm3 = vcmask 1045504   ;;  %vm238_vm4 = vcmask 130048   ;;  %vm243_vm5 = vcmask 261120  }
  0x53   :  { %2876 = vmatprep.subr.bf16.mxu0 %v2875_v12  ;;  %v2881_v22 = vpack.c.bf16 %v254_v19, %v252_v18  ;;  %v2883_v23 = vpack.c.bf16 %v259_v21, %v257_v20  ;;  %v256_v24 = vld [vmem:[%s4641_s3 + $0x40] sm:$0xff]  ;;  %v258_v25 = vld [vmem:[%s4641_s3 + $0x50] sm:$0xff]  ;;  %vm272_vm6 = vcmask 392192  }
  0x54   :  { %2878 = vmatpush1.bf16.msra.mxu0 %v2877_v16  ;;  %v2885_v26 = vpack.c.bf16 %v258_v25, %v256_v24  ;;  %v629_v24 = vld [vmem:[#allocation2 + $0x118] sm:$0xff] }
  0x55   :  { %v125_v1 = vld [vmem:[%s4692_s2 + $0x10] sm:$0xff]  ;;  %v123_v2 = vld [vmem:[%s4692_s2] sm:$0xff]  ;;  %v126_v3 = vld [vmem:[%s4692_s2 + $0x18] sm:$0x3f]  ;;  %2880 = vmatprep.subr.bf16.mxu0 %v2879_v17 }
  0x56   :  { %180 = vperm.xlu1 %3316, %v125_v1   ;;  %172 = vperm.xlu0 %3315, %v123_v2   ;;  %v124_v4 = vld [vmem:[%s4692_s2 + $0x8] sm:$0xff]  ;;  %v119_v5 = vld [vmem:[%s4693_s19] sm:$0xff]  ;;  %v122_v8 = vld [vmem:[%s4693_s19 + $0x18] sm:$0x3f] }
  0x57   :  { %v115_v6 = vld [vmem:[%s4694_s21] sm:$0xff]  ;;  %v120_v7 = vld [vmem:[%s4693_s19 + $0x8] sm:$0xff]  ;;  %v117_v27 = vld [vmem:[%s4694_s21 + $0x10] sm:$0xff] }
  0x58   :  { %2882 = vmatpush1.bf16.msra.mxu0 %v2881_v22  ;;  %v118_v28 = vld [vmem:[%s4694_s21 + $0x18] sm:$0x3f]  ;;  %v116_v29 = vld [vmem:[%s4694_s21 + $0x8] sm:$0xff]  ;;  %v135_v30 = vrot.slane %v117_v27, 7  ;;  %v132_v32 = vrot.slane %v115_v6, 7  ;;  %v121_v61 = vld [vmem:[%s4693_s19 + $0x10] sm:$0xff] }
  0x59   :  { %2884 = vmatprep.subr.bf16.mxu0 %v2883_v23  ;;  %v137_v31 = vrot.slane %v118_v28, 7  ;;  %v133_v33 = vrot.slane %v116_v29, 7  ;;  %v627_v23 = vld [vmem:[#allocation2 + $0x108] sm:$0xff] }
  0x5a   :  { %184 = vperm.xlu1 %3316, %v126_v3   ;;  %176 = vperm.xlu0 %3315, %v124_v4   ;;  %v143_v39 = vsel %vm131_vm0, 0.0, %v132_v32  ;;  %v2887_v25 = vpack.c.bf16 %v629_v24, %v627_v23 }
  0x5b   :  { %v138_v38 = vsel %vm131_vm0, %v135_v30, %v137_v31  ;;  %v134_v41 = vsel %vm131_vm0, %v132_v32, %v133_v33  ;;  %v136_v46 = vsel %vm131_vm0, %v133_v33, %v135_v30  ;;  %v633_v30 = vld [vmem:[#allocation2 + $0x138] sm:$0xff]  ;;  %v630_v32 = vld [vmem:[#allocation2 + $0x120] sm:$0xff]  ;;  %v632_v33 = vld [vmem:[#allocation2 + $0x130] sm:$0xff] }
  0x5c   :  { %2886 = vmatpush1.bf16.msra.mxu0 %v2885_v26  ;;  %v145_v47 = vsel %vm144_vm1, %v138_v38, 0.0  ;;  %v626_v26 = vld [vmem:[#allocation2 + $0x100] sm:$0xff]  ;;  %2888 = vmatprep.subr.bf16.mxu1 %v2887_v25  ;;  %v637_v38 = vld [vmem:[#allocation2 + $0x158] sm:$0xff] }
  0x5e   :  { %148 = vperm.xlu0 %3315, %v119_v5   ;;  %202 = vrot.lane.b32.xlu1 %v115_v6, %s3542_s28 }
  0x62   :  { %153 = vperm.xlu1 %3316, %v120_v7  }
  0x66   :  { %163 = vperm.xlu1 %3316, %v122_v8  }
  0xd5   :  { %v181_v34 = vpop.permute.xlu1 %180  ;;  %v173_v35 = vpop.permute.xlu0 %172 }
  0xd6   :  { %v3776_v37 = vrot.slane %v173_v35, 6  ;;  %v190_v40 = vrot.slane %v181_v34, 6  ;;  %v2893_v34 = vpack.c.bf16 %v632_v33, %v630_v32  ;;  %v635_v35 = vld [vmem:[#allocation2 + $0x148] sm:$0xff] }
  0xd8   :  { %v198_v48 = vmul.f32 %v3776_v37, %v143_v39 }
  0xd9   :  { %v185_v42 = vpop.permute.xlu1 %184  ;;  %v177_v43 = vpop.permute.xlu0 %176 }
  0xda   :  { %v192_v44 = vrot.slane %v185_v42, 6  ;;  %v188_v45 = vrot.slane %v177_v43, 6  ;;  %v219_v57 = vrot.slane %v198_v48, 2  ;;  %v639_v43 = vld [vmem:[#allocation2 + $0x168] sm:$0xff] }
  0xdc   :  { %v3785_v49 = vsel %vm186_vm2, %v190_v40, %v192_v44  ;;  %v3789_v50 = vsel %vm186_vm2, %v3776_v37, %v188_v45  ;;  %v3792_v51 = vsel %vm186_vm2, %v188_v45, %v190_v40  ;;  %v634_v40 = vld [vmem:[#allocation2 + $0x140] sm:$0xff]  ;;  %v641_v44 = vld [vmem:[#allocation2 + $0x178] sm:$0xff] }
  0xdd   :  { %4695 = vst [vmem:[#allocation15_spill] sm:$0xff] %v3785_v49  ;;  %v199_v52 = vmul.f32 %v3789_v50, %v134_v41  ;;  %v200_v53 = vmul.f32 %v3792_v51, %v136_v46  ;;  %v201_v54 = vmul.f32 %v3785_v49, %v145_v47  ;;  %v3810_v63 = vpop.permute.xlu0 %148  ;;  %v203_v1 = vpop.permute.xlu1 %202  ;;  %v2899_v45 = vpack.c.bf16 %v641_v44, %v639_v43 }
  0xde   :  { %4696 = vst [vmem:[#allocation16_spill] sm:$0xff] %v3810_v63  ;;  %v166_v0 = vmul.f32 %v3810_v63, %v143_v39  ;;  %v2895_v39 = vpack.c.bf16 %v637_v38, %v635_v35 }
  0xdf   :  { %v220_v55 = vrot.slane %v199_v52, 2  ;;  %v222_v56 = vrot.slane %v200_v53, 2  ;;  %v224_v60 = vrot.slane %v201_v54, 2  ;;  %v643_v52 = vld [vmem:[#allocation2 + $0x188] sm:$0xff]  ;;  %v645_v53 = vld [vmem:[#allocation2 + $0x198] sm:$0xff] }
  0xe0   :  { %v239_v2 = vsel %vm238_vm4, %v166_v0, %v203_v1  ;;  %v2903_v54 = vpack.c.bf16 %v645_v53, %v643_v52  ;;  %v651_v1 = vld [vmem:[#allocation2 + $0x1c8] sm:$0xff] }
  0xe1   :  { %v223_v58 = vsel %vm218_vm3, %v220_v55, %v222_v56  ;;  %v221_v59 = vsel %vm218_vm3, %v219_v57, %v220_v55  ;;  %v225_v62 = vsel %vm218_vm3, %v222_v56, %v224_v60  ;;  %v3817_v5 = vpop.permute.xlu1 %153  ;;  %v642_v55 = vld [vmem:[#allocation2 + $0x180] sm:$0xff]  ;;  %v644_v56 = vld [vmem:[#allocation2 + $0x190] sm:$0xff] }
  0xe2   :  { %228 = vrot.lane.b32.xlu1 %v223_v58, %s3545_s27  ;;  %226 = vrot.lane.b32.xlu0 %v221_v59, %s3545_s27  ;;  %4697 = vst [vmem:[#allocation17_spill] sm:$0xff] %v3817_v5  ;;  %v167_v8 = vmul.f32 %v3817_v5, %v134_v41  ;;  %v636_v41 = vld [vmem:[#allocation2 + $0x150] sm:$0xff]  ;;  %v2905_v57 = vpack.c.bf16 %v644_v56, %v642_v55  ;;  %v647_v58 = vld [vmem:[#allocation2 + $0x1a8] sm:$0xff]  ;;  %v649_v59 = vld [vmem:[#allocation2 + $0x1b8] sm:$0xff] }
  0xe3   :  { %v2897_v42 = vpack.c.bf16 %v636_v41, %v634_v40 }
  0xe5   :  { %v3819_v6 = vpop.permute.xlu1 %163 }
  0xe6   :  { %230 = vrot.lane.b32.xlu1 %v225_v62, %s3545_s27  ;;  %158 = vperm.xlu0 %3315, %v121_v61   ;;  %4698 = vst [vmem:[#allocation18_spill] sm:$0xff] %v3819_v6  ;;  %v169_v18 = vmul.f32 %v3819_v6, %v145_v47  ;;  %v640_v47 = vld [vmem:[#allocation2 + $0x170] sm:$0xff]  ;;  %v646_v61 = vld [vmem:[#allocation2 + $0x1a0] sm:$0xff] }
  0xe7   :  { %v648_v62 = vld [vmem:[#allocation2 + $0x1b0] sm:$0xff] }
  0xe8   :  { %v2909_v0 = vpack.c.bf16 %v648_v62, %v646_v61 }
  0xea   :  { %232 = vrot.lane.b32.xlu1 %v224_v60, %s3545_s27  ;;  %204 = vrot.lane.b32.xlu0 %v116_v29, %s3542_s28  ;;  %v631_v29 = vld [vmem:[#allocation2 + $0x128] sm:$0xff]  ;;  %v2907_v60 = vpack.c.bf16 %v649_v59, %v647_v58 }
  0xeb   :  { %v2891_v31 = vpack.c.bf16 %v633_v30, %v631_v29 }
  0xee   :  { %206 = vrot.lane.b32.xlu0 %v117_v27, %s3542_s28  ;;  %v628_v27 = vld [vmem:[#allocation2 + $0x110] sm:$0xff] }
  0xf2   :  { %208 = vrot.lane.b32.xlu0 %v118_v28, %s3542_s28  ;;  %v2889_v28 = vpack.c.bf16 %v628_v27, %v626_v26 }
  0xf4   :  { %2890 = vmatpush1.bf16.msra.mxu1 %v2889_v28 }
  0xf5   :  { %2892 = vmatprep.subr.bf16.mxu1 %v2891_v31 }
  0xf8   :  { %2894 = vmatpush1.bf16.msra.mxu1 %v2893_v34 }
  0xf9   :  { %2896 = vmatprep.subr.bf16.mxu1 %v2895_v39 }
  0xfc   :  { %2898 = vmatpush1.bf16.msra.mxu1 %v2897_v42 }
  0xfd   :  { %2900 = vmatprep.subr.bf16.mxu1 %v2899_v45 }
 0x154   :  { %v227_v3 = vpop.permute.xlu0 %226  ;;  %v229_v9 = vpop.permute.xlu1 %228 }
 0x155   :  { %v244_v4 = vsel %vm243_vm5, %v239_v2, %v227_v3  ;;  %v653_v2 = vld [vmem:[#allocation2 + $0x1d8] sm:$0xff] }
 0x156   :  { %2671 = vmatmul.mubr.msk.f32.vlgmr.msra.gmra.mrb[0].mxu0 %vm272_vm6, %v244_v4  ;;  %v2911_v3 = vpack.c.bf16 %v653_v2, %v651_v1  ;;  %v650_v4 = vld [vmem:[#allocation2 + $0x1c0] sm:$0xff] }
 0x157   :  { %355 = vmatprep.mubr.f32.mxu0 %v4660_v36 }
 0x158   :  { %v231_v15 = vpop.permute.xlu1 %230 }
 0x15c   :  { %v233_v20 = vpop.permute.xlu1 %232 }
 0x165   :  { %v3821_v7 = vpop.permute.xlu0 %158 }
 0x166   :  { %4699 = vst [vmem:[#allocation19_spill] sm:$0xff] %v3821_v7  ;;  %v168_v13 = vmul.f32 %v3821_v7, %v136_v46  ;;  %v638_v46 = vld [vmem:[#allocation2 + $0x160] sm:$0xff] }
 0x167   :  { %v2901_v48 = vpack.c.bf16 %v640_v47, %v638_v46 }
 0x169   :  { %v205_v10 = vpop.permute.xlu0 %204  ;;  %2902 = vmatpush1.bf16.msra.mxu1 %v2901_v48 }
 0x16a   :  { %v240_v11 = vsel %vm238_vm4, %v167_v8, %v205_v10  ;;  %2904 = vmatprep.subr.bf16.mxu1 %v2903_v54  ;;  %v652_v8 = vld [vmem:[#allocation2 + $0x1d0] sm:$0xff]  ;;  %v655_v10 = vld [vmem:[#allocation2 + $0x1e8] sm:$0xff] }
 0x16b   :  { %v245_v12 = vsel %vm243_vm5, %v240_v11, %v229_v9  ;;  %v2913_v9 = vpack.c.bf16 %v652_v8, %v650_v4  ;;  %v657_v11 = vld [vmem:[#allocation2 + $0x1f8] sm:$0xff] }
 0x16c   :  { %2672 = vmatmul.mubr.msk.f32.gmra.mrb[2].mxu0 %vm272_vm6, %v245_v12  ;;  %v2915_v12 = vpack.c.bf16 %v657_v11, %v655_v10 }
 0x16d   :  { %v207_v14 = vpop.permute.xlu0 %206  ;;  %361 = vmatprep.mubr.f32.mxu0 %v4660_v36  ;;  %2906 = vmatpush1.bf16.msra.mxu1 %v2905_v57 }
 0x16e   :  { %v241_v16 = vsel %vm238_vm4, %v168_v13, %v207_v14  ;;  %2908 = vmatprep.subr.bf16.mxu1 %v2907_v60  ;;  %v654_v13 = vld [vmem:[#allocation2 + $0x1e0] sm:$0xff]  ;;  %v656_v14 = vld [vmem:[#allocation2 + $0x1f0] sm:$0xff] }
 0x16f   :  { %v246_v17 = vsel %vm243_vm5, %v241_v16, %v231_v15  ;;  %v2917_v15 = vpack.c.bf16 %v656_v14, %v654_v13  ;;  %v595_v16 = vld [vmem:[#allocation2 + $0x8] sm:$0xff] }
 0x170   :  { %2673 = vmatmul.mubr.msk.f32.gmra.mrb[4].mxu0 %vm272_vm6, %v246_v17  ;;  %v597_v17 = vld [vmem:[#allocation2 + $0x18] sm:$0xff] }
 0x171   :  { %v209_v19 = vpop.permute.xlu0 %208  ;;  %367 = vmatprep.mubr.f32.mxu0 %v4660_v36  ;;  %2910 = vmatpush1.bf16.msra.mxu1 %v2909_v0 }
 0x172   :  { %v242_v21 = vsel %vm238_vm4, %v169_v18, %v209_v19  ;;  %2912 = vmatprep.subr.bf16.mxu1 %v2911_v3  ;;  %v2919_v18 = vpack.c.bf16 %v597_v17, %v595_v16  ;;  %v262_v19 = vlaneseq }
 0x173   :  { %v247_v22 = vsel %vm243_vm5, %v242_v21, %v233_v20 }
 0x174   :  { %2674 = vmatmul.mubr.msk.f32.gmra.mrb[6].mxu0 %vm272_vm6, %v247_v22  ;;  %v3837_v20 = vshrl.u32 %v262_v19, 7  ;;  %v260_v22 = vld [vmem:[%s4642_s4] sm:$0x3] }
 0x175   :  { %2914 = vmatpush1.bf16.msra.mxu1 %v2913_v9 }
 0x176   :  { %2916 = vmatprep.subr.bf16.mxu1 %v2915_v12  ;;  %4700 = vst [vmem:[#allocation20_spill] sm:$0xff] %v3837_v20  ;;  %v3840_v21 = vsub.s32 0, %v3837_v20  ;;  %v3846_v23 = vsub.s32 1, %v3837_v20 }
 0x178   :  { %4701 = vst [vmem:[#allocation21_spill] sm:$0xff] %v3840_v21  ;;  %4702 = vst [vmem:[#allocation22_spill] sm:$0xff] %v3846_v23  ;;  %v3849_v24 = vrot.slane %v260_v22, %v3840_v21  ;;  %v3852_v25 = vrot.slane %v260_v22, %v3846_v23 }
 0x179   :  { %2918 = vmatpush1.bf16.msra.mxu1 %v2917_v15 }
 0x17a   :  { %2920 = vmatprep.subr.bf16.mxu1 %v2919_v18 }
 0x229   :  { %v351_v26 = vpop.f32.mrb[0].mxu0 }
 0x22a   :  { %v3855_v27 = vadd.f32 %v351_v26, %v3849_v24  ;;  %v353_v28 = vpop.f32.mrb[1].mxu0 }
 0x22b   :  { %v3858_v29 = vadd.f32 %v353_v28, %v3852_v25 }
 0x22c   :  { %v3861_v30 = vmul.f32 0.70710677, %v3855_v27 }
 0x22d   :  { %v3864_v31 = vmul.f32 0.70710677, %v3858_v29 }
 0x22e   :  { %v390_v32 = vand.u32 2147483647, %v3861_v30  ;;  %vm382_vm7 = vcmp.ge.f32.partialorder %v3861_v30, 0.0 }
 0x22f   :  { %v498_v33 = vand.u32 2147483647, %v3864_v31  ;;  %vm490_vm8 = vcmp.ge.f32.partialorder %v3864_v31, 0.0  ;;  %v599_v31 = vld [vmem:[#allocation2 + $0x28] sm:$0xff] }
 0x230   :  { %v394_v34 = vmul.f32 0.3275911, %v390_v32  ;;  %v446_v40 = vsub.f32 0.0, %v390_v32 }
 0x231   :  { %v502_v35 = vmul.f32 0.3275911, %v498_v33  ;;  %v554_v41 = vsub.f32 0.0, %v498_v33 }
 0x232   :  { %v398_v38 = vadd.f32 1.0, %v394_v34  ;;  %v450_v43 = vmul.f32 %v446_v40, %v390_v32 }
 0x233   :  { %v506_v39 = vadd.f32 1.0, %v502_v35  ;;  %v558_v46 = vmul.f32 %v554_v41, %v498_v33 }
 0x234   :  { %3317 = vrcp.f32 %v398_v38  ;;  %v454_v56 = vmul.f32 1.442695, %v450_v43 }
 0x235   :  { %3319 = vrcp.f32 %v506_v39  ;;  %v562_v60 = vmul.f32 1.442695, %v558_v46  ;;  %v3904_v46 = vld [vmem:[#allocation2 + $0x10] sm:$0xff] }
 0x236   :  { %3321 = vpow2.f32 %v454_v56 }
 0x237   :  { %3323 = vpow2.f32 %v562_v60  ;;  %v374_v60 = vmul.f32 0.5, %v3855_v27 }
 0x23e   :  { %v3318_v42 = vpop.eup %3317 }
 0x23f   :  { %v3320_v44 = vpop.eup %3319  ;;  %v410_v45 = vmul.f32 1.0614054, %v3318_v42  ;;  %v357_v47 = vpop.f32.mrb[2].mxu0 }
 0x240   :  { %v518_v48 = vmul.f32 1.0614054, %v3320_v44  ;;  %v3869_v52 = vadd.f32 %v357_v47, %v3849_v24  ;;  %v359_v53 = vpop.f32.mrb[3].mxu0  ;;  %v3322_v47 = vpop.eup %3321 }
 0x241   :  { %v2675_v54 = vadd.f32 -1.4531521, %v410_v45  ;;  %v3872_v55 = vadd.f32 %v359_v53, %v3852_v25  ;;  %v3902_v45 = vld [vmem:[#allocation2] sm:$0xff] }
 0x242   :  { %v2683_v57 = vadd.f32 -1.4531521, %v518_v48  ;;  %v3875_v58 = vmul.f32 0.70710677, %v3869_v52 }
 0x243   :  { %v418_v59 = vmul.f32 %v3318_v42, %v2675_v54  ;;  %v3878_v61 = vmul.f32 0.70710677, %v3872_v55  ;;  %v363_v62 = vpop.f32.mrb[4].mxu0 }
 0x244   :  { %v526_v0 = vmul.f32 %v3320_v44, %v2683_v57  ;;  %v391_v1 = vand.u32 2147483647, %v3875_v58  ;;  %v3882_v2 = vadd.f32 %v363_v62, %v3849_v24  ;;  %v365_v3 = vpop.f32.mrb[5].mxu0  ;;  %vm383_vm9 = vcmp.ge.f32.partialorder %v3875_v58, 0.0 }
 0x245   :  { %v422_v4 = vadd.f32 1.4214138, %v418_v59  ;;  %v499_v8 = vand.u32 2147483647, %v3878_v61  ;;  %v3889_v22 = vadd.f32 %v365_v3, %v3852_v25  ;;  %v4664_v3 = vmov -1.0  }
 0x246   :  { %v530_v9 = vadd.f32 1.4214138, %v526_v0  ;;  %v395_v10 = vmul.f32 0.3275911, %v391_v1  ;;  %v3886_v16 = vmul.f32 0.70710677, %v3882_v2  ;;  %v2921_v0 = vpack.c.bf16 %v3904_v46, %v3902_v45 }
 0x247   :  { %v426_v11 = vmul.f32 %v3318_v42, %v422_v4  ;;  %v503_v12 = vmul.f32 0.3275911, %v499_v8  ;;  %v369_v13 = vpop.f32.mrb[6].mxu0  ;;  %v3893_v35 = vmul.f32 0.70710677, %v3889_v22  ;;  %v447_v53 = vsub.f32 0.0, %v391_v1 }
 0x248   :  { %v534_v14 = vmul.f32 %v3320_v44, %v530_v9  ;;  %v399_v15 = vadd.f32 1.0, %v395_v10  ;;  %v371_v17 = vpop.f32.mrb[7].mxu0  ;;  %v392_v33 = vand.u32 2147483647, %v3886_v16  ;;  %v3896_v38 = vadd.f32 %v369_v13, %v3849_v24  ;;  %v3324_v24 = vpop.eup %3323 }
 0x249   :  { %v2679_v18 = vadd.f32 -0.28449672, %v426_v11  ;;  %v507_v19 = vadd.f32 1.0, %v503_v12  ;;  %v3900_v43 = vand.u32 2147483647, %v3893_v35  ;;  %v555_v57 = vsub.f32 0.0, %v499_v8 }
 0x24a   :  { %v2687_v26 = vadd.f32 -0.28449672, %v534_v14  ;;  %3325 = vrcp.f32 %v399_v15  ;;  %v396_v40 = vmul.f32 0.3275911, %v392_v33  ;;  %v3918_v10 = vadd.f32 %v371_v17, %v3852_v25 }
 0x24b   :  { %v434_v28 = vmul.f32 %v3318_v42, %v2679_v18  ;;  %3327 = vrcp.f32 %v507_v19  ;;  %v504_v59 = vmul.f32 0.3275911, %v3900_v43  ;;  %v494_v27 = vsel %vm490_vm8, 1.0, %v4664_v3 }
 0x24c   :  { %v542_v32 = vmul.f32 %v3320_v44, %v2687_v26  ;;  %v400_v54 = vadd.f32 1.0, %v396_v40  ;;  %v451_v13 = vmul.f32 %v447_v53, %v391_v1  ;;  %v559_v19 = vmul.f32 %v555_v57, %v499_v8  ;;  %v598_v57 = vld [vmem:[#allocation2 + $0x20] sm:$0xff] }
 0x24d   :  { %v438_v34 = vadd.f32 0.2548296, %v434_v28  ;;  %v508_v9 = vadd.f32 1.0, %v504_v59  ;;  %v448_v26 = vsub.f32 0.0, %v392_v33  ;;  %v482_v1 = vmul.f32 0.5, %v3858_v29  ;;  %v600_v59 = vld [vmem:[#allocation2 + $0x30] sm:$0xff] }
 0x24e   :  { %v546_v39 = vadd.f32 0.2548296, %v542_v32  ;;  %3329 = vrcp.f32 %v400_v54  ;;  %v601_v32 = vld [vmem:[#allocation2 + $0x38] sm:$0xff]  ;;  %v3935_v40 = vmul.f32 0.70710677, %v3918_v10  ;;  %vm491_vm10 = vcmp.ge.f32.partialorder %v3878_v61, 0.0 }
 0x24f   :  { %v442_v41 = vmul.f32 %v3318_v42, %v438_v34  ;;  %v3909_v42 = vmul.f32 0.70710677, %v3896_v38  ;;  %3331 = vrcp.f32 %v508_v9  ;;  %v605_v9 = vld [vmem:[#allocation2 + $0x58] sm:$0xff]  ;;  %vm384_vm11 = vcmp.ge.f32.partialorder %v3886_v16, 0.0 }
 0x250   :  { %v550_v48 = vmul.f32 %v3320_v44, %v546_v39  ;;  %v386_v44 = vsel %vm382_vm7, 1.0, %v4664_v3  ;;  %vm492_vm12 = vcmp.ge.f32.partialorder %v3893_v35, 0.0  ;;  %v484_v35 = vmul.f32 0.5, %v3889_v22 }
 0x251   :  { %v462_v56 = vmul.f32 %v3322_v47, %v442_v41  ;;  %v3926_v14 = vand.u32 2147483647, %v3909_v42  ;;  %v456_v47 = vmul.f32 1.442695, %v451_v13  ;;  %vm385_vm13 = vcmp.ge.f32.partialorder %v3909_v42, 0.0 }
 0x252   :  { %v570_v62 = vmul.f32 %v3324_v24, %v550_v48  ;;  %v564_v24 = vmul.f32 1.442695, %v559_v19  ;;  %vm493_vm14 = vcmp.ge.f32.partialorder %v3935_v40, 0.0 }
 0x253   :  { %v466_v4 = vsub.f32 1.0, %v462_v56  ;;  %v397_v28 = vmul.f32 0.3275911, %v3926_v14  ;;  %v3939_v56 = vand.u32 2147483647, %v3935_v40 }
 0x254   :  { %v3920_v11 = vpop.eup %3325  ;;  %v574_v12 = vsub.f32 1.0, %v570_v62 }
 0x255   :  { %v3928_v15 = vpop.eup %3327  ;;  %v470_v30 = vmul.f32 %v466_v4, %v386_v44  ;;  %v411_v18 = vmul.f32 1.0614054, %v3920_v11  ;;  %v401_v8 = vadd.f32 1.0, %v397_v28  ;;  %v452_v44 = vmul.f32 %v448_v26, %v392_v33  ;;  %v603_v4 = vld [vmem:[#allocation2 + $0x48] sm:$0xff] }
 0x256   :  { %v578_v25 = vmul.f32 %v574_v12, %v494_v27  ;;  %v519_v17 = vmul.f32 1.0614054, %v3928_v15  ;;  %v3942_v27 = vld [vmem:[#allocation2 + $0x40] sm:$0xff]  ;;  %v505_v13 = vmul.f32 0.3275911, %v3939_v56  ;;  %v2925_v33 = vpack.c.bf16 %v600_v59, %v598_v57  ;;  %v3952_v26 = vld [vmem:[#allocation2 + $0x68] sm:$0xff] }
 0x257   :  { %v474_v34 = vadd.f32 1.0, %v470_v30  ;;  %v2676_v39 = vadd.f32 -1.4531521, %v411_v18  ;;  %3333 = vrcp.f32 %v401_v8  ;;  %v2923_v30 = vpack.c.bf16 %v601_v32, %v599_v31  ;;  %v3946_v18 = vld [vmem:[#allocation2 + $0x50] sm:$0xff]  ;;  %v3958_v31 = vld [vmem:[#allocation2 + $0x60] sm:$0xff] }
 0x258   :  { %v582_v41 = vadd.f32 1.0, %v578_v25  ;;  %v2684_v48 = vadd.f32 -1.4531521, %v519_v17  ;;  %v3948_v19 = vpop.eup %3329  ;;  %3335 = vpow2.f32 %v456_v47  ;;  %v3960_v32 = vld [vmem:[#allocation2 + $0x70] sm:$0xff]  ;;  %v458_v47 = vmul.f32 1.442695, %v452_v44 }
 0x259   :  { %v478_v53 = vmul.f32 %v474_v34, %v374_v60  ;;  %v419_v54 = vmul.f32 %v3920_v11, %v2676_v39  ;;  %v556_v60 = vsub.f32 0.0, %v3900_v43  ;;  %3337 = vpow2.f32 %v564_v24  ;;  %v3956_v39 = vld [vmem:[#allocation2 + $0x78] sm:$0xff]  ;;  %v3970_v24 = vld [vmem:[#allocation2 + $0x80] sm:$0xff]  ;;  %v3972_v57 = vpop.eup %3331  ;;  %v3978_v44 = vld [vmem:[#allocation2 + $0x90] sm:$0xff] }
 0x25a   :  { %v586_v62 = vmul.f32 %v582_v41, %v482_v1  ;;  %v527_v29 = vmul.f32 %v3928_v15, %v2684_v48  ;;  %v412_v34 = vmul.f32 1.0614054, %v3948_v19  ;;  %v509_v1 = vadd.f32 1.0, %v505_v13 }
 0x25b   :  { %v423_v12 = vadd.f32 1.4214138, %v419_v54  ;;  %v2927_v48 = vpack.c.bf16 %v605_v9, %v603_v4  ;;  %v2929_v8 = vpack.c.bf16 %v3946_v18, %v3942_v27  ;;  %v3968_v54 = vld [vmem:[#allocation2 + $0x98] sm:$0xff]  ;;  %v3981_v4 = vld [vmem:[#allocation2 + $0xa8] sm:$0xff]  ;;  %v520_v27 = vmul.f32 1.0614054, %v3972_v57 }
 0x25c   :  { %v531_v25 = vadd.f32 1.4214138, %v527_v29  ;;  %v3950_v17 = vmax.f32 %v478_v53, %v586_v62  ;;  %v3966_v53 = vld [vmem:[#allocation2 + $0x88] sm:$0xff]  ;;  %v2677_v62 = vadd.f32 -1.4531521, %v412_v34  ;;  %v560_v29 = vmul.f32 %v556_v60, %v3900_v43  ;;  %v3987_v60 = vld [vmem:[#allocation2 + $0xb8] sm:$0xff] }
 0x25d   :  { %v427_v28 = vmul.f32 %v3920_v11, %v423_v12  ;;  %3339 = vrcp.f32 %v509_v1  ;;  %v449_v12 = vsub.f32 0.0, %v3926_v14  ;;  %v2931_v43 = vpack.c.bf16 %v3956_v39, %v3952_v26 }
 0x25e   :  { %4703 = vst [vmem:[#allocation23_spill] sm:$0xff] %v3950_v17  ;;  %v535_v41 = vmul.f32 %v3928_v15, %v531_v25  ;;  %780 = vmatmul.mubr.f32.vlgmr.msra.gmra.mrb[0].mxu1 %v3950_v17  ;;  %v420_v46 = vmul.f32 %v3948_v19, %v2677_v62  ;;  %v2935_v13 = vpack.c.bf16 %v3968_v54, %v3966_v53  ;;  %v3996_v18 = vmul.f32 0.5, %v3869_v52 }
 0x25f   :  { %v2680_v59 = vadd.f32 -0.28449672, %v427_v28  ;;  %2922 = vmatpush1.bf16.msra.mxu1 %v2921_v0  ;;  %785 = vmatprep.mubr.f32.mxu1 %v4660_v36  ;;  %v2933_v0 = vpack.c.bf16 %v3960_v32, %v3958_v31  ;;  %v2685_v25 = vadd.f32 -1.4531521, %v520_v27  ;;  %v2937_v26 = vpack.c.bf16 %v3978_v44, %v3970_v24  ;;  %v623_v44 = vld [vmem:[#allocation2 + $0xe8] sm:$0xff] }
 0x260   :  { %v2688_v9 = vadd.f32 -0.28449672, %v535_v41  ;;  %2924 = vmatprep.subr.bf16.mxu1 %v2923_v30  ;;  %v424_v34 = vadd.f32 1.4214138, %v420_v46  ;;  %v566_v1 = vmul.f32 1.442695, %v560_v29  ;;  %v2939_v39 = vpack.c.bf16 %v3987_v60, %v3981_v4 }
 0x261   :  { %v435_v45 = vmul.f32 %v3920_v11, %v2680_v59  ;;  %v4003_v31 = vpop.eup %3333  ;;  %3341 = vpow2.f32 %v458_v47  ;;  %v528_v52 = vmul.f32 %v3972_v57, %v2685_v25  ;;  %v453_v41 = vmul.f32 %v449_v12, %v3926_v14 }
 0x262   :  { %v543_v30 = vmul.f32 %v3928_v15, %v2688_v9  ;;  %v428_v54 = vmul.f32 %v3948_v19, %v424_v34  ;;  %v413_v59 = vmul.f32 1.0614054, %v4003_v31  ;;  %v3336_v62 = vpop.eup %3335  ;;  %v483_v29 = vmul.f32 0.5, %v3872_v55 }
 0x263   :  { %v439_v28 = vadd.f32 0.2548296, %v435_v45  ;;  %2926 = vmatpush1.bf16.msra.mxu1 %v2925_v33  ;;  %v557_v33 = vsub.f32 0.0, %v3939_v56  ;;  %v532_v9 = vadd.f32 1.4214138, %v528_v52  ;;  %v3338_v27 = vpop.eup %3337  ;;  %3343 = vpow2.f32 %v566_v1 }
 0x264   :  { %v547_v32 = vadd.f32 0.2548296, %v543_v30  ;;  %2928 = vmatprep.subr.bf16.mxu1 %v2927_v48  ;;  %v2681_v14 = vadd.f32 -0.28449672, %v428_v54  ;;  %v2678_v48 = vadd.f32 -1.4531521, %v413_v59 }
 0x265   :  { %v443_v53 = vmul.f32 %v3920_v11, %v439_v28  ;;  %v536_v12 = vmul.f32 %v3972_v57, %v532_v9  ;;  %v460_v46 = vmul.f32 1.442695, %v453_v41  ;;  %v561_v28 = vmul.f32 %v557_v33, %v3939_v56  ;;  %v614_v56 = vld [vmem:[#allocation2 + $0xa0] sm:$0xff]  ;;  %v616_v33 = vld [vmem:[#allocation2 + $0xb0] sm:$0xff] }
 0x266   :  { %v551_v47 = vmul.f32 %v3928_v15, %v547_v32  ;;  %v436_v55 = vmul.f32 %v3948_v19, %v2681_v14  ;;  %v421_v15 = vmul.f32 %v4003_v31, %v2678_v48  ;;  %v694_v40 = vrot.slane %v3950_v17, 7 }
 0x267   :  { %v463_v45 = vmul.f32 %v3336_v62, %v443_v53  ;;  %2930 = vmatpush1.bf16.msra.mxu1 %v2929_v8  ;;  %v4016_v30 = vpop.eup %3339  ;;  %v387_v8 = vsel %vm383_vm9, 1.0, %v4664_v3  ;;  %v2689_v61 = vadd.f32 -0.28449672, %v536_v12  ;;  %3345 = vpow2.f32 %v460_v46 }
 0x268   :  { %v571_v11 = vmul.f32 %v3338_v27, %v551_v47  ;;  %2932 = vmatprep.subr.bf16.mxu1 %v2931_v43  ;;  %v521_v1 = vmul.f32 1.0614054, %v4016_v30  ;;  %v495_v43 = vsel %vm491_vm10, 1.0, %v4664_v3  ;;  %v440_v52 = vadd.f32 0.2548296, %v436_v55  ;;  %v619_v27 = vld [vmem:[#allocation2 + $0xc8] sm:$0xff] }
 0x269   :  { %v467_v25 = vsub.f32 1.0, %v463_v45  ;;  %v425_v41 = vadd.f32 1.4214138, %v421_v15  ;;  %v544_v54 = vmul.f32 %v3972_v57, %v2689_v61  ;;  %v568_v9 = vmul.f32 1.442695, %v561_v28  ;;  %v621_v45 = vld [vmem:[#allocation2 + $0xd8] sm:$0xff] }
 0x26a   :  { %v575_v34 = vsub.f32 1.0, %v571_v11  ;;  %v2686_v59 = vadd.f32 -1.4531521, %v521_v1  ;;  %v444_v62 = vmul.f32 %v3948_v19, %v440_v52  ;;  %v2941_v19 = vpack.c.bf16 %v616_v33, %v614_v56 }
 0x26b   :  { %v471_v32 = vmul.f32 %v467_v25, %v387_v8  ;;  %2934 = vmatpush1.bf16.msra.mxu1 %v2933_v0  ;;  %v429_v47 = vmul.f32 %v4003_v31, %v425_v41  ;;  %v3342_v14 = vpop.eup %3341  ;;  %v548_v0 = vadd.f32 0.2548296, %v544_v54  ;;  %v2943_v28 = vpack.c.bf16 %v621_v45, %v619_v27  ;;  %v618_v8 = vld [vmem:[#allocation2 + $0xc0] sm:$0xff]  ;;  %v659_v54 = vld [vmem:[#allocation2 + $0x208] sm:$0xff] }
 0x26c   :  { %v579_v53 = vmul.f32 %v575_v34, %v495_v43  ;;  %2936 = vmatprep.subr.bf16.mxu1 %v2935_v13  ;;  %v529_v11 = vmul.f32 %v4016_v30, %v2686_v59  ;;  %v464_v13 = vmul.f32 %v3342_v14, %v444_v62  ;;  %v620_v34 = vld [vmem:[#allocation2 + $0xd0] sm:$0xff]  ;;  %3347 = vpow2.f32 %v568_v9  ;;  %v622_v43 = vld [vmem:[#allocation2 + $0xe0] sm:$0xff]  ;;  %v661_v59 = vld [vmem:[#allocation2 + $0x218] sm:$0xff] }
 0x26d   :  { %v475_v58 = vadd.f32 1.0, %v471_v32  ;;  %v2682_v46 = vadd.f32 -0.28449672, %v429_v47  ;;  %v552_v55 = vmul.f32 %v3972_v57, %v548_v0  ;;  %v3344_v61 = vpop.eup %3343  ;;  %v2945_v32 = vpack.c.bf16 %v620_v34, %v618_v8 }
 0x26e   :  { %v583_v48 = vadd.f32 1.0, %v579_v53  ;;  %v533_v15 = vadd.f32 1.4214138, %v529_v11  ;;  %v468_v1 = vsub.f32 1.0, %v464_v13  ;;  %v624_v53 = vld [vmem:[#allocation2 + $0xf0] sm:$0xff]  ;;  %v496_v33 = vsel %vm492_vm12, 1.0, %v4664_v3 }
 0x26f   :  { %v479_v12 = vmul.f32 %v475_v58, %v3996_v18  ;;  %2938 = vmatpush1.bf16.msra.mxu1 %v2937_v26  ;;  %v388_v18 = vsel %vm384_vm11, 1.0, %v4664_v3  ;;  %v437_v24 = vmul.f32 %v4003_v31, %v2682_v46  ;;  %v625_v26 = vld [vmem:[#allocation2 + $0xf8] sm:$0xff]  ;;  %v572_v57 = vmul.f32 %v3344_v61, %v552_v55 }
 0x270   :  { %v587_v25 = vmul.f32 %v583_v48, %v483_v29  ;;  %2940 = vmatprep.subr.bf16.mxu1 %v2939_v39  ;;  %v537_v4 = vmul.f32 %v4016_v30, %v533_v15  ;;  %v472_v39 = vmul.f32 %v468_v1, %v388_v18  ;;  %v2947_v41 = vpack.c.bf16 %v625_v26, %v623_v44  ;;  %v658_v44 = vld [vmem:[#allocation2 + $0x200] sm:$0xff]  ;;  %v660_v26 = vld [vmem:[#allocation2 + $0x210] sm:$0xff] }
 0x271   :  { %v441_v29 = vadd.f32 0.2548296, %v437_v24  ;;  %v576_v16 = vsub.f32 1.0, %v572_v57  ;;  %v3346_v62 = vpop.eup %3345  ;;  %v376_v47 = vmul.f32 0.5, %v3882_v2  ;;  %v2949_v14 = vpack.c.bf16 %v624_v53, %v622_v43  ;;  %v662_v43 = vld [vmem:[#allocation2 + $0x220] sm:$0xff]  ;;  %v667_v53 = vld [vmem:[#allocation2 + $0x248] sm:$0xff] }
 0x272   :  { %v4045_v60 = vmax.f32 %v479_v12, %v587_v25  ;;  %v2690_v52 = vadd.f32 -0.28449672, %v537_v4  ;;  %v476_v56 = vadd.f32 1.0, %v472_v39  ;;  %v2951_v48 = vpack.c.bf16 %v661_v59, %v659_v54  ;;  %v663_v39 = vld [vmem:[#allocation2 + $0x228] sm:$0xff]  ;;  %v669_v54 = vld [vmem:[#allocation2 + $0x258] sm:$0xff] }
 0x273   :  { %2942 = vmatpush1.bf16.msra.mxu1 %v2941_v19  ;;  %v445_v58 = vmul.f32 %v4003_v31, %v441_v29  ;;  %v580_v9 = vmul.f32 %v576_v16, %v496_v33  ;;  %v389_v46 = vsel %vm385_vm13, 1.0, %v4664_v3  ;;  %v377_v8 = vmul.f32 0.5, %v3896_v38  ;;  %v665_v29 = vld [vmem:[#allocation2 + $0x238] sm:$0xff]  ;;  %v664_v16 = vld [vmem:[#allocation2 + $0x230] sm:$0xff] }
 0x274   :  { %4704 = vst [vmem:[#allocation24_spill] sm:$0xff] %v4045_v60  ;;  %786 = vmatmul.mubr.f32.gmra.mrb[2].mxu1 %v4045_v60  ;;  %2944 = vmatprep.subr.bf16.mxu1 %v2943_v28  ;;  %v545_v27 = vmul.f32 %v4016_v30, %v2690_v52  ;;  %v480_v0 = vmul.f32 %v476_v56, %v376_v47  ;;  %v497_v28 = vsel %vm493_vm14, 1.0, %v4664_v3  ;;  %v485_v61 = vmul.f32 0.5, %v3918_v10  ;;  %v668_v47 = vld [vmem:[#allocation2 + $0x250] sm:$0xff] }
 0x275   :  { %791 = vmatprep.mubr.f32.mxu1 %v4660_v36  ;;  %v465_v45 = vmul.f32 %v3346_v62, %v445_v58  ;;  %v584_v11 = vadd.f32 1.0, %v580_v9  ;;  %v4071_v57 = vsel %vm131_vm0, 0.0, %v694_v40  ;;  %v695_v4 = vrot.slane %v4045_v60, 7  ;;  %v666_v62 = vld [vmem:[#allocation2 + $0x240] sm:$0xff] }
 0x276   :  { %v549_v12 = vadd.f32 0.2548296, %v545_v27  ;;  %v3348_v19 = vpop.eup %3347  ;;  %v2953_v38 = vpack.c.bf16 %v660_v26, %v658_v44  ;;  %v707_v10 = vmul.f32 %v4071_v57, %v3810_v63  ;;  %v2957_v56 = vpack.c.bf16 %v664_v16, %v662_v43  ;;  %v671_v27 = vld [vmem:[#allocation2 + $0x268] sm:$0xff]  ;;  %v682_v26 = vld [vmem:[#allocation2 + $0x2c0] sm:$0xff]  ;;  %v688_v43 = vld [vmem:[#allocation2 + $0x2f0] sm:$0xff] }
 0x277   :  { %2946 = vmatpush1.bf16.msra.mxu1 %v2945_v32  ;;  %v469_v31 = vsub.f32 1.0, %v465_v45  ;;  %v588_v13 = vmul.f32 %v584_v11, %v484_v35  ;;  %v2955_v32 = vpack.c.bf16 %v665_v29, %v663_v39  ;;  %v2959_v58 = vpack.c.bf16 %v669_v54, %v667_v53  ;;  %v673_v45 = vld [vmem:[#allocation2 + $0x278] sm:$0xff]  ;;  %v670_v11 = vld [vmem:[#allocation2 + $0x260] sm:$0xff]  ;;  %v687_v39 = vld [vmem:[#allocation2 + $0x2e8] sm:$0xff] }
 0x278   :  { %2948 = vmatprep.subr.bf16.mxu1 %v2947_v41  ;;  %v553_v2 = vmul.f32 %v4016_v30, %v549_v12  ;;  %v4080_v41 = vsel %vm131_vm0, %v694_v40, %v695_v4  ;;  %v2963_v35 = vpack.c.bf16 %v673_v45, %v671_v27  ;;  %v672_v12 = vld [vmem:[#allocation2 + $0x270] sm:$0xff]  ;;  %v685_v40 = vld [vmem:[#allocation2 + $0x2d8] sm:$0xff]  ;;  %v711_v53 = vmul.f32 %v4071_v57, %v3776_v37  ;;  %v1290_v27 = vld [vmem:[#allocation5 + $0x188] sm:$0xff] }
 0x279   :  { %v473_v25 = vmul.f32 %v469_v31, %v389_v46  ;;  %v4060_v55 = vmax.f32 %v480_v0, %v588_v13  ;;  %v708_v33 = vmul.f32 %v4080_v41, %v3817_v5  ;;  %v675_v13 = vld [vmem:[#allocation2 + $0x288] sm:$0xff]  ;;  %v677_v46 = vld [vmem:[#allocation2 + $0x298] sm:$0xff]  ;;  %v712_v16 = vmul.f32 %v4080_v41, %v3789_v50 }
 0x27a   :  { %v573_v42 = vmul.f32 %v3348_v19, %v553_v2  ;;  %v2965_v2 = vpack.c.bf16 %v672_v12, %v670_v11  ;;  %v689_v29 = vld [vmem:[#allocation2 + $0x2f8] sm:$0xff]  ;;  %vm3552_vm14 = vmmov 1  }
 0x27b   :  { %2950 = vmatpush1.bf16.msra.mxu1 %v2949_v14  ;;  %4705 = vst [vmem:[#allocation25_spill] sm:$0xff] %v4060_v55  ;;  %v477_v15 = vadd.f32 1.0, %v473_v25  ;;  %v697_v52 = vrot.slane %v4060_v55, 7  ;;  %v2967_v25 = vpack.c.bf16 %v677_v46, %v675_v13  ;;  %v898_v54 = vrot.slane %v712_v16, 2  ;;  %v1292_v11 = vld [vmem:[#allocation5 + $0x198] sm:$0xff] }
 0x27c   :  { %2952 = vmatprep.subr.bf16.mxu1 %v2951_v48  ;;  %v577_v22 = vsub.f32 1.0, %v573_v42  ;;  %792 = vmatmul.mubr.f32.gmra.mrb[4].mxu1 %v4060_v55  ;;  %v2961_v48 = vpack.c.bf16 %v668_v47, %v666_v62  ;;  %v674_v42 = vld [vmem:[#allocation2 + $0x280] sm:$0xff]  ;;  %v1276_v13 = vld [vmem:[#allocation5 + $0x118] sm:$0xff] }
 0x27d   :  { %797 = vmatprep.mubr.f32.mxu1 %v4660_v36  ;;  %v481_v34 = vmul.f32 %v477_v15, %v377_v8  ;;  %v698_v9 = vsel %vm131_vm0, %v695_v4, %v697_v52  ;;  %v676_v15 = vld [vmem:[#allocation2 + $0x290] sm:$0xff] }
 0x27e   :  { %v581_v30 = vmul.f32 %v577_v22, %v497_v28  ;;  %v709_v0 = vmul.f32 %v698_v9, %v3821_v7  ;;  %v679_v22 = vld [vmem:[#allocation2 + $0x2a8] sm:$0xff]  ;;  %v681_v28 = vld [vmem:[#allocation2 + $0x2b8] sm:$0xff]  ;;  %v2969_v8 = vpack.c.bf16 %v676_v15, %v674_v42  ;;  %v684_v4 = vld [vmem:[#allocation2 + $0x2d0] sm:$0xff] }
 0x27f   :  { %v1277_v42 = vld [vmem:[#allocation5 + $0x120] sm:$0xff]  ;;  %v1278_v15 = vld [vmem:[#allocation5 + $0x128] sm:$0xff] }
 0x280   :  { %v585_v18 = vadd.f32 1.0, %v581_v30  ;;  %v2971_v30 = vpack.c.bf16 %v681_v28, %v679_v22  ;;  %v2993_v22 = vpack.c.bf16 %v1278_v15, %v1277_v42  ;;  %v1295_v28 = vld [vmem:[#allocation5 + $0x1b0] sm:$0xff] }
 0x282   :  { %v589_v1 = vmul.f32 %v585_v18, %v485_v61  ;;  %v680_v61 = vld [vmem:[#allocation2 + $0x2b0] sm:$0xff]  ;;  %v683_v18 = vld [vmem:[#allocation2 + $0x2c8] sm:$0xff] }
 0x283   :  { %v2975_v44 = vpack.c.bf16 %v685_v40, %v683_v18  ;;  %v1297_v40 = vld [vmem:[#allocation5 + $0x1c0] sm:$0xff] }
 0x284   :  { %v4068_v24 = vmax.f32 %v481_v34, %v589_v1  ;;  %v678_v34 = vld [vmem:[#allocation2 + $0x2a0] sm:$0xff] }
 0x285   :  { %v2973_v1 = vpack.c.bf16 %v680_v61, %v678_v34  ;;  %v1279_v34 = vld [vmem:[#allocation5 + $0x130] sm:$0xff]  ;;  %v1280_v61 = vld [vmem:[#allocation5 + $0x138] sm:$0xff] }
 0x286   :  { %4706 = vst [vmem:[#allocation26_spill] sm:$0xff] %v4068_v24  ;;  %798 = vmatmul.mubr.f32.gmra.mrb[6].mxu1 %v4068_v24  ;;  %v699_v59 = vrot.slane %v4068_v24, 7  ;;  %v2997_v18 = vpack.c.bf16 %v1280_v61, %v1279_v34  ;;  %v4135_v34 = vld [vmem:[#allocation5 + $0x90] sm:$0xff]  ;;  %v4137_v61 = vld [vmem:[#allocation5 + $0x98] sm:$0xff] }
 0x287   :  { %868 = vmatprep.mubr.f32.mxu1 %v4660_v36 }
 0x288   :  { %v700_v14 = vsel %vm131_vm0, %v697_v52, %v699_v59  ;;  %v713_v59 = vmul.f32 %v698_v9, %v3792_v51  ;;  %v1289_v9 = vld [vmem:[#allocation5 + $0x180] sm:$0xff] }
 0x289   :  { %v706_v31 = vsel %vm144_vm1, %v700_v14, 0.0  ;;  %v2983_v45 = vpack.c.bf16 %v1290_v27, %v1289_v9  ;;  %v1273_v14 = vld [vmem:[#allocation5 + $0x100] sm:$0xff] }
 0x28a   :  { %869 = vmatmul.mubr.f32.vlgmr.msra.gmra.mrb[0].mxu1 %v707_v10  ;;  %v710_v19 = vmul.f32 %v706_v31, %v3819_v6  ;;  %v2979_v10 = vpack.c.bf16 %v689_v29, %v687_v39  ;;  %v900_v62 = vrot.slane %v713_v59, 2  ;;  %v1299_v29 = vld [vmem:[#allocation5 + $0x1d0] sm:$0xff]  ;;  %v1285_v59 = vld [vmem:[#allocation5 + $0x160] sm:$0xff] }
 0x28b   :  { %2954 = vmatpush1.bf16.msra.mxu1 %v2953_v38  ;;  %874 = vmatprep.mubr.f32.mxu1 %v4660_v36  ;;  %v2977_v38 = vpack.c.bf16 %v684_v4, %v682_v26  ;;  %v1281_v26 = vld [vmem:[#allocation5 + $0x140] sm:$0xff]  ;;  %v1282_v4 = vld [vmem:[#allocation5 + $0x148] sm:$0xff] }
 0x28c   :  { %2956 = vmatprep.subr.bf16.mxu1 %v2955_v32  ;;  %v686_v32 = vld [vmem:[#allocation2 + $0x2e0] sm:$0xff]  ;;  %v901_v41 = vsel %vm218_vm3, %v898_v54, %v900_v62  ;;  %2984 = vmatprep.subr.bf16.mxu0 %v2983_v45  ;;  %v3001_v39 = vpack.c.bf16 %v1282_v4, %v1281_v26  ;;  %v1258_v45 = vld [vmem:[#allocation5 + $0x88] sm:$0xff] }
 0x28d   :  { %v2981_v52 = vpack.c.bf16 %v688_v43, %v686_v32  ;;  %v1283_v32 = vld [vmem:[#allocation5 + $0x150] sm:$0xff]  ;;  %v1284_v43 = vld [vmem:[#allocation5 + $0x158] sm:$0xff]  ;;  %v1257_v9 = vld [vmem:[#allocation5 + $0x80] sm:$0xff] }
 0x28e   :  { %875 = vmatmul.mubr.f32.gmra.mrb[2].mxu1 %v708_v33  ;;  %v714_v33 = vmul.f32 %v706_v31, %v3785_v49  ;;  %v1275_v31 = vld [vmem:[#allocation5 + $0x110] sm:$0xff]  ;;  %v3005_v16 = vpack.c.bf16 %v1284_v43, %v1283_v32  ;;  %v4154_v43 = vld [vmem:[#allocation5 + $0x28] sm:$0xff] }
 0x28f   :  { %2958 = vmatpush1.bf16.msra.mxu1 %v2957_v56  ;;  %880 = vmatprep.mubr.f32.mxu1 %v4660_v36  ;;  %v897_v56 = vrot.slane %v711_v53, 2  ;;  %v2989_v46 = vpack.c.bf16 %v1276_v13, %v1275_v31  ;;  %v1302_v53 = vld [vmem:[#allocation5 + $0x1e8] sm:$0xff] }
 0x290   :  { %2960 = vmatprep.subr.bf16.mxu1 %v2959_v58  ;;  %v902_v47 = vrot.slane %v714_v33, 2 }
 0x291   :  { %v899_v58 = vsel %vm218_vm3, %v897_v56, %v898_v54  ;;  %v1286_v56 = vld [vmem:[#allocation5 + $0x168] sm:$0xff] }
 0x292   :  { %881 = vmatmul.mubr.f32.gmra.mrb[4].mxu1 %v709_v0  ;;  %v903_v57 = vsel %vm218_vm3, %v900_v62, %v902_v47  ;;  %v3009_v33 = vpack.c.bf16 %v1286_v56, %v1285_v59  ;;  %v1304_v62 = vld [vmem:[#allocation5 + $0x1f8] sm:$0xff] }
 0x293   :  { %2962 = vmatpush1.bf16.msra.mxu1 %v2961_v48  ;;  %886 = vmatprep.mubr.f32.mxu1 %v4660_v36  ;;  %v1274_v48 = vld [vmem:[#allocation5 + $0x108] sm:$0xff]  ;;  %v4158_v56 = vld [vmem:[#allocation5 + $0xb8] sm:$0xff] }
 0x294   :  { %2964 = vmatprep.subr.bf16.mxu1 %v2963_v35  ;;  %v2985_v0 = vpack.c.bf16 %v1274_v48, %v1273_v14  ;;  %v1291_v35 = vld [vmem:[#allocation5 + $0x190] sm:$0xff]  ;;  %v3015_v14 = vpack.c.bf16 %v1258_v45, %v1257_v9  ;;  %v1005_v48 = vld [vmem:[%s4644_s6] sm:$0x3] }
 0x295   :  { %v2987_v12 = vpack.c.bf16 %v1292_v11, %v1291_v35  ;;  %v4113_v35 = vrot.slane %v1005_v48, %v3846_v23  ;;  %v4172_v45 = vld [vmem:[#allocation5 + $0xc0] sm:$0xff] }
 0x296   :  { %887 = vmatmul.mubr.f32.gmra.mrb[6].mxu1 %v710_v19  ;;  %2986 = vmatpush3.bf16.msra.mxu0 %v2985_v0  ;;  %v1294_v19 = vld [vmem:[#allocation5 + $0x1a8] sm:$0xff]  ;;  %v4110_v0 = vrot.slane %v1005_v48, %v3840_v21  ;;  %4709 = vst [vmem:[#allocation29_spill] sm:$0xff] %v4172_v45 }
 0x297   :  { %2966 = vmatpush1.bf16.msra.mxu1 %v2965_v2  ;;  %972 = vmatprep.mubr.f32.mxu1 %v4660_v36  ;;  %v1293_v2 = vld [vmem:[#allocation5 + $0x1a0] sm:$0xff] }
 0x298   :  { %2968 = vmatprep.subr.bf16.mxu1 %v2967_v25  ;;  %2988 = vmatprep.subr.bf16.mxu0 %v2987_v12  ;;  %v2991_v25 = vpack.c.bf16 %v1294_v19, %v1293_v2 }
 0x29a   :  { %2990 = vmatpush3.bf16.msra.mxu0 %v2989_v46 }
 0x29b   :  { %2970 = vmatpush1.bf16.msra.mxu1 %v2969_v8  ;;  %2992 = vmatprep.subr.bf16.mxu0 %v2991_v25  ;;  %v1296_v8 = vld [vmem:[#allocation5 + $0x1b8] sm:$0xff] }
 0x29c   :  { %2972 = vmatprep.subr.bf16.mxu1 %v2971_v30  ;;  %v2995_v30 = vpack.c.bf16 %v1296_v8, %v1295_v28  ;;  %v4131_v8 = vld [vmem:[#allocation5] sm:$0xff] }
 0x29e   :  { %2994 = vmatpush3.bf16.msra.mxu0 %v2993_v22 }
 0x29f   :  { %2974 = vmatpush1.bf16.msra.mxu1 %v2973_v1  ;;  %2996 = vmatprep.subr.bf16.mxu0 %v2995_v30  ;;  %v1298_v1 = vld [vmem:[#allocation5 + $0x1c8] sm:$0xff] }
 0x2a0   :  { %2976 = vmatprep.subr.bf16.mxu1 %v2975_v44  ;;  %v2999_v44 = vpack.c.bf16 %v1298_v1, %v1297_v40  ;;  %v4133_v30 = vld [vmem:[#allocation5 + $0x8] sm:$0xff]  ;;  %v4139_v40 = vld [vmem:[#allocation5 + $0x10] sm:$0xff]  ;;  %v4141_v1 = vld [vmem:[#allocation5 + $0x18] sm:$0xff] }
 0x2a2   :  { %2998 = vmatpush3.bf16.msra.mxu0 %v2997_v18 }
 0x2a3   :  { %2978 = vmatpush1.bf16.msra.mxu1 %v2977_v38  ;;  %3000 = vmatprep.subr.bf16.mxu0 %v2999_v44  ;;  %v1300_v38 = vld [vmem:[#allocation5 + $0x1d8] sm:$0xff]  ;;  %v4143_v44 = vld [vmem:[#allocation5 + $0xa0] sm:$0xff] }
 0x2a4   :  { %2980 = vmatprep.subr.bf16.mxu1 %v2979_v10  ;;  %v3003_v10 = vpack.c.bf16 %v1300_v38, %v1299_v29  ;;  %v4149_v29 = vld [vmem:[#allocation5 + $0x20] sm:$0xff] }
 0x2a6   :  { %3002 = vmatpush3.bf16.msra.mxu0 %v3001_v39  ;;  %v4147_v39 = vld [vmem:[#allocation5 + $0xa8] sm:$0xff] }
 0x2a7   :  { %2982 = vmatpush1.bf16.msra.mxu1 %v2981_v52  ;;  %3004 = vmatprep.subr.bf16.mxu0 %v3003_v10  ;;  %v1301_v52 = vld [vmem:[#allocation5 + $0x1e0] sm:$0xff] }
 0x2a8   :  { %v3007_v54 = vpack.c.bf16 %v1302_v53, %v1301_v52 }
 0x2aa   :  { %973 = vmatmul.mubr.f32.vlgmr.msra.gmra.mrb[0].mxu1 %v899_v58  ;;  %3006 = vmatpush3.bf16.msra.mxu0 %v3005_v16  ;;  %v1303_v58 = vld [vmem:[#allocation5 + $0x1f0] sm:$0xff] }
 0x2ab   :  { %978 = vmatprep.mubr.f32.mxu1 %v4660_v36  ;;  %3008 = vmatprep.subr.bf16.mxu0 %v3007_v54  ;;  %v4156_v16 = vld [vmem:[#allocation5 + $0xb0] sm:$0xff] }
 0x2ae   :  { %979 = vmatmul.mubr.f32.gmra.mrb[2].mxu1 %v901_v41  ;;  %3010 = vmatpush3.bf16.msra.mxu0 %v3009_v33  ;;  %v3011_v41 = vpack.c.bf16 %v1304_v62, %v1303_v58  ;;  %v4164_v62 = vld [vmem:[#allocation5 + $0x30] sm:$0xff] }
 0x2af   :  { %984 = vmatprep.mubr.f32.mxu1 %v4660_v36  ;;  %4707 = vst [vmem:[#allocation27_spill] sm:$0xff] %v4164_v62 }
 0x2b0   :  { %3012 = vmatprep.subr.bf16.mxu0 %v3011_v41  ;;  %v4166_v41 = vld [vmem:[#allocation5 + $0x38] sm:$0xff] }
 0x2b1   :  { %4708 = vst [vmem:[#allocation28_spill] sm:$0xff] %v4166_v41 }
 0x2b2   :  { %985 = vmatmul.mubr.f32.gmra.mrb[4].mxu1 %v903_v57  ;;  %v1288_v57 = vld [vmem:[#allocation5 + $0x178] sm:$0xff] }
 0x2b3   :  { %990 = vmatprep.mubr.f32.mxu1 %v4660_v36 }
 0x2b6   :  { %991 = vmatmul.mubr.f32.gmra.mrb[6].mxu1 %v902_v47  ;;  %v1287_v47 = vld [vmem:[#allocation5 + $0x170] sm:$0xff] }
 0x2b7   :  { %v3013_v27 = vpack.c.bf16 %v1288_v57, %v1287_v47 }
 0x2b9   :  { %3014 = vmatpush3.bf16.msra.mxu0 %v3013_v27 }
 0x2ba   :  { %3016 = vmatprep.subr.bf16.mxu0 %v3015_v14  ;;  %v4174_v14 = vld [vmem:[#allocation5 + $0xc8] sm:$0xff] }
 0x2bb   :  { %4710 = vst [vmem:[#allocation30_spill] sm:$0xff] %v4174_v14 }
 0x37d   :  { %v974_v11 = vpop.f32.mrb[0].mxu1 }
 0x37e   :  { %v1017_v12 = vadd.f32 %v4110_v0, %v974_v11  ;;  %v976_v31 = vpop.f32.mrb[1].mxu1 }
 0x37f   :  { %v1018_v13 = vadd.f32 %v4113_v35, %v976_v31 }
 0x380   :  { %v4117_v46 = vmul.f32 0.70710677, %v1017_v12 }
 0x381   :  { %v4119_v2 = vmul.f32 0.70710677, %v1018_v13  ;;  %v980_v19 = vpop.f32.mrb[2].mxu1 }
 0x382   :  { %v1057_v25 = vand.u32 2147483647, %v4117_v46  ;;  %v4123_v42 = vadd.f32 %v4110_v0, %v980_v19  ;;  %v982_v15 = vpop.f32.mrb[3].mxu1  ;;  %vm1041_vm15 = vcmp.ge.f32.partialorder %v4117_v46, 0.0 }
 0x383   :  { %v4126_v22 = vand.u32 2147483647, %v4119_v2  ;;  %v4129_v28 = vadd.f32 %v4113_v35, %v982_v15  ;;  %vm1042_vm4 = vcmp.ge.f32.partialorder %v4119_v2, 0.0  ;;  %v4206_v2 = vsel %vm1041_vm15, 1.0, %v4664_v3  ;;  %vm3084_vm15 = vmpackc.low %vm218_vm3, %vm3552_vm14 }
 0x384   :  { %v1065_v18 = vmul.f32 0.3275911, %v1057_v25  ;;  %v1035_v4 = vmul.f32 0.70710677, %v4123_v42  ;;  %v1169_v52 = vsub.f32 0.0, %v1057_v25 }
 0x385   :  { %v1066_v26 = vmul.f32 0.3275911, %v4126_v22  ;;  %v4152_v10 = vmul.f32 0.70710677, %v4129_v28  ;;  %v986_v32 = vpop.f32.mrb[4].mxu1  ;;  %v1170_v15 = vsub.f32 0.0, %v4126_v22 }
 0x386   :  { %v1073_v38 = vadd.f32 1.0, %v1065_v18  ;;  %v1059_v54 = vand.u32 2147483647, %v1035_v4  ;;  %v988_v59 = vpop.f32.mrb[5].mxu1  ;;  %v4178_v11 = vadd.f32 %v4110_v0, %v986_v32  ;;  %v1177_v18 = vmul.f32 %v1169_v52, %v1057_v25 }
 0x387   :  { %v1074_v53 = vadd.f32 1.0, %v1066_v26  ;;  %v1060_v48 = vand.u32 2147483647, %v4152_v10  ;;  %v4197_v52 = vmul.f32 0.5, %v1017_v12  ;;  %vm1043_vm5 = vcmp.ge.f32.partialorder %v1035_v4, 0.0 }
 0x388   :  { %3349 = vrcp.f32 %v1073_v38  ;;  %v1067_v47 = vmul.f32 0.3275911, %v1059_v54  ;;  %v1022_v38 = vadd.f32 %v4113_v35, %v988_v59  ;;  %v4189_v32 = vmul.f32 0.70710677, %v4178_v11 }
 0x389   :  { %3351 = vrcp.f32 %v1074_v53  ;;  %v992_v57 = vpop.f32.mrb[6].mxu1  ;;  %v1068_v36 = vmul.f32 0.3275911, %v1060_v48  ;;  %v4199_v59 = vmul.f32 0.5, %v1018_v13  ;;  %v1185_v19 = vmul.f32 1.442695, %v1177_v18 }
 0x38a   :  { %v994_v31 = vpop.f32.mrb[7].mxu1  ;;  %v1075_v26 = vadd.f32 1.0, %v1067_v47  ;;  %v4195_v25 = vmul.f32 0.70710677, %v1022_v38  ;;  %v1061_v53 = vand.u32 2147483647, %v4189_v32  ;;  %v1178_v13 = vmul.f32 %v1170_v15, %v4126_v22 }
 0x38b   :  { %v1076_v47 = vadd.f32 1.0, %v1068_v36  ;;  %v1171_v9 = vsub.f32 0.0, %v1059_v54  ;;  %v4213_v36 = vmul.f32 0.5, %v4123_v42  ;;  %v4216_v4 = vadd.f32 %v4110_v0, %v992_v57 }
 0x38c   :  { %3353 = vrcp.f32 %v1075_v26  ;;  %v1062_v58 = vand.u32 2147483647, %v4195_v25  ;;  %v4209_v26 = vsel %vm1042_vm4, 1.0, %v4664_v3  ;;  %v1069_v12 = vmul.f32 0.3275911, %v1061_v53 }
 0x38d   :  { %3355 = vrcp.f32 %v1076_v47  ;;  %v4221_v46 = vsel %vm1043_vm5, 1.0, %v4664_v3  ;;  %v4224_v33 = vmul.f32 0.5, %v4129_v28  ;;  %v4227_v47 = vadd.f32 %v4113_v35, %v994_v31 }
 0x38e   :  { %v1070_v18 = vmul.f32 0.3275911, %v1062_v58  ;;  %v1077_v23 = vadd.f32 1.0, %v1069_v12  ;;  %3357 = vpow2.f32 %v1185_v19  ;;  %v1179_v15 = vmul.f32 %v1171_v9, %v1059_v54 }
 0x38f   :  { %4711 = vst [vmem:[#allocation31_spill] sm:$0xff] %v4227_v47  ;;  %vm1044_vm6 = vcmp.ge.f32.partialorder %v4152_v10, 0.0  ;;  %v1172_v57 = vsub.f32 0.0, %v1060_v48  ;;  %v4234_v3 = vmul.f32 0.70710677, %v4216_v4  ;;  %v1173_v31 = vsub.f32 0.0, %v1061_v53 }
 0x390   :  { %v1078_v0 = vadd.f32 1.0, %v1070_v18  ;;  %3359 = vrcp.f32 %v1077_v23  ;;  %v1187_v21 = vmul.f32 1.442695, %v1178_v13  ;;  %v4237_v35 = vmul.f32 0.70710677, %v4227_v47 }
 0x391   :  { %v1174_v12 = vsub.f32 0.0, %v1062_v58  ;;  %v1063_v20 = vand.u32 2147483647, %v4234_v3  ;;  %v1189_v23 = vmul.f32 1.442695, %v1179_v15  ;;  %v4712_v19 = vmov -1.0  }
 0x392   :  { %v4218_v27 = vpop.eup %3349  ;;  %3361 = vrcp.f32 %v1078_v0  ;;  %v4245_v18 = vsel %vm1044_vm6, 1.0, %v4712_v19  ;;  %v1180_v13 = vmul.f32 %v1172_v57, %v1060_v48  ;;  %vm1045_vm7 = vcmp.ge.f32.partialorder %v4189_v32, 0.0 }
 0x393   :  { %v4229_v22 = vpop.eup %3351  ;;  %v1097_v42 = vmul.f32 1.0614054, %v4218_v27  ;;  %v1071_v0 = vmul.f32 0.3275911, %v1063_v20  ;;  %v1064_v24 = vand.u32 2147483647, %v4237_v35  ;;  %3363 = vpow2.f32 %v1187_v21 }
 0x394   :  { %v1098_v54 = vmul.f32 1.0614054, %v4229_v22  ;;  %v1182_v15 = vmul.f32 %v1174_v12, %v1062_v58  ;;  %v1191_v63 = vmul.f32 1.442695, %v1180_v13  ;;  %v4260_v21 = vsel %vm1045_vm7, 1.0, %v4712_v19 }
 0x395   :  { %v2691_v28 = vadd.f32 -1.4531521, %v1097_v42  ;;  %v4247_v42 = vmul.f32 0.5, %v1022_v38  ;;  %v1079_v7 = vadd.f32 1.0, %v1071_v0  ;;  %v1072_v5 = vmul.f32 0.3275911, %v1064_v24 }
 0x396   :  { %v4241_v9 = vpop.eup %3353  ;;  %v2692_v60 = vadd.f32 -1.4531521, %v1098_v54  ;;  %v1195_v0 = vmul.f32 1.442695, %v1182_v15  ;;  %v1175_v45 = vsub.f32 0.0, %v1063_v20  ;;  %vm1046_vm8 = vcmp.ge.f32.partialorder %v4195_v25, 0.0 }
 0x397   :  { %v1113_v10 = vmul.f32 %v4218_v27, %v2691_v28  ;;  %v1099_v17 = vmul.f32 1.0614054, %v4241_v9  ;;  %v4252_v6 = vpop.eup %3355  ;;  %v1181_v28 = vmul.f32 %v1173_v31, %v1061_v53  ;;  %3365 = vrcp.f32 %v1079_v7 }
 0x398   :  { %v1114_v48 = vmul.f32 %v4229_v22, %v2692_v60  ;;  %v1100_v57 = vmul.f32 1.0614054, %v4252_v6  ;;  %v1080_v54 = vadd.f32 1.0, %v1072_v5  ;;  %v1183_v14 = vmul.f32 %v1175_v45, %v1063_v20 }
 0x399   :  { %v1121_v55 = vadd.f32 1.4214138, %v1113_v10  ;;  %v2693_v49 = vadd.f32 -1.4531521, %v1099_v17  ;;  %v3358_v10 = vpop.eup %3357  ;;  %v1193_v60 = vmul.f32 1.442695, %v1181_v28 }
 0x39a   :  { %v1122_v58 = vadd.f32 1.4214138, %v1114_v48  ;;  %v2694_v31 = vadd.f32 -1.4531521, %v1100_v57  ;;  %v1176_v17 = vsub.f32 0.0, %v1064_v24  ;;  %3367 = vrcp.f32 %v1080_v54 }
 0x39b   :  { %v1129_v38 = vmul.f32 %v4218_v27, %v1121_v55  ;;  %v1115_v12 = vmul.f32 %v4241_v9, %v2693_v49  ;;  %v4263_v55 = vpop.eup %3359  ;;  %3369 = vpow2.f32 %v1189_v23  ;;  %vm1047_vm9 = vcmp.ge.f32.partialorder %v4234_v3, 0.0 }
 0x39c   :  { %v4265_v13 = vpop.eup %3361  ;;  %v1130_v7 = vmul.f32 %v4229_v22, %v1122_v58  ;;  %v1116_v5 = vmul.f32 %v4252_v6, %v2694_v31  ;;  %v1101_v49 = vmul.f32 1.0614054, %v4263_v55  ;;  %3371 = vpow2.f32 %v1191_v63 }
 0x39d   :  { %v2699_v53 = vadd.f32 -0.28449672, %v1129_v38  ;;  %v1123_v38 = vadd.f32 1.4214138, %v1115_v12  ;;  %v1102_v48 = vmul.f32 1.0614054, %v4265_v13  ;;  %v3364_v54 = vpop.eup %3363  ;;  %3373 = vpow2.f32 %v1193_v60 }
 0x39e   :  { %v2700_v28 = vadd.f32 -0.28449672, %v1130_v7  ;;  %v1124_v15 = vadd.f32 1.4214138, %v1116_v5  ;;  %v1184_v12 = vmul.f32 %v1176_v17, %v1064_v24  ;;  %3375 = vpow2.f32 %v1195_v0 }
 0x39f   :  { %v1145_v32 = vmul.f32 %v4218_v27, %v2699_v53  ;;  %v1131_v47 = vmul.f32 %v4241_v9, %v1123_v38  ;;  %v2696_v62 = vadd.f32 -1.4531521, %v1102_v48  ;;  %v2695_v53 = vadd.f32 -1.4531521, %v1101_v49 }
 0x3a0   :  { %v1146_v23 = vmul.f32 %v4229_v22, %v2700_v28  ;;  %v1132_v31 = vmul.f32 %v4252_v6, %v1124_v15  ;;  %v1197_v38 = vmul.f32 1.442695, %v1183_v14  ;;  %vm1048_vm10 = vcmp.ge.f32.partialorder %v4237_v35, 0.0 }
 0x3a1   :  { %v1153_v57 = vadd.f32 0.2548296, %v1145_v32  ;;  %v2701_v41 = vadd.f32 -0.28449672, %v1131_v47  ;;  %v1118_v32 = vmul.f32 %v4265_v13, %v2696_v62  ;;  %v1117_v63 = vmul.f32 %v4263_v55, %v2695_v53  ;;  %v4278_v5 = vpop.eup %3365 }
 0x3a2   :  { %v1154_v20 = vadd.f32 0.2548296, %v1146_v23  ;;  %v2702_v45 = vadd.f32 -0.28449672, %v1132_v31  ;;  %v1103_v62 = vmul.f32 1.0614054, %v4278_v5  ;;  %3377 = vpow2.f32 %v1197_v38 }
 0x3a3   :  { %v1161_v58 = vmul.f32 %v4218_v27, %v1153_v57  ;;  %v1147_v27 = vmul.f32 %v4241_v9, %v2701_v41  ;;  %v1126_v60 = vadd.f32 1.4214138, %v1118_v32  ;;  %v1125_v48 = vadd.f32 1.4214138, %v1117_v63 }
 0x3a4   :  { %v1162_v57 = vmul.f32 %v4229_v22, %v1154_v20  ;;  %v1148_v24 = vmul.f32 %v4252_v6, %v2702_v45  ;;  %v1199_v47 = vmul.f32 1.442695, %v1184_v12  ;;  %v4286_v28 = vpop.eup %3367  ;;  %v2697_v53 = vadd.f32 -1.4531521, %v1103_v62 }
 0x3a5   :  { %v1201_v7 = vmul.f32 %v3358_v10, %v1161_v58  ;;  %v1155_v17 = vadd.f32 0.2548296, %v1147_v27  ;;  %v1134_v10 = vmul.f32 %v4265_v13, %v1126_v60  ;;  %v1133_v0 = vmul.f32 %v4263_v55, %v1125_v48  ;;  %v3370_v58 = vpop.eup %3369 }
 0x3a6   :  { %v1202_v41 = vmul.f32 %v3364_v54, %v1162_v57  ;;  %v1156_v15 = vadd.f32 0.2548296, %v1148_v24  ;;  %v1104_v32 = vmul.f32 1.0614054, %v4286_v28  ;;  %v3372_v12 = vpop.eup %3371  ;;  %v1119_v45 = vmul.f32 %v4278_v5, %v2697_v53 }
 0x3a7   :  { %v1209_v49 = vsub.f32 1.0, %v1201_v7  ;;  %v1163_v22 = vmul.f32 %v4241_v9, %v1155_v17  ;;  %v2704_v23 = vadd.f32 -0.28449672, %v1134_v10  ;;  %v2703_v31 = vadd.f32 -0.28449672, %v1133_v0  ;;  %v3374_v48 = vpop.eup %3373 }
 0x3a8   :  { %v1210_v7 = vsub.f32 1.0, %v1202_v41  ;;  %v1164_v20 = vmul.f32 %v4252_v6, %v1156_v15  ;;  %v2698_v60 = vadd.f32 -1.4531521, %v1104_v32  ;;  %v1127_v24 = vadd.f32 1.4214138, %v1119_v45  ;;  %v3376_v0 = vpop.eup %3375 }
 0x3a9   :  { %v1217_v14 = vmul.f32 %v1209_v49, %v4206_v2  ;;  %v1203_v27 = vmul.f32 %v3370_v58, %v1163_v22  ;;  %v1150_v2 = vmul.f32 %v4265_v13, %v2704_v23  ;;  %v1149_v54 = vmul.f32 %v4263_v55, %v2703_v31 }
 0x3aa   :  { %v1218_v49 = vmul.f32 %v1210_v7, %v4209_v26  ;;  %v1204_v57 = vmul.f32 %v3372_v12, %v1164_v20  ;;  %v1120_v6 = vmul.f32 %v4286_v28, %v2698_v60  ;;  %v1135_v15 = vmul.f32 %v4278_v5, %v1127_v24 }
 0x3ab   :  { %v1225_v63 = vadd.f32 1.0, %v1217_v14  ;;  %v1211_v62 = vsub.f32 1.0, %v1203_v27  ;;  %v1158_v17 = vadd.f32 0.2548296, %v1150_v2  ;;  %v1157_v10 = vadd.f32 0.2548296, %v1149_v54 }
 0x3ac   :  { %v1226_v14 = vadd.f32 1.0, %v1218_v49  ;;  %v1212_v41 = vsub.f32 1.0, %v1204_v57  ;;  %v1128_v26 = vadd.f32 1.4214138, %v1120_v6  ;;  %v2705_v31 = vadd.f32 -0.28449672, %v1135_v15  ;;  %v3378_v24 = vpop.eup %3377 }
 0x3ad   :  { %v1233_v9 = vmul.f32 %v1225_v63, %v4197_v52  ;;  %v1219_v53 = vmul.f32 %v1211_v62, %v4221_v46  ;;  %v1166_v58 = vmul.f32 %v4265_v13, %v1158_v17  ;;  %v1165_v52 = vmul.f32 %v4263_v55, %v1157_v10 }
 0x3ae   :  { %v1234_v22 = vmul.f32 %v1226_v14, %v4199_v59  ;;  %v1220_v23 = vmul.f32 %v1212_v41, %v4245_v18  ;;  %3379 = vpow2.f32 %v1199_v47  ;;  %v1136_v13 = vmul.f32 %v4286_v28, %v1128_v26 }
 0x3af   :  { %v1345_v32 = vrot.slane %v1233_v9, 7  ;;  %v1227_v38 = vadd.f32 1.0, %v1219_v53  ;;  %v1206_v12 = vmul.f32 %v3376_v0, %v1166_v58  ;;  %v1205_v46 = vmul.f32 %v3374_v48, %v1165_v52 }
 0x3b0   :  { %v1346_v63 = vrot.slane %v1234_v22, 7  ;;  %1451 = vmatprep.mubr.f32.mxu0 %v1234_v22  ;;  %v1228_v7 = vadd.f32 1.0, %v1220_v23  ;;  %v1054_v55 = vsel %vm1046_vm8, 1.0, %v4712_v19  ;;  %v1151_v59 = vmul.f32 %v4278_v5, %v2705_v31 }
 0x3b1   :  { %1452 = vmatmul.mubr.f32.vlgmr.msra.gmra.mrb[8].mxu0 %v1233_v9  ;;  %v1235_v25 = vmul.f32 %v1227_v38, %v4213_v36  ;;  %v1214_v20 = vsub.f32 1.0, %v1206_v12  ;;  %v4713_v18 = vpack.c.bf16 %v4133_v30, %v4131_v8  ;;  %v1213_v45 = vsub.f32 1.0, %v1205_v46 }
 0x3b2   :  { %v1236_v47 = vmul.f32 %v1228_v7, %v4224_v33  ;;  %v2706_v27 = vadd.f32 -0.28449672, %v1136_v13  ;;  %v4314_v2 = vsel %vm131_vm0, 0.0, %v1346_v63  ;;  %v4714_v54 = vpack.c.bf16 %v4137_v61, %v4135_v34  ;;  %v1250_v7 = vld [vmem:[#allocation5 + $0x48] sm:$0xff] }
 0x3b3   :  { %3018 = vmatpush3.bf16.msra.mxu0 %v4713_v18  ;;  %v1347_v36 = vrot.slane %v1235_v25, 7  ;;  %v1222_v60 = vmul.f32 %v1214_v20, %v1054_v55  ;;  %v1159_v48 = vadd.f32 0.2548296, %v1151_v59  ;;  %v4321_v9 = vsel %vm131_vm0, 0.0, %v1345_v32  ;;  %v1268_v55 = vld [vmem:[#allocation5 + $0xd8] sm:$0xff]  ;;  %v4719_v18 = vld [vmem:[#allocation28_spill] sm:$0xff] }
 0x3b4   :  { %3020 = vmatprep.subr.bf16.mxu0 %v4714_v54  ;;  %v1349_v8 = vrot.slane %v1236_v47, 7  ;;  %1456 = vmatprep.mubr.f32.mxu0 %v1236_v47  ;;  %v1221_v30 = vmul.f32 %v1213_v45, %v4260_v21  ;;  %v1152_v33 = vmul.f32 %v4286_v28, %v2706_v27  ;;  %v1380_v34 = vmul.f32 %v4314_v2, %v3776_v37  ;;  %v4720_v47 = vld [vmem:[#allocation27_spill] sm:$0xff] }
 0x3b5   :  { %1457 = vmatmul.mubr.f32.gmra.mrb[10].mxu0 %v1235_v25  ;;  %v1230_v49 = vadd.f32 1.0, %v1222_v60  ;;  %v1167_v57 = vmul.f32 %v4278_v5, %v1159_v48  ;;  %v4329_v61 = vsel %vm131_vm0, %v1345_v32, %v1347_v36  ;;  %v1029_v62 = vmul.f32 0.5, %v4178_v11  ;;  %v4722_v54 = vld [vmem:[#allocation31_spill] sm:$0xff]  ;;  %v4723_v48 = vld [vmem:[#allocation30_spill] sm:$0xff] }
 0x3b6   :  { %v4715_v17 = vpack.c.bf16 %v4141_v1, %v4139_v40  ;;  %v1229_v21 = vadd.f32 1.0, %v1221_v30  ;;  %v1160_v10 = vadd.f32 0.2548296, %v1152_v33  ;;  %v4336_v6 = vsel %vm131_vm0, %v1346_v63, %v1349_v8  ;;  %v1249_v63 = vld [vmem:[#allocation5 + $0x40] sm:$0xff]  ;;  %v1251_v33 = vld [vmem:[#allocation5 + $0x50] sm:$0xff] }
 0x3b7   :  { %v1379_v5 = vmul.f32 %v4321_v9, %v3776_v37  ;;  %v4341_v0 = vmul.f32 %v1230_v49, %v4247_v42  ;;  %v4716_v14 = vpack.c.bf16 %v4147_v39, %v4143_v44  ;;  %v1207_v11 = vmul.f32 %v3378_v24, %v1167_v57  ;;  %v1252_v49 = vld [vmem:[#allocation5 + $0x58] sm:$0xff]  ;;  %v1269_v24 = vld [vmem:[#allocation5 + $0xe0] sm:$0xff] }
 0x3b8   :  { %3022 = vmatpush3.bf16.msra.mxu0 %v4715_v17  ;;  %v1382_v40 = vmul.f32 %v4336_v6, %v3789_v50  ;;  %v1055_v1 = vsel %vm1047_vm9, 1.0, %v4712_v19  ;;  %v1237_v41 = vmul.f32 %v1229_v21, %v1029_v62  ;;  %v1168_v15 = vmul.f32 %v4286_v28, %v1160_v10  ;;  %v3380_v42 = vpop.eup %3379  ;;  %v1270_v62 = vld [vmem:[#allocation5 + $0xe8] sm:$0xff] }
 0x3b9   :  { %3024 = vmatprep.subr.bf16.mxu0 %v4716_v14  ;;  %v1381_v37 = vmul.f32 %v4329_v61, %v3789_v50  ;;  %v1353_v53 = vrot.slane %v4341_v0, 7  ;;  %1461 = vmatprep.mubr.f32.mxu0 %v4341_v0  ;;  %v1215_v44 = vsub.f32 1.0, %v1207_v11  ;;  %v1568_v39 = vrot.slane %v1380_v34, 2  ;;  %v4726_v11 = vld [vmem:[#allocation16_spill] sm:$0xff] }
 0x3ba   :  { %v1569_v58 = vrot.slane %v1382_v40, 2  ;;  %v1351_v52 = vrot.slane %v1237_v41, 7  ;;  %1462 = vmatmul.mubr.f32.gmra.mrb[12].mxu0 %v1237_v41  ;;  %v1208_v3 = vmul.f32 %v3380_v42, %v1168_v15  ;;  %v1565_v22 = vrot.slane %v1379_v5, 2  ;;  %v1253_v41 = vld [vmem:[#allocation5 + $0x60] sm:$0xff]  ;;  %v1254_v15 = vld [vmem:[#allocation5 + $0x68] sm:$0xff]  ;;  %v1271_v42 = vld [vmem:[#allocation5 + $0xf0] sm:$0xff] }
 0x3bb   :  { %v1566_v26 = vrot.slane %v1381_v37, 2  ;;  %v4717_v28 = vpack.c.bf16 %v4154_v43, %v4149_v29  ;;  %v1223_v50 = vmul.f32 %v1215_v44, %v1055_v1  ;;  %v4363_v23 = vsel %vm131_vm0, %v1349_v8, %v1353_v53  ;;  %v4724_v8 = vld [vmem:[#allocation29_spill] sm:$0xff] }
 0x3bc   :  { %v4366_v31 = vsel %vm218_vm3, %v1568_v39, %v1569_v58  ;;  %v1031_v32 = vmul.f32 0.5, %v4216_v4  ;;  %v1216_v38 = vsub.f32 1.0, %v1208_v3  ;;  %v4718_v12 = vpack.c.bf16 %v4158_v56, %v4156_v16  ;;  %v1267_v4 = vld [vmem:[#allocation5 + $0xd0] sm:$0xff]  ;;  %v1272_v44 = vld [vmem:[#allocation5 + $0xf8] sm:$0xff]  ;;  %v4727_v39 = vld [vmem:[#allocation15_spill] sm:$0xff] }
 0x3bd   :  { %3026 = vmatpush3.bf16.msra.mxu0 %v4717_v28  ;;  %v4374_v29 = vmul.f32 %v4363_v23, %v3792_v51  ;;  %v4377_v43 = vsel %vm131_vm0, %v1347_v36, %v1351_v52  ;;  %v1056_v46 = vsel %vm1048_vm10, 1.0, %v4712_v19  ;;  %v1231_v13 = vadd.f32 1.0, %v1223_v50  ;;  %v1255_v28 = vld [vmem:[#allocation5 + $0x70] sm:$0xff]  ;;  %v1256_v50 = vld [vmem:[#allocation5 + $0x78] sm:$0xff] }
 0x3be   :  { %3028 = vmatprep.subr.bf16.mxu0 %v4718_v12  ;;  %v1383_v16 = vmul.f32 %v4377_v43, %v3792_v51  ;;  %v4385_v56 = vsel %vm218_vm3, %v1565_v22, %v1566_v26  ;;  %v1224_v25 = vmul.f32 %v1216_v38, %v1056_v46  ;;  %v4721_v45 = vpack.c.bf16 %v4719_v18, %v4720_v47  ;;  %v1321_v38 = vld [vmem:[#allocation5 + $0x280] sm:$0xff]  ;;  %v1322_v12 = vld [vmem:[#allocation5 + $0x288] sm:$0xff]  ;;  %v1307_v18 = vld [vmem:[#allocation5 + $0x210] sm:$0xff] }
 0x3bf   :  { %v1573_v20 = vrot.slane %v4374_v29, 2  ;;  %v1239_v59 = vmul.f32 %v1231_v13, %v1031_v32  ;;  %v3033_v27 = vpack.c.bf16 %v1250_v7, %v1249_v63  ;;  %v1032_v36 = vmul.f32 0.5, %v4722_v54  ;;  %v1305_v29 = vld [vmem:[#allocation5 + $0x200] sm:$0xff]  ;;  %v1306_v46 = vld [vmem:[#allocation5 + $0x208] sm:$0xff]  ;;  %v1308_v47 = vld [vmem:[#allocation5 + $0x218] sm:$0xff] }
 0x3c0   :  { %v1571_v35 = vrot.slane %v1383_v16, 2  ;;  %v1232_v60 = vadd.f32 1.0, %v1224_v25  ;;  %v4725_v30 = vpack.c.bf16 %v4723_v48, %v4724_v8  ;;  %v3035_v51 = vpack.c.bf16 %v1268_v55, %v1267_v4  ;;  %v1323_v4 = vld [vmem:[#allocation5 + $0x290] sm:$0xff]  ;;  %v1324_v55 = vld [vmem:[#allocation5 + $0x298] sm:$0xff]  ;;  %v1326_v54 = vld [vmem:[#allocation5 + $0x2a8] sm:$0xff] }
 0x3c1   :  { %3030 = vmatpush3.bf16.msra.mxu0 %v4721_v45  ;;  %v4396_v57 = vsel %vm218_vm3, %v1569_v58, %v1573_v20  ;;  %v1355_v34 = vrot.slane %v1239_v59, 7  ;;  %v3037_v10 = vpack.c.bf16 %v1252_v49, %v1251_v33  ;;  %v1372_v40 = vmul.f32 %v4314_v2, %v4726_v11  ;;  %v4728_v45 = vld [vmem:[#allocation17_spill] sm:$0xff]  ;;  %v1309_v48 = vld [vmem:[#allocation5 + $0x220] sm:$0xff] }
 0x3c2   :  { %3032 = vmatprep.subr.bf16.mxu0 %v4725_v30  ;;  %v4399_v17 = vsel %vm218_vm3, %v1566_v26, %v1571_v35  ;;  %v1240_v21 = vmul.f32 %v1232_v60, %v1032_v36  ;;  %v3039_v1 = vpack.c.bf16 %v1270_v62, %v1269_v24  ;;  %v3041_v2 = vpack.c.bf16 %v1254_v15, %v1253_v41  ;;  %v4729_v8 = vld [vmem:[#allocation19_spill] sm:$0xff]  ;;  %v1328_v33 = vld [vmem:[#allocation5 + $0x2b8] sm:$0xff]  ;;  %v1311_v24 = vld [vmem:[#allocation5 + $0x230] sm:$0xff] }
 0x3c3   :  { %v1356_v5 = vsel %vm131_vm0, %v1351_v52, %v1355_v34  ;;  %v3043_v22 = vpack.c.bf16 %v1272_v44, %v1271_v42  ;;  %v3045_v63 = vpack.c.bf16 %v1256_v50, %v1255_v28  ;;  %v3047_v7 = vpack.c.bf16 %v1322_v12, %v1321_v38  ;;  %v4730_v62 = vld [vmem:[#allocation18_spill] sm:$0xff]  ;;  %v1315_v44 = vld [vmem:[#allocation5 + $0x250] sm:$0xff]  ;;  %v1318_v28 = vld [vmem:[#allocation5 + $0x268] sm:$0xff] }
 0x3c4   :  { %v1357_v14 = vrot.slane %v1240_v21, 7  ;;  %1466 = vmatprep.mubr.f32.mxu0 %v1240_v21  ;;  %v4405_v37 = vsel %vm144_vm1, %v1356_v5, 0.0  ;;  %v3049_v16 = vpack.c.bf16 %v1306_v46, %v1305_v29  ;;  %v1371_v25 = vmul.f32 %v4321_v9, %v4726_v11  ;;  %v1310_v9 = vld [vmem:[#allocation5 + $0x228] sm:$0xff]  ;;  %v1332_v41 = vld [vmem:[#allocation5 + $0x2d8] sm:$0xff]  ;;  %v1335_v50 = vld [vmem:[#allocation5 + $0x2f0] sm:$0xff] }
 0x3c5   :  { %3034 = vmatpush3.bf16.msra.mxu0 %v3033_v27  ;;  %v4409_v58 = vmul.f32 %v4405_v37, %v4727_v39  ;;  %v1374_v27 = vmul.f32 %v4336_v6, %v4728_v45  ;;  %v1373_v36 = vmul.f32 %v4329_v61, %v4728_v45  ;;  %v1376_v30 = vmul.f32 %v4363_v23, %v4729_v8  ;;  %v1312_v61 = vld [vmem:[#allocation5 + $0x238] sm:$0xff]  ;;  %v1330_v5 = vld [vmem:[#allocation5 + $0x2c8] sm:$0xff] }
 0x3c6   :  { %3036 = vmatprep.subr.bf16.mxu0 %v3035_v51  ;;  %1467 = vmatmul.mubr.f32.gmra.mrb[14].mxu0 %v1239_v59  ;;  %v1358_v52 = vsel %vm131_vm0, %v1353_v53, %v1357_v14  ;;  %v3051_v59 = vpack.c.bf16 %v1324_v55, %v1323_v4  ;;  %v1327_v51 = vld [vmem:[#allocation5 + $0x2b0] sm:$0xff]  ;;  %v3057_v6 = vpack.c.bf16 %v1310_v9, %v1309_v48  ;;  %v1336_v38 = vld [vmem:[#allocation5 + $0x2f8] sm:$0xff]  ;;  %v4731_v46 = vmov 0.0   ;;  %v1886_v45 = vld [vmem:[#allocation7 + $0x48] sm:$0xff] }
 0x3c7   :  { %1536 = vmatprep.mubr.f32.mxu0 %v1372_v40  ;;  %v1370_v3 = vsel %vm144_vm1, %v1358_v52, 0.0  ;;  %v1575_v26 = vrot.slane %v4409_v58, 2  ;;  %v1375_v49 = vmul.f32 %v4377_v43, %v4729_v8  ;;  %v3059_v34 = vpack.c.bf16 %v1328_v33, %v1327_v51  ;;  %v1313_v40 = vld [vmem:[#allocation5 + $0x240] sm:$0xff]  ;;  %v1331_v43 = vld [vmem:[#allocation5 + $0x2d0] sm:$0xff]  ;;  %v1898_v48 = vld [vmem:[#allocation7 + $0xa8] sm:$0xff] }
 0x3c8   :  { %v4417_v32 = vmul.f32 %v1370_v3, %v4727_v39  ;;  %v1378_v21 = vmul.f32 %v1370_v3, %v4730_v62  ;;  %v3061_v23 = vpack.c.bf16 %v1312_v61, %v1311_v24  ;;  %v1377_v14 = vmul.f32 %v4405_v37, %v4730_v62  ;;  %v1316_v39 = vld [vmem:[#allocation5 + $0x258] sm:$0xff]  ;;  %v1333_v52 = vld [vmem:[#allocation5 + $0x2e0] sm:$0xff]  ;;  %v1902_v51 = vld [vmem:[#allocation7 + $0xc8] sm:$0xff] }
 0x3c9   :  { %3038 = vmatpush3.bf16.msra.mxu0 %v3037_v10  ;;  %v4422_v0 = vsel %vm218_vm3, %v1571_v35, %v1575_v26  ;;  %v1325_v35 = vld [vmem:[#allocation5 + $0x2a0] sm:$0xff]  ;;  %v3067_v42 = vpack.c.bf16 %v1332_v41, %v1331_v43  ;;  %v3069_v3 = vpack.c.bf16 %v1316_v39, %v1315_v44  ;;  %vm3551_vm0 = vmmov 0   ;;  %v1906_v33 = vld [vmem:[#allocation7 + $0xe8] sm:$0xff] }
 0x3ca   :  { %3040 = vmatprep.subr.bf16.mxu0 %v3039_v1  ;;  %v1577_v53 = vrot.slane %v4417_v32, 2  ;;  %v3055_v60 = vpack.c.bf16 %v1326_v54, %v1325_v35  ;;  %v1329_v10 = vld [vmem:[#allocation5 + $0x2c0] sm:$0xff]  ;;  %v1314_v1 = vld [vmem:[#allocation5 + $0x248] sm:$0xff]  ;;  %2872 = vmatprep.mubr.msk.f32.mxu1 %vm3551_vm0, %v4731_v46  ;;  %v3098_v24 = vpack.c.bf16 %v1906_v33, %v1902_v51  ;;  %vm1800_vm4 = vcmask 244736  }
 0x3cb   :  { %v3063_v11 = vpack.c.bf16 %v1330_v5, %v1329_v10  ;;  %v3065_v15 = vpack.c.bf16 %v1314_v1, %v1313_v40  ;;  %v1882_v32 = vld [vmem:[#allocation7 + $0x28] sm:$0xff]  ;;  %v1885_v54 = vld [vmem:[#allocation7 + $0x40] sm:$0xff] }
 0x3cc   :  { %v4428_v13 = vsel %vm218_vm3, %v1573_v20, %v1577_v53  ;;  %v3053_v20 = vpack.c.bf16 %v1308_v47, %v1307_v18  ;;  %v1881_v18 = vld [vmem:[#allocation7 + $0x20] sm:$0xff]  ;;  %v1910_v10 = vld [vmem:[#allocation7 + $0x108] sm:$0xff] }
 0x3cd   :  { %3042 = vmatpush3.bf16.msra.mxu0 %v3041_v2  ;;  %v1334_v2 = vld [vmem:[#allocation5 + $0x2e8] sm:$0xff]  ;;  %v1893_v8 = vld [vmem:[#allocation7 + $0x80] sm:$0xff] }
 0x3ce   :  { %3044 = vmatprep.subr.bf16.mxu0 %v3043_v22  ;;  %v3071_v37 = vpack.c.bf16 %v1334_v2, %v1333_v52  ;;  %v1317_v22 = vld [vmem:[#allocation5 + $0x260] sm:$0xff]  ;;  %v1914_v5 = vld [vmem:[#allocation7 + $0x128] sm:$0xff] }
 0x3cf   :  { %v3073_v12 = vpack.c.bf16 %v1318_v28, %v1317_v22  ;;  %v1901_v61 = vld [vmem:[#allocation7 + $0xc0] sm:$0xff]  ;;  %v1918_v1 = vld [vmem:[#allocation7 + $0x148] sm:$0xff] }
 0x3d0   :  { %v1905_v62 = vld [vmem:[#allocation7 + $0xe0] sm:$0xff]  ;;  %v1922_v43 = vld [vmem:[#allocation7 + $0x168] sm:$0xff] }
 0x3d1   :  { %3046 = vmatpush3.bf16.msra.mxu0 %v3045_v63  ;;  %v3075_v63 = vpack.c.bf16 %v1336_v38, %v1335_v50  ;;  %v1913_v40 = vld [vmem:[#allocation7 + $0x120] sm:$0xff]  ;;  %v1926_v39 = vld [vmem:[#allocation7 + $0x188] sm:$0xff] }
 0x3d2   :  { %3048 = vmatprep.subr.bf16.mxu0 %v3047_v7  ;;  %v1320_v7 = vld [vmem:[#allocation5 + $0x278] sm:$0xff]  ;;  %v1921_v44 = vld [vmem:[#allocation7 + $0x160] sm:$0xff]  ;;  %v1930_v52 = vld [vmem:[#allocation7 + $0x1a8] sm:$0xff] }
 0x3d3   :  { %v1925_v22 = vld [vmem:[#allocation7 + $0x180] sm:$0xff]  ;;  %v1934_v38 = vld [vmem:[#allocation7 + $0x1c8] sm:$0xff] }
 0x3d4   :  { %1537 = vmatmul.mubr.f32.vlgmr.msra.gmra.mrb[16].mxu0 %v1371_v25  ;;  %v3550_v25 = vmov 0.0|0.0   ;;  %v1929_v28 = vld [vmem:[#allocation7 + $0x1a0] sm:$0xff] }
 0x3d5   :  { %1541 = vmatprep.mubr.f32.mxu0 %v1374_v27  ;;  %3050 = vmatpush3.bf16.msra.mxu0 %v3049_v16  ;;  %v1890_v27 = vld [vmem:[#allocation7 + $0x68] sm:$0xff] }
 0x3d6   :  { %3052 = vmatprep.subr.bf16.mxu0 %v3051_v59  ;;  %3079 = vmatprep.subr.bf16.mxu1 %v3550_v25  ;;  %v3090_v35 = vpack.c.bf16 %v1890_v27, %v1886_v45 }
 0x3d8   :  { %1542 = vmatmul.mubr.f32.gmra.mrb[18].mxu0 %v1373_v36 }
 0x3d9   :  { %1546 = vmatprep.mubr.f32.mxu0 %v1376_v30  ;;  %3054 = vmatpush3.bf16.msra.mxu0 %v3053_v20  ;;  %v1889_v20 = vld [vmem:[#allocation7 + $0x60] sm:$0xff] }
 0x3da   :  { %3056 = vmatprep.subr.bf16.mxu0 %v3055_v60  ;;  %v3092_v36 = vpack.c.bf16 %v1889_v20, %v1885_v54  ;;  %v1894_v60 = vld [vmem:[#allocation7 + $0x88] sm:$0xff]  ;;  %v1897_v30 = vld [vmem:[#allocation7 + $0xa0] sm:$0xff] }
 0x3db   :  { %v3094_v9 = vpack.c.bf16 %v1898_v48, %v1894_v60 }
 0x3dc   :  { %1547 = vmatmul.mubr.f32.gmra.mrb[20].mxu0 %v1375_v49  ;;  %v3096_v49 = vpack.c.bf16 %v1897_v30, %v1893_v8 }
 0x3dd   :  { %1551 = vmatprep.mubr.f32.mxu0 %v1378_v21  ;;  %3058 = vmatpush3.bf16.msra.mxu0 %v3057_v6 }
 0x3de   :  { %3060 = vmatprep.subr.bf16.mxu0 %v3059_v34 }
 0x3e0   :  { %1552 = vmatmul.mubr.f32.gmra.mrb[22].mxu0 %v1377_v14  ;;  %v3102_v14 = vpack.c.bf16 %v1914_v5, %v1910_v10 }
 0x3e1   :  { %3062 = vmatpush3.bf16.msra.mxu0 %v3061_v23  ;;  %1651 = vmatprep.mubr.f32.mxu0 %v4366_v31  ;;  %v1319_v31 = vld [vmem:[#allocation5 + $0x270] sm:$0xff]  ;;  %v3100_v23 = vpack.c.bf16 %v1905_v62, %v1901_v61 }
 0x3e2   :  { %3064 = vmatprep.subr.bf16.mxu0 %v3063_v11  ;;  %v3077_v29 = vpack.c.bf16 %v1320_v7, %v1319_v31  ;;  %v1909_v11 = vld [vmem:[#allocation7 + $0x100] sm:$0xff]  ;;  %v3112_v31 = vpack.c.bf16 %v1929_v28, %v1925_v22 }
 0x3e3   :  { %v3104_v41 = vpack.c.bf16 %v1913_v40, %v1909_v11 }
 0x3e5   :  { %3066 = vmatpush3.bf16.msra.mxu0 %v3065_v15  ;;  %v3106_v15 = vpack.c.bf16 %v1922_v43, %v1918_v1 }
 0x3e6   :  { %3068 = vmatprep.subr.bf16.mxu0 %v3067_v42  ;;  %v1917_v42 = vld [vmem:[#allocation7 + $0x140] sm:$0xff] }
 0x3e7   :  { %v3108_v2 = vpack.c.bf16 %v1921_v44, %v1917_v42 }
 0x3e9   :  { %3070 = vmatpush3.bf16.msra.mxu0 %v3069_v3 }
 0x3ea   :  { %3072 = vmatprep.subr.bf16.mxu0 %v3071_v37  ;;  %v3110_v37 = vpack.c.bf16 %v1930_v52, %v1926_v39 }
 0x3ed   :  { %3074 = vmatpush3.bf16.msra.mxu0 %v3073_v12  ;;  %v1938_v12 = vld [vmem:[#allocation7 + $0x1e8] sm:$0xff] }
 0x3ee   :  { %3076 = vmatprep.subr.bf16.mxu0 %v3075_v63 }
 0x3f1   :  { %3078 = vmatpush3.bf16.msra.mxu0 %v3077_v29 }
 0x3f4   :  { %1652 = vmatmul.mubr.f32.vlgmr.msra.gmra.mrb[24].mxu0 %v4385_v56 }
 0x3f5   :  { %1656 = vmatprep.mubr.f32.mxu0 %v4396_v57 }
 0x3f8   :  { %1657 = vmatmul.mubr.f32.gmra.mrb[26].mxu0 %v4399_v17 }
 0x3f9   :  { %1661 = vmatprep.mubr.f32.mxu0 %v4428_v13 }
 0x3fc   :  { %1662 = vmatmul.mubr.f32.gmra.mrb[28].mxu0 %v4422_v0 }
 0x3fd   :  { %1666 = vmatprep.mubr.f32.mxu0 %v1577_v53  ;;  %v1877_v53 = vld [vmem:[#allocation7] sm:$0xff] }
 0x3fe   :  { %v3088_v47 = vpack.c.bf16 %v1881_v18, %v1877_v53 }
 0x400   :  { %1667 = vmatmul.mubr.f32.gmra.mrb[30].mxu0 %v1575_v26  ;;  %v1878_v26 = vld [vmem:[#allocation7 + $0x8] sm:$0xff] }
 0x401   :  { %2027 = vmatprep.mubr.f32.mxu0 %v4731_v46  ;;  %v3086_v59 = vpack.c.bf16 %v1882_v32, %v1878_v26 }
 0x403   :  { %3087 = vmatprep.subr.bf16.mxu0 %v3086_v59 }
 0x404   :  { %3089 = vmatpush1.bf16.msra.mxu0 %v3088_v47 }
 0x405   :  { %3091 = vmatprep.subr.bf16.mxu0 %v3090_v35 }
 0x408   :  { %3093 = vmatpush1.bf16.msra.mxu0 %v3092_v36  ;;  %v2707_v36 = vld [vmem:[%s4646_s8] ss:$0 sm:$0xff] }
 0x409   :  { %3095 = vmatprep.subr.bf16.mxu0 %v3094_v9 }
 0x40c   :  { %3097 = vmatpush1.bf16.msra.mxu0 %v3096_v49 }
 0x40d   :  { %3099 = vmatprep.subr.bf16.mxu0 %v3098_v24 }
 0x410   :  { %3101 = vmatpush1.bf16.msra.mxu0 %v3100_v23 }
 0x411   :  { %3103 = vmatprep.subr.bf16.mxu0 %v3102_v14 }
 0x414   :  { %3105 = vmatpush1.bf16.msra.mxu0 %v3104_v41 }
 0x415   :  { %3107 = vmatprep.subr.bf16.mxu0 %v3106_v15 }
 0x418   :  { %3109 = vmatpush1.bf16.msra.mxu0 %v3108_v2 }
 0x419   :  { %3111 = vmatprep.subr.bf16.mxu0 %v3110_v37 }
 0x41c   :  { %3113 = vmatpush1.bf16.msra.mxu0 %v3112_v31 }
 0x484   :  { %v2759_v4 = vpop.f32.mrb[8].mxu0 }
 0x485   :  { %v2760_v55 = vpop.f32.mrb[9].mxu0 }
 0x486   :  { %v4454_v16 = vadd.f32 %v2760_v55, %v2759_v4  ;;  %v3114_v4 = vpack.c.bf16 %v1938_v12, %v1934_v38  ;;  %v1933_v55 = vld [vmem:[#allocation7 + $0x1c0] sm:$0xff] }
 0x488   :  { %v2762_v56 = vpop.f32.mrb[10].mxu0  ;;  %3115 = vmatprep.subr.bf16.mxu0 %v3114_v4 }
 0x489   :  { %v2763_v57 = vpop.f32.mrb[11].mxu0 }
 0x48a   :  { %v4457_v17 = vadd.f32 %v2763_v57, %v2762_v56  ;;  %v1937_v56 = vld [vmem:[#allocation7 + $0x1e0] sm:$0xff] }
 0x48d   :  { %v2765_v0 = vpop.f32.mrb[12].mxu0 }
 0x48e   :  { %v2766_v13 = vpop.f32.mrb[13].mxu0 }
 0x48f   :  { %v4460_v58 = vadd.f32 %v2766_v13, %v2765_v0  ;;  %v3116_v13 = vpack.c.bf16 %v1937_v56, %v1933_v55 }
 0x491   :  { %3117 = vmatpush1.bf16.msra.mxu0 %v3116_v13 }
 0x499   :  { %v2768_v6 = vpop.f32.mrb[14].mxu0 }
 0x49a   :  { %v2769_v34 = vpop.f32.mrb[15].mxu0 }
 0x49b   :  { %v2770_v21 = vadd.f32 %v2769_v34, %v2768_v6 }
 0x4a7   :  { %v2803_v3 = vpop.f32.mrb[16].mxu0 }
 0x4a8   :  { %v2804_v50 = vpop.f32.mrb[17].mxu0 }
 0x4a9   :  { %v2805_v63 = vadd.f32 %v2804_v50, %v2803_v3 }
 0x4ab   :  { %v1539_v7 = vadd.f32 %v2805_v63, %v4454_v16  ;;  %v2806_v29 = vpop.f32.mrb[18].mxu0 }
 0x4ac   :  { %v2807_v57 = vpop.f32.mrb[19].mxu0 }
 0x4ad   :  { %v2808_v0 = vadd.f32 %v2807_v57, %v2806_v29 }
 0x4af   :  { %v1544_v26 = vadd.f32 %v2808_v0, %v4457_v17  ;;  %v2809_v32 = vpop.f32.mrb[20].mxu0 }
 0x4b0   :  { %v2810_v53 = vpop.f32.mrb[21].mxu0 }
 0x4b1   :  { %v2811_v59 = vadd.f32 %v2810_v53, %v2809_v32 }
 0x4b3   :  { %v1549_v18 = vadd.f32 %v2811_v59, %v4460_v58  ;;  %v2812_v47 = vpop.f32.mrb[22].mxu0 }
 0x4b4   :  { %v2813_v16 = vpop.f32.mrb[23].mxu0 }
 0x4b5   :  { %v2814_v45 = vadd.f32 %v2813_v16, %v2812_v47 }
 0x4b7   :  { %v1554_v27 = vadd.f32 %v2814_v45, %v2770_v21 }
 0x4c7   :  { %v2847_v35 = vpop.f32.mrb[24].mxu0 }
 0x4c8   :  { %v2848_v54 = vpop.f32.mrb[25].mxu0 }
 0x4c9   :  { %v2849_v20 = vadd.f32 %v2848_v54, %v2847_v35 }
 0x4cb   :  { %v1672_v60 = vadd.f32 %v2849_v20, %v1539_v7  ;;  %v2850_v17 = vpop.f32.mrb[26].mxu0 }
 0x4cc   :  { %v2851_v48 = vpop.f32.mrb[27].mxu0 }
 0x4cd   :  { %v4468_v9 = vadd.f32 %v2707_v36, %v1672_v60  ;;  %v2852_v8 = vadd.f32 %v2851_v48, %v2850_v17 }
 0x4cf   :  { %v4471_v30 = vmul.f32 0.70710677, %v4468_v9  ;;  %v1673_v58 = vadd.f32 %v2852_v8, %v1544_v26  ;;  %v2853_v51 = vpop.f32.mrb[28].mxu0 }
 0x4d0   :  { %v2854_v33 = vpop.f32.mrb[29].mxu0 }
 0x4d1   :  { %v1703_v6 = vand.u32 2147483647, %v4471_v30  ;;  %v4474_v49 = vadd.f32 %v2707_v36, %v1673_v58  ;;  %v2855_v34 = vadd.f32 %v2854_v33, %v2853_v51  ;;  %vm1695_vm1 = vcmp.ge.f32.partialorder %v4471_v30, 0.0 }
 0x4d3   :  { %v1707_v24 = vmul.f32 0.3275911, %v1703_v6  ;;  %v4477_v61 = vmul.f32 0.70710677, %v4474_v49  ;;  %v1674_v62 = vadd.f32 %v2855_v34, %v1549_v18  ;;  %v2856_v21 = vpop.f32.mrb[30].mxu0  ;;  %v1759_v52 = vsub.f32 0.0, %v1703_v6 }
 0x4d4   :  { %v2857_v23 = vpop.f32.mrb[31].mxu0 }
 0x4d5   :  { %v1711_v10 = vadd.f32 1.0, %v1707_v24  ;;  %v1704_v5 = vand.u32 2147483647, %v4477_v61  ;;  %v4480_v14 = vadd.f32 %v2707_v36, %v1674_v62  ;;  %v2858_v11 = vadd.f32 %v2857_v23, %v2856_v21 }
 0x4d6   :  { %v1763_v28 = vmul.f32 %v1759_v52, %v1703_v6  ;;  %vm1696_vm11 = vcmp.ge.f32.partialorder %v4477_v61, 0.0  ;;  %v1688_v61 = vmul.f32 0.5, %v4474_v49 }
 0x4d7   :  { %3381 = vrcp.f32 %v1711_v10  ;;  %v1708_v40 = vmul.f32 0.3275911, %v1704_v5  ;;  %v4483_v1 = vmul.f32 0.70710677, %v4480_v14  ;;  %v1675_v43 = vadd.f32 %v2858_v11, %v1554_v27 }
 0x4d8   :  { %v1760_v50 = vsub.f32 0.0, %v1704_v5  ;;  %v1767_v7 = vmul.f32 1.442695, %v1763_v28 }
 0x4d9   :  { %v1712_v41 = vadd.f32 1.0, %v1708_v40  ;;  %v1705_v15 = vand.u32 2147483647, %v4483_v1  ;;  %v4486_v42 = vadd.f32 %v2707_v36, %v1675_v43  ;;  %vm1697_vm12 = vcmp.ge.f32.partialorder %v4483_v1, 0.0 }
 0x4da   :  { %v1764_v29 = vmul.f32 %v1760_v50, %v1704_v5 }
 0x4db   :  { %3383 = vrcp.f32 %v1712_v41  ;;  %v1709_v44 = vmul.f32 0.3275911, %v1705_v15  ;;  %v4489_v39 = vmul.f32 0.70710677, %v4486_v42  ;;  %v1761_v56 = vsub.f32 0.0, %v1705_v15 }
 0x4dc   :  { %v1769_v13 = vmul.f32 1.442695, %v1764_v29 }
 0x4dd   :  { %v1713_v2 = vadd.f32 1.0, %v1709_v44  ;;  %v1706_v3 = vand.u32 2147483647, %v4489_v39  ;;  %v1765_v59 = vmul.f32 %v1761_v56, %v1705_v15  ;;  %v1699_v44 = vsel %vm1695_vm1, 1.0, %v4712_v19 }
 0x4de   :  { %vm1698_vm13 = vcmp.ge.f32.partialorder %v4489_v39, 0.0 }
 0x4df   :  { %3385 = vrcp.f32 %v1713_v2  ;;  %v1710_v37 = vmul.f32 0.3275911, %v1706_v3  ;;  %v1762_v18 = vsub.f32 0.0, %v1706_v3  ;;  %v1771_v36 = vmul.f32 1.442695, %v1765_v59 }
 0x4e0   :  { %v1701_v59 = vsel %vm1697_vm12, 1.0, %v4712_v19 }
 0x4e1   :  { %v3382_v22 = vpop.eup %3381  ;;  %v1714_v12 = vadd.f32 1.0, %v1710_v37  ;;  %v1766_v60 = vmul.f32 %v1762_v18, %v1706_v3 }
 0x4e2   :  { %v1723_v38 = vmul.f32 1.0614054, %v3382_v22 }
 0x4e3   :  { %3387 = vrcp.f32 %v1714_v12  ;;  %v1773_v24 = vmul.f32 1.442695, %v1766_v60  ;;  %v1690_v60 = vmul.f32 0.5, %v4486_v42 }
 0x4e4   :  { %v2708_v63 = vadd.f32 -1.4531521, %v1723_v38  ;;  %3389 = vpow2.f32 %v1767_v7  ;;  %v1700_v38 = vsel %vm1696_vm11, 1.0, %v4712_v19 }
 0x4e5   :  { %v3384_v31 = vpop.eup %3383  ;;  %3391 = vpow2.f32 %v1769_v13 }
 0x4e6   :  { %v1731_v4 = vmul.f32 %v3382_v22, %v2708_v63  ;;  %v1724_v55 = vmul.f32 1.0614054, %v3384_v31  ;;  %3393 = vpow2.f32 %v1771_v36 }
 0x4e7   :  { %3395 = vpow2.f32 %v1773_v24  ;;  %v1883_v24 = vld [vmem:[#allocation7 + $0x30] sm:$0xff] }
 0x4e8   :  { %v1735_v57 = vadd.f32 1.4214138, %v1731_v4  ;;  %v2709_v0 = vadd.f32 -1.4531521, %v1724_v55 }
 0x4e9   :  { %v3386_v26 = vpop.eup %3385 }
 0x4ea   :  { %v1739_v32 = vmul.f32 %v3382_v22, %v1735_v57  ;;  %v1732_v53 = vmul.f32 %v3384_v31, %v2709_v0  ;;  %v1725_v47 = vmul.f32 1.0614054, %v3386_v26 }
 0x4ec   :  { %v2712_v16 = vadd.f32 -0.28449672, %v1739_v32  ;;  %v1736_v45 = vadd.f32 1.4214138, %v1732_v53  ;;  %v2710_v27 = vadd.f32 -1.4531521, %v1725_v47 }
 0x4ed   :  { %v3388_v35 = vpop.eup %3387 }
 0x4ee   :  { %v1747_v54 = vmul.f32 %v3382_v22, %v2712_v16  ;;  %v1740_v20 = vmul.f32 %v3384_v31, %v1736_v45  ;;  %v1733_v17 = vmul.f32 %v3386_v26, %v2710_v27  ;;  %v1726_v48 = vmul.f32 1.0614054, %v3388_v35  ;;  %v3390_v62 = vpop.eup %3389  ;;  %v4733_v16 = vld [vmem:[#allocation24_spill] sm:$0xff] }
 0x4ef   :  { %v3392_v15 = vpop.eup %3391 }
 0x4f0   :  { %v1751_v8 = vadd.f32 0.2548296, %v1747_v54  ;;  %v2713_v58 = vadd.f32 -0.28449672, %v1740_v20  ;;  %v1737_v51 = vadd.f32 1.4214138, %v1733_v17  ;;  %v3394_v7 = vpop.eup %3393 }
 0x4f1   :  { %v2711_v33 = vadd.f32 -1.4531521, %v1726_v48  ;;  %v3396_v32 = vpop.eup %3395  ;;  %v1702_v54 = vsel %vm1698_vm13, 1.0, %v4712_v19  ;;  %v1689_v20 = vmul.f32 0.5, %v4480_v14  ;;  %v1880_v48 = vld [vmem:[#allocation7 + $0x18] sm:$0xff]  ;;  %v1879_v14 = vld [vmem:[#allocation7 + $0x10] sm:$0xff] }
 0x4f2   :  { %v1755_v6 = vmul.f32 %v3382_v22, %v1751_v8  ;;  %v1748_v34 = vmul.f32 %v3384_v31, %v2713_v58  ;;  %v1741_v21 = vmul.f32 %v3386_v26, %v1737_v51  ;;  %v1884_v8 = vld [vmem:[#allocation7 + $0x38] sm:$0xff]  ;;  %v3120_v42 = vpack.c.bf16 %v1883_v24, %v1879_v14 }
 0x4f3   :  { %v1734_v10 = vmul.f32 %v3388_v35, %v2711_v33  ;;  %v4734_v58 = vld [vmem:[#allocation25_spill] sm:$0xff]  ;;  %v4735_v33 = vld [vmem:[#allocation26_spill] sm:$0xff] }
 0x4f4   :  { %v1775_v5 = vmul.f32 %v3390_v62, %v1755_v6  ;;  %v1752_v23 = vadd.f32 0.2548296, %v1748_v34  ;;  %v2714_v11 = vadd.f32 -0.28449672, %v1741_v21  ;;  %v3118_v34 = vpack.c.bf16 %v1884_v8, %v1880_v48  ;;  %v1888_v21 = vld [vmem:[#allocation7 + $0x58] sm:$0xff] }
 0x4f5   :  { %v1738_v40 = vadd.f32 1.4214138, %v1734_v10  ;;  %v1892_v10 = vld [vmem:[#allocation7 + $0x78] sm:$0xff] }
 0x4f6   :  { %v1779_v43 = vsub.f32 1.0, %v1775_v5  ;;  %v1756_v41 = vmul.f32 %v3384_v31, %v1752_v23  ;;  %v1749_v52 = vmul.f32 %v3386_v26, %v2714_v11  ;;  %v1687_v31 = vmul.f32 0.5, %v4468_v9  ;;  %v4732_v9 = vld [vmem:[#allocation23_spill] sm:$0xff]  ;;  %v1887_v23 = vld [vmem:[#allocation7 + $0x50] sm:$0xff] }
 0x4f7   :  { %v1742_v2 = vmul.f32 %v3388_v35, %v1738_v40  ;;  %v3122_v5 = vpack.c.bf16 %v1892_v10, %v1888_v21  ;;  %v1891_v11 = vld [vmem:[#allocation7 + $0x70] sm:$0xff]  ;;  %v1896_v40 = vld [vmem:[#allocation7 + $0x98] sm:$0xff] }
 0x4f8   :  { %v1783_v3 = vmul.f32 %v1779_v43, %v1699_v44  ;;  %v1776_v37 = vmul.f32 %v3392_v15, %v1756_v41  ;;  %v1753_v22 = vadd.f32 0.2548296, %v1749_v52  ;;  %v1900_v43 = vld [vmem:[#allocation7 + $0xb8] sm:$0xff]  ;;  %v3124_v41 = vpack.c.bf16 %v1891_v11, %v1887_v23  ;;  %v1895_v44 = vld [vmem:[#allocation7 + $0x90] sm:$0xff] }
 0x4f9   :  { %v2715_v28 = vadd.f32 -0.28449672, %v1742_v2  ;;  %v3126_v15 = vpack.c.bf16 %v1900_v43, %v1896_v40  ;;  %v1899_v52 = vld [vmem:[#allocation7 + $0xb0] sm:$0xff]  ;;  %v1904_v2 = vld [vmem:[#allocation7 + $0xd8] sm:$0xff] }
 0x4fa   :  { %v1787_v50 = vadd.f32 1.0, %v1783_v3  ;;  %v1780_v30 = vsub.f32 1.0, %v1776_v37  ;;  %v1757_v12 = vmul.f32 %v3386_v26, %v1753_v22  ;;  %v1908_v3 = vld [vmem:[#allocation7 + $0xf8] sm:$0xff]  ;;  %v3128_v37 = vpack.c.bf16 %v1899_v52, %v1895_v44 }
 0x4fb   :  { %v1750_v63 = vmul.f32 %v3388_v35, %v2715_v28  ;;  %v3130_v22 = vpack.c.bf16 %v1908_v3, %v1904_v2  ;;  %v1903_v28 = vld [vmem:[#allocation7 + $0xd0] sm:$0xff] }
 0x4fc   :  { %v1784_v29 = vmul.f32 %v1780_v30, %v1700_v38  ;;  %v1777_v4 = vmul.f32 %v3394_v7, %v1757_v12  ;;  %v1791_v56 = vmul.f32 %v1787_v50, %v1687_v31  ;;  %v1907_v50 = vld [vmem:[#allocation7 + $0xf0] sm:$0xff]  ;;  %v1912_v30 = vld [vmem:[#allocation7 + $0x118] sm:$0xff] }
 0x4fd   :  { %v1754_v55 = vadd.f32 0.2548296, %v1750_v63  ;;  %v1916_v38 = vld [vmem:[#allocation7 + $0x138] sm:$0xff]  ;;  %v3132_v12 = vpack.c.bf16 %v1907_v50, %v1903_v28  ;;  %v1911_v7 = vld [vmem:[#allocation7 + $0x110] sm:$0xff] }
 0x4fe   :  { %v1788_v57 = vadd.f32 1.0, %v1784_v29  ;;  %v1781_v0 = vsub.f32 1.0, %v1777_v4  ;;  %v1796_v47 = vadd.f32 %v1791_v56, %v4732_v9  ;;  %v3134_v63 = vpack.c.bf16 %v1916_v38, %v1912_v30  ;;  %v1920_v31 = vld [vmem:[#allocation7 + $0x158] sm:$0xff]  ;;  %v1919_v56 = vld [vmem:[#allocation7 + $0x150] sm:$0xff] }
 0x4ff   :  { %v1758_v13 = vmul.f32 %v3388_v35, %v1754_v55  ;;  %v1924_v29 = vld [vmem:[#allocation7 + $0x178] sm:$0xff] }
 0x500   :  { %v1792_v53 = vmul.f32 %v1788_v57, %v1688_v61  ;;  %v1785_v26 = vmul.f32 %v1781_v0, %v1701_v59  ;;  %v3138_v55 = vpack.c.bf16 %v1924_v29, %v1920_v31  ;;  %v1923_v61 = vld [vmem:[#allocation7 + $0x170] sm:$0xff]  ;;  %v1928_v57 = vld [vmem:[#allocation7 + $0x198] sm:$0xff]  ;;  %v2301_v31 = vld [vmem:[#allocation8 + $0x8] sm:$0xff] }
 0x501   :  { %v1778_v18 = vmul.f32 %v3396_v32, %v1758_v13  ;;  %v1932_v0 = vld [vmem:[#allocation7 + $0x1b8] sm:$0xff]  ;;  %v3140_v13 = vpack.c.bf16 %v1923_v61, %v1919_v56  ;;  %v1931_v59 = vld [vmem:[#allocation7 + $0x1b0] sm:$0xff]  ;;  %v2300_v61 = vld [vmem:[#allocation8] sm:$0xff] }
 0x502   :  { %v1797_v1 = vadd.f32 %v1792_v53, %v4733_v16  ;;  %v1789_v45 = vadd.f32 1.0, %v1785_v26  ;;  %v3142_v32 = vpack.c.bf16 %v1932_v0, %v1928_v57  ;;  %v1927_v53 = vld [vmem:[#allocation7 + $0x190] sm:$0xff]  ;;  %v1940_v9 = vld [vmem:[#allocation7 + $0x1f8] sm:$0xff] }
 0x503   :  { %v1782_v27 = vsub.f32 1.0, %v1778_v18  ;;  %v3144_v26 = vpack.c.bf16 %v1931_v59, %v1927_v53  ;;  %v1936_v18 = vld [vmem:[#allocation7 + $0x1d8] sm:$0xff]  ;;  %v1935_v16 = vld [vmem:[#allocation7 + $0x1d0] sm:$0xff]  ;;  %v2305_v59 = vld [vmem:[#allocation8 + $0x28] sm:$0xff] }
 0x504   :  { %v3080_v49 = vpack.c.bf16 %v1797_v1, %v1796_v47  ;;  %v1793_v36 = vmul.f32 %v1789_v45, %v1689_v20  ;;  %v3146_v47 = vpack.c.bf16 %v1940_v9, %v1936_v18  ;;  %v1939_v1 = vld [vmem:[#allocation7 + $0x1f0] sm:$0xff]  ;;  %v2303_v29 = vld [vmem:[#allocation8 + $0x18] sm:$0xff]  ;;  %v2369_v9 = vld [vmem:[#allocation8 + $0x228] sm:$0xff] }
 0x505   :  { %v1786_v35 = vmul.f32 %v1782_v27, %v1702_v54  ;;  %v3148_v45 = vpack.c.bf16 %v1939_v1, %v1935_v16  ;;  %v4736_v20 = vld [vmem:[#allocation20_spill] sm:$0xff]  ;;  %v2367_v56 = vld [vmem:[#allocation8 + $0x218] sm:$0xff] }
 0x506   :  { %3081 = vmatpush3.bf16.msra.mxu1 %v3080_v49  ;;  %v1798_v51 = vadd.f32 %v1793_v36, %v4734_v58  ;;  %v1941_v49 = vld [vmem:[%s4649_s11] sm:$0xf]  ;;  %v4521_v36 = vsub.s32 3, %v4736_v20  ;;  %v2302_v57 = vld [vmem:[#allocation8 + $0x10] sm:$0xff]  ;;  %v2307_v18 = vld [vmem:[#allocation8 + $0x38] sm:$0xff] }
 0x507   :  { %v1790_v17 = vadd.f32 1.0, %v1786_v35  ;;  %3082 = vmatprep.subr.bf16.mxu1 %v3550_v25  ;;  %v1795_v25 = vld [vmem:[%s4647_s9] sm:$0x3]  ;;  %v4518_v35 = vsub.s32 2, %v4736_v20  ;;  %v2366_v53 = vld [vmem:[#allocation8 + $0x210] sm:$0xff]  ;;  %v3154_v16 = vpack.c.bf16 %v2307_v18, %v2305_v59 }
 0x508   :  { %v2370_v20 = vld [vmem:[#allocation8 + $0x230] sm:$0xff] }
 0x509   :  { %v1794_v39 = vmul.f32 %v1790_v17, %v1690_v60  ;;  %v4737_v60 = vld [vmem:[#allocation21_spill] sm:$0xff]  ;;  %v1954_v8 = vrot.slane %v1941_v49, %v4518_v35 }
 0x50a   :  { %v1946_v17 = vrot.slane %v1941_v49, %v4737_v60  ;;  %v2322_v59 = vld [vmem:[#allocation8 + $0xb0] sm:$0xff] }
 0x50b   :  { %v1799_v6 = vadd.f32 %v1794_v39, %v4735_v33  ;;  %v4738_v39 = vld [vmem:[#allocation22_spill] sm:$0xff]  ;;  %v1958_v33 = vrot.slane %v1941_v49, %v4521_v36 }
 0x50c   :  { %v1950_v48 = vrot.slane %v1941_v49, %v4738_v39 }
 0x50d   :  { %v3083_v62 = vpack.c.bf16 %v1799_v6, %v1798_v51 }
 0x50f   :  { %3085 = vmatpush3.bf16.msk.msra.mxu1 %vm3084_vm15, %v3083_v62 }
 0x510   :  { %3119 = vmatprep.subr.bf16.mxu1 %v3118_v34 }
 0x512   :  { %2873 = vmatmul.mubr.msk.f32.vlgmr.msra.gmra.mrb[8].mxu1 %vm1800_vm4, %v1795_v25 }
 0x513   :  { %3121 = vmatpush1.bf16.msra.mxu1 %v3120_v42  ;;  %2098 = vmatprep.mubr.f32.mxu1 %v4731_v46  ;;  %v1915_v46 = vld [vmem:[#allocation7 + $0x130] sm:$0xff] }
 0x514   :  { %3123 = vmatprep.subr.bf16.mxu1 %v3122_v5  ;;  %v3136_v4 = vpack.c.bf16 %v1915_v46, %v1911_v7 }
 0x517   :  { %3125 = vmatpush1.bf16.msra.mxu1 %v3124_v41 }
 0x518   :  { %3127 = vmatprep.subr.bf16.mxu1 %v3126_v15 }
 0x51b   :  { %3129 = vmatpush1.bf16.msra.mxu1 %v3128_v37 }
 0x51c   :  { %3131 = vmatprep.subr.bf16.mxu1 %v3130_v22 }
 0x51f   :  { %3133 = vmatpush1.bf16.msra.mxu1 %v3132_v12 }
 0x520   :  { %3135 = vmatprep.subr.bf16.mxu1 %v3134_v63 }
 0x523   :  { %3137 = vmatpush1.bf16.msra.mxu1 %v3136_v4  ;;  %v2365_v4 = vld [vmem:[#allocation8 + $0x208] sm:$0xff] }
 0x524   :  { %3139 = vmatprep.subr.bf16.mxu1 %v3138_v55  ;;  %v3150_v55 = vpack.c.bf16 %v2303_v29, %v2301_v31  ;;  %v3214_v0 = vpack.c.bf16 %v2367_v56, %v2365_v4  ;;  %v2380_v31 = vld [vmem:[#allocation8 + $0x280] sm:$0xff]  ;;  %v2382_v4 = vld [vmem:[#allocation8 + $0x290] sm:$0xff]  ;;  %v2323_v56 = vld [vmem:[#allocation8 + $0xb8] sm:$0xff] }
 0x526   :  { %3215 = vmatprep.subr.bf16.mxu0 %v3214_v0 }
 0x527   :  { %3141 = vmatpush1.bf16.msra.mxu1 %v3140_v13  ;;  %v3152_v13 = vpack.c.bf16 %v2302_v57, %v2300_v61  ;;  %v2385_v61 = vld [vmem:[#allocation8 + $0x2a8] sm:$0xff]  ;;  %v2387_v57 = vld [vmem:[#allocation8 + $0x2b8] sm:$0xff] }
 0x528   :  { %3143 = vmatprep.subr.bf16.mxu1 %v3142_v32  ;;  %v2364_v32 = vld [vmem:[#allocation8 + $0x200] sm:$0xff]  ;;  %v3234_v18 = vpack.c.bf16 %v2387_v57, %v2385_v61 }
 0x529   :  { %v2400_v61 = vld [vmem:[#allocation8 + $0x320] sm:$0xff] }
 0x52b   :  { %3145 = vmatpush1.bf16.msra.mxu1 %v3144_v26  ;;  %v3216_v26 = vpack.c.bf16 %v2366_v53, %v2364_v32  ;;  %v2320_v53 = vld [vmem:[#allocation8 + $0xa0] sm:$0xff] }
 0x52c   :  { %3147 = vmatprep.subr.bf16.mxu1 %v3146_v47  ;;  %v2371_v47 = vld [vmem:[#allocation8 + $0x238] sm:$0xff] }
 0x52d   :  { %v3218_v1 = vpack.c.bf16 %v2371_v47, %v2369_v9  ;;  %v2386_v9 = vld [vmem:[#allocation8 + $0x2b0] sm:$0xff]  ;;  %v2325_v47 = vld [vmem:[#allocation8 + $0xc8] sm:$0xff] }
 0x52f   :  { %3149 = vmatpush1.bf16.msra.mxu1 %v3148_v45  ;;  %v2304_v45 = vld [vmem:[#allocation8 + $0x20] sm:$0xff] }
 0x530   :  { %3151 = vmatprep.subr.bf16.mxu1 %v3150_v55  ;;  %v2321_v55 = vld [vmem:[#allocation8 + $0xa8] sm:$0xff] }
 0x531   :  { %v3170_v32 = vpack.c.bf16 %v2323_v56, %v2321_v55  ;;  %v2336_v55 = vld [vmem:[#allocation8 + $0x120] sm:$0xff]  ;;  %v2338_v56 = vld [vmem:[#allocation8 + $0x130] sm:$0xff] }
 0x5e5   :  { %v1873_v27 = vpop.f32.mrb[8].mxu1 }
 0x5e6   :  { %2028 = vmatmul.mubr.f32.vlgmr.msra.gmra.mrb[32].mxu0 %v1873_v27  ;;  %2099 = vmatmul.mubr.f32.vlgmr.msra.gmra.mrb[10].mxu1 %v1873_v27  ;;  %v2874_v54 = vpop.f32.mrb[9].mxu1  ;;  %v2306_v27 = vld [vmem:[#allocation8 + $0x30] sm:$0xff] }
 0x5e7   :  { %3153 = vmatpush1.bf16.msra.mxu1 %v3152_v13  ;;  %v2368_v54 = vld [vmem:[#allocation8 + $0x220] sm:$0xff]  ;;  %3217 = vmatpush1.bf16.msra.mxu0 %v3216_v26  ;;  %v3156_v49 = vpack.c.bf16 %v2306_v27, %v2304_v45  ;;  %v3232_v13 = vpack.c.bf16 %v2382_v4, %v2380_v31  ;;  %v2391_v45 = vld [vmem:[#allocation8 + $0x2d8] sm:$0xff]  ;;  %v3172_v27 = vpack.c.bf16 %v2322_v59, %v2320_v53  ;;  %v2405_v53 = vld [vmem:[#allocation8 + $0x348] sm:$0xff] }
 0x5e8   :  { %3155 = vmatprep.subr.bf16.mxu1 %v3154_v16  ;;  %3219 = vmatprep.subr.bf16.mxu0 %v3218_v1  ;;  %v2384_v26 = vld [vmem:[#allocation8 + $0x2a0] sm:$0xff]  ;;  %v2327_v16 = vld [vmem:[#allocation8 + $0xd8] sm:$0xff]  ;;  %v2389_v1 = vld [vmem:[#allocation8 + $0x2c8] sm:$0xff] }
 0x5e9   :  { %v2407_v59 = vld [vmem:[#allocation8 + $0x358] sm:$0xff] }
 0x5eb   :  { %3157 = vmatpush1.bf16.msra.mxu1 %v3156_v49  ;;  %v3174_v49 = vpack.c.bf16 %v2327_v16, %v2325_v47  ;;  %v2340_v47 = vld [vmem:[#allocation8 + $0x140] sm:$0xff]  ;;  %v2342_v16 = vld [vmem:[#allocation8 + $0x150] sm:$0xff] }
 0x6b9   :  { %v2029_v58 = vpop.f32.mrb[32].mxu0  ;;  %v2100_v51 = vpop.f32.mrb[10].mxu1 }
 0x6ba   :  { %v2030_v6 = vadd.f32 %v2029_v58, %v1946_v17  ;;  %v2031_v34 = vpop.f32.mrb[33].mxu0  ;;  %v2102_v14 = vpop.f32.mrb[11].mxu1  ;;  %v2101_v62 = vadd.f32 %v2100_v51, %v1954_v8  ;;  %v2309_v17 = vld [vmem:[#allocation8 + $0x48] sm:$0xff]  ;;  %v3220_v8 = vpack.c.bf16 %v2370_v20, %v2368_v54  ;;  %v3236_v54 = vpack.c.bf16 %v2386_v9, %v2384_v26  ;;  %v2324_v20 = vld [vmem:[#allocation8 + $0xc0] sm:$0xff] }
 0x6bb   :  { %v2032_v24 = vadd.f32 %v2031_v34, %v1950_v48  ;;  %v2103_v25 = vadd.f32 %v2102_v14, %v1958_v33  ;;  %v2311_v48 = vld [vmem:[#allocation8 + $0x58] sm:$0xff]  ;;  %v2373_v51 = vld [vmem:[#allocation8 + $0x248] sm:$0xff]  ;;  %v2310_v14 = vld [vmem:[#allocation8 + $0x50] sm:$0xff]  ;;  %v3188_v26 = vpack.c.bf16 %v2338_v56, %v2336_v55 }
 0x6bc   :  { %v2107_v21 = vsel %vm186_vm2, %v2030_v6, 0.0  ;;  %v2110_v5 = vsel %vm186_vm2, %v2101_v62, 0.0  ;;  %v3158_v58 = vpack.c.bf16 %v2311_v48, %v2309_v17  ;;  %v2375_v33 = vld [vmem:[#allocation8 + $0x258] sm:$0xff]  ;;  %3221 = vmatpush1.bf16.msra.mxu0 %v3220_v8  ;;  %v2326_v17 = vld [vmem:[#allocation8 + $0xd0] sm:$0xff]  ;;  %v2388_v48 = vld [vmem:[#allocation8 + $0x2c0] sm:$0xff]  ;;  %v3238_v8 = vpack.c.bf16 %v2391_v45, %v2389_v1 }
 0x6bd   :  { %v2108_v10 = vsel %vm186_vm2, %v2032_v24, 0.0  ;;  %v2112_v11 = vsel %vm186_vm2, %v2103_v25, 0.0  ;;  %v3222_v34 = vpack.c.bf16 %v2375_v33, %v2373_v51  ;;  %v2329_v51 = vld [vmem:[#allocation8 + $0xe8] sm:$0xff]  ;;  %v2331_v33 = vld [vmem:[#allocation8 + $0xf8] sm:$0xff]  ;;  %v2404_v1 = vld [vmem:[#allocation8 + $0x340] sm:$0xff]  ;;  %v3254_v45 = vpack.c.bf16 %v2407_v59, %v2405_v53 }
 0x6be   :  { %v2109_v42 = vadd.f32 %v2108_v10, %v2107_v21  ;;  %v2313_v10 = vld [vmem:[#allocation8 + $0x68] sm:$0xff]  ;;  %3159 = vmatprep.subr.bf16.mxu1 %v3158_v58  ;;  %v2390_v58 = vld [vmem:[#allocation8 + $0x2d0] sm:$0xff]  ;;  %v2423_v56 = vld [vmem:[#allocation8 + $0x3d8] sm:$0xff] }
 0x6bf   :  { %3223 = vmatprep.subr.bf16.mxu0 %v3222_v34  ;;  %v2395_v34 = vld [vmem:[#allocation8 + $0x2f8] sm:$0xff]  ;;  %v2421_v55 = vld [vmem:[#allocation8 + $0x3c8] sm:$0xff]  ;;  %v2420_v53 = vld [vmem:[#allocation8 + $0x3c0] sm:$0xff] }
 0x6c0   :  { %v2111_v23 = vadd.f32 %v2110_v5, %v2109_v42  ;;  %v2377_v42 = vld [vmem:[#allocation8 + $0x268] sm:$0xff]  ;;  %v3270_v59 = vpack.c.bf16 %v2423_v56, %v2421_v55 }
 0x6c2   :  { %v2113_v40 = vadd.f32 %v2112_v11, %v2111_v23  ;;  %v2379_v11 = vld [vmem:[#allocation8 + $0x278] sm:$0xff] }
 0x6c4   :  { %2114 = vadd.xlane.f32.xlu0 %v2113_v40  ;;  %v2312_v40 = vld [vmem:[#allocation8 + $0x60] sm:$0xff] }
 0x751   :  { %v2115_v43 = vpop.xlane.xlu0 %2114 }
 0x752   :  { %v2117_v41 = vmul.f32 0.001953125, %v2115_v43  ;;  %v2314_v43 = vld [vmem:[#allocation8 + $0x70] sm:$0xff] }
 0x754   :  { %v4531_v15 = vsub.f32 %v2030_v6, %v2117_v41  ;;  %v4533_v44 = vsub.f32 %v2032_v24, %v2117_v41  ;;  %v4535_v52 = vsub.f32 %v2101_v62, %v2117_v41  ;;  %v4537_v2 = vsub.f32 %v2103_v25, %v2117_v41  ;;  %v2308_v6 = vld [vmem:[#allocation8 + $0x40] sm:$0xff]  ;;  %v2374_v62 = vld [vmem:[#allocation8 + $0x250] sm:$0xff]  ;;  %v2315_v25 = vld [vmem:[#allocation8 + $0x78] sm:$0xff] }
 0x755   :  { %v2372_v24 = vld [vmem:[#allocation8 + $0x240] sm:$0xff]  ;;  %v3160_v21 = vpack.c.bf16 %v2310_v14, %v2308_v6  ;;  %v3162_v23 = vpack.c.bf16 %v2315_v25, %v2313_v10  ;;  %v3226_v41 = vpack.c.bf16 %v2379_v11, %v2377_v42  ;;  %v2393_v6 = vld [vmem:[#allocation8 + $0x2e8] sm:$0xff]  ;;  %v3176_v14 = vpack.c.bf16 %v2326_v17, %v2324_v20  ;;  %v2330_v10 = vld [vmem:[#allocation8 + $0xf0] sm:$0xff] }
 0x756   :  { %v2122_v3 = vmul.f32 %v4531_v15, %v4531_v15  ;;  %v2123_v37 = vmul.f32 %v4533_v44, %v4533_v44  ;;  %v2124_v22 = vmul.f32 %v4535_v52, %v4535_v52  ;;  %v2125_v28 = vmul.f32 %v4537_v2, %v4537_v2  ;;  %v2392_v25 = vld [vmem:[#allocation8 + $0x2e0] sm:$0xff]  ;;  %v2335_v11 = vld [vmem:[#allocation8 + $0x118] sm:$0xff]  ;;  %v2409_v20 = vld [vmem:[#allocation8 + $0x368] sm:$0xff] }
 0x757   :  { %v3224_v5 = vpack.c.bf16 %v2374_v62, %v2372_v24  ;;  %3161 = vmatpush1.bf16.msra.mxu1 %v3160_v21  ;;  %v3240_v24 = vpack.c.bf16 %v2390_v58, %v2388_v48  ;;  %v3178_v62 = vpack.c.bf16 %v2331_v33, %v2329_v51  ;;  %v2328_v21 = vld [vmem:[#allocation8 + $0xe0] sm:$0xff]  ;;  %v3242_v42 = vpack.c.bf16 %v2395_v34, %v2393_v6  ;;  %v2411_v17 = vld [vmem:[#allocation8 + $0x378] sm:$0xff]  ;;  %v2346_v33 = vld [vmem:[#allocation8 + $0x170] sm:$0xff] }
 0x758   :  { %v2126_v50 = vsel %vm186_vm2, %v2122_v3, 0.0  ;;  %v2127_v30 = vsel %vm186_vm2, %v2123_v37, 0.0  ;;  %v2129_v12 = vsel %vm186_vm2, %v2124_v22, 0.0  ;;  %v2131_v7 = vsel %vm186_vm2, %v2125_v28, 0.0  ;;  %v2376_v3 = vld [vmem:[#allocation8 + $0x260] sm:$0xff]  ;;  %v2378_v37 = vld [vmem:[#allocation8 + $0x270] sm:$0xff]  ;;  %3163 = vmatprep.subr.bf16.mxu1 %v3162_v23 }
 0x759   :  { %v2128_v38 = vadd.f32 %v2127_v30, %v2126_v50  ;;  %v2317_v22 = vld [vmem:[#allocation8 + $0x88] sm:$0xff]  ;;  %v2319_v28 = vld [vmem:[#allocation8 + $0x98] sm:$0xff]  ;;  %3225 = vmatpush1.bf16.msra.mxu0 %v3224_v5  ;;  %v2394_v5 = vld [vmem:[#allocation8 + $0x2f0] sm:$0xff]  ;;  %v3192_v48 = vpack.c.bf16 %v2342_v16, %v2340_v47  ;;  %v3258_v34 = vpack.c.bf16 %v2411_v17, %v2409_v20 }
 0x75a   :  { %v2381_v50 = vld [vmem:[#allocation8 + $0x288] sm:$0xff]  ;;  %v2383_v30 = vld [vmem:[#allocation8 + $0x298] sm:$0xff]  ;;  %3227 = vmatprep.subr.bf16.mxu0 %v3226_v41  ;;  %v3180_v41 = vpack.c.bf16 %v2330_v10, %v2328_v21  ;;  %v2344_v51 = vld [vmem:[#allocation8 + $0x160] sm:$0xff] }
 0x75b   :  { %v2130_v63 = vadd.f32 %v2129_v12, %v2128_v38  ;;  %v3164_v38 = vpack.c.bf16 %v2314_v43, %v2312_v40  ;;  %v3228_v12 = vpack.c.bf16 %v2378_v37, %v2376_v3  ;;  %v3230_v29 = vpack.c.bf16 %v2383_v30, %v2381_v50  ;;  %v2333_v23 = vld [vmem:[#allocation8 + $0x108] sm:$0xff]  ;;  %v2399_v43 = vld [vmem:[#allocation8 + $0x318] sm:$0xff]  ;;  %v2396_v50 = vld [vmem:[#allocation8 + $0x300] sm:$0xff] }
 0x75c   :  { %v2397_v40 = vld [vmem:[#allocation8 + $0x308] sm:$0xff]  ;;  %v3244_v3 = vpack.c.bf16 %v2394_v5, %v2392_v25  ;;  %v3182_v37 = vpack.c.bf16 %v2335_v11, %v2333_v23  ;;  %v2408_v6 = vld [vmem:[#allocation8 + $0x360] sm:$0xff]  ;;  %v2415_v10 = vld [vmem:[#allocation8 + $0x398] sm:$0xff]  ;;  %v3196_v25 = vpack.c.bf16 %v2346_v33, %v2344_v51 }
 0x75d   :  { %v2132_v46 = vadd.f32 %v2131_v7, %v2130_v63  ;;  %v3166_v63 = vpack.c.bf16 %v2319_v28, %v2317_v22  ;;  %v2316_v7 = vld [vmem:[#allocation8 + $0x80] sm:$0xff]  ;;  %3165 = vmatpush1.bf16.msra.mxu1 %v3164_v38  ;;  %3229 = vmatpush1.bf16.msra.mxu0 %v3228_v12  ;;  %v2334_v28 = vld [vmem:[#allocation8 + $0x110] sm:$0xff]  ;;  %v3246_v30 = vpack.c.bf16 %v2399_v43, %v2397_v40  ;;  %v2337_v12 = vld [vmem:[#allocation8 + $0x128] sm:$0xff] }
 0x75e   :  { %3231 = vmatprep.subr.bf16.mxu0 %v3230_v29  ;;  %v2332_v22 = vld [vmem:[#allocation8 + $0x100] sm:$0xff]  ;;  %v2398_v38 = vld [vmem:[#allocation8 + $0x310] sm:$0xff]  ;;  %v2413_v21 = vld [vmem:[#allocation8 + $0x388] sm:$0xff] }
 0x75f   :  { %2133 = vadd.xlane.f32.xlu1 %v2132_v46  ;;  %v2318_v46 = vld [vmem:[#allocation8 + $0x90] sm:$0xff]  ;;  %3167 = vmatprep.subr.bf16.mxu1 %v3166_v63  ;;  %v2339_v63 = vld [vmem:[#allocation8 + $0x138] sm:$0xff]  ;;  %v3184_v31 = vpack.c.bf16 %v2334_v28, %v2332_v22  ;;  %v3248_v29 = vpack.c.bf16 %v2398_v38, %v2396_v50  ;;  %v2348_v23 = vld [vmem:[#allocation8 + $0x180] sm:$0xff]  ;;  %v3262_v43 = vpack.c.bf16 %v2415_v10, %v2413_v21 }
 0x760   :  { %v3168_v0 = vpack.c.bf16 %v2318_v46, %v2316_v7  ;;  %v2401_v7 = vld [vmem:[#allocation8 + $0x328] sm:$0xff]  ;;  %v2403_v46 = vld [vmem:[#allocation8 + $0x338] sm:$0xff]  ;;  %v3186_v4 = vpack.c.bf16 %v2339_v63, %v2337_v12  ;;  %v2350_v11 = vld [vmem:[#allocation8 + $0x190] sm:$0xff] }
 0x761   :  { %3233 = vmatpush1.bf16.msra.mxu0 %v3232_v13  ;;  %v3250_v57 = vpack.c.bf16 %v2403_v46, %v2401_v7  ;;  %v2341_v13 = vld [vmem:[#allocation8 + $0x148] sm:$0xff]  ;;  %v2412_v40 = vld [vmem:[#allocation8 + $0x380] sm:$0xff]  ;;  %v2419_v28 = vld [vmem:[#allocation8 + $0x3b8] sm:$0xff]  ;;  %v3200_v50 = vpack.c.bf16 %v2350_v11, %v2348_v23 }
 0x762   :  { %3169 = vmatpush1.bf16.msra.mxu1 %v3168_v0  ;;  %3235 = vmatprep.subr.bf16.mxu0 %v3234_v18  ;;  %v2402_v0 = vld [vmem:[#allocation8 + $0x330] sm:$0xff]  ;;  %v2417_v22 = vld [vmem:[#allocation8 + $0x3a8] sm:$0xff]  ;;  %v2352_v12 = vld [vmem:[#allocation8 + $0x1a0] sm:$0xff] }
 0x763   :  { %3171 = vmatprep.subr.bf16.mxu1 %v3170_v32  ;;  %v2343_v32 = vld [vmem:[#allocation8 + $0x158] sm:$0xff]  ;;  %v3252_v18 = vpack.c.bf16 %v2402_v0, %v2400_v61  ;;  %v2354_v63 = vld [vmem:[#allocation8 + $0x1b0] sm:$0xff]  ;;  %v2416_v7 = vld [vmem:[#allocation8 + $0x3a0] sm:$0xff]  ;;  %v3266_v46 = vpack.c.bf16 %v2419_v28, %v2417_v22 }
 0x764   :  { %v3190_v9 = vpack.c.bf16 %v2343_v32, %v2341_v13  ;;  %v3204_v61 = vpack.c.bf16 %v2354_v63, %v2352_v12  ;;  %v2356_v13 = vld [vmem:[#allocation8 + $0x1c0] sm:$0xff]  ;;  %v2358_v32 = vld [vmem:[#allocation8 + $0x1d0] sm:$0xff]  ;;  %v2425_v47 = vld [vmem:[#allocation8 + $0x3e8] sm:$0xff] }
 0x765   :  { %3237 = vmatpush1.bf16.msra.mxu0 %v3236_v54  ;;  %v2345_v54 = vld [vmem:[#allocation8 + $0x168] sm:$0xff]  ;;  %v2427_v16 = vld [vmem:[#allocation8 + $0x3f8] sm:$0xff]  ;;  %v2424_v17 = vld [vmem:[#allocation8 + $0x3e0] sm:$0xff] }
 0x766   :  { %3173 = vmatpush1.bf16.msra.mxu1 %v3172_v27  ;;  %3239 = vmatprep.subr.bf16.mxu0 %v3238_v8  ;;  %v2406_v27 = vld [vmem:[#allocation8 + $0x350] sm:$0xff]  ;;  %v3274_v20 = vpack.c.bf16 %v2427_v16, %v2425_v47 }
 0x767   :  { %3175 = vmatprep.subr.bf16.mxu1 %v3174_v49  ;;  %v2347_v49 = vld [vmem:[#allocation8 + $0x178] sm:$0xff]  ;;  %v3256_v8 = vpack.c.bf16 %v2406_v27, %v2404_v1  ;;  %v3208_v1 = vpack.c.bf16 %v2358_v32, %v2356_v13 }
 0x768   :  { %v3194_v58 = vpack.c.bf16 %v2347_v49, %v2345_v54  ;;  %v2360_v54 = vld [vmem:[#allocation8 + $0x1e0] sm:$0xff]  ;;  %v2362_v49 = vld [vmem:[#allocation8 + $0x1f0] sm:$0xff] }
 0x769   :  { %3241 = vmatpush1.bf16.msra.mxu0 %v3240_v24  ;;  %v2349_v24 = vld [vmem:[#allocation8 + $0x188] sm:$0xff] }
 0x76a   :  { %3177 = vmatpush1.bf16.msra.mxu1 %v3176_v14  ;;  %3243 = vmatprep.subr.bf16.mxu0 %v3242_v42  ;;  %v2410_v14 = vld [vmem:[#allocation8 + $0x370] sm:$0xff] }
 0x76b   :  { %3179 = vmatprep.subr.bf16.mxu1 %v3178_v62  ;;  %v2351_v62 = vld [vmem:[#allocation8 + $0x198] sm:$0xff]  ;;  %v3260_v42 = vpack.c.bf16 %v2410_v14, %v2408_v6  ;;  %v2106_v14 = vld [vmem:[%s4651_s13] sm:$0xf] }
 0x76c   :  { %v3198_v5 = vpack.c.bf16 %v2351_v62, %v2349_v24  ;;  %v2171_v23 = vrot.slane %v2106_v14, %v4737_v60 }
 0x76d   :  { %3245 = vmatpush1.bf16.msra.mxu0 %v3244_v3  ;;  %v2353_v3 = vld [vmem:[#allocation8 + $0x1a8] sm:$0xff] }
 0x76e   :  { %3181 = vmatpush1.bf16.msra.mxu1 %v3180_v41  ;;  %3247 = vmatprep.subr.bf16.mxu0 %v3246_v30  ;;  %v2414_v41 = vld [vmem:[#allocation8 + $0x390] sm:$0xff] }
 0x76f   :  { %3183 = vmatprep.subr.bf16.mxu1 %v3182_v37  ;;  %v2355_v37 = vld [vmem:[#allocation8 + $0x1b8] sm:$0xff]  ;;  %v3264_v30 = vpack.c.bf16 %v2414_v41, %v2412_v40 }
 0x770   :  { %v3202_v38 = vpack.c.bf16 %v2355_v37, %v2353_v3  ;;  %v2179_v3 = vrot.slane %v2106_v14, %v4518_v35 }
 0x771   :  { %3249 = vmatpush1.bf16.msra.mxu0 %v3248_v29  ;;  %v2357_v29 = vld [vmem:[#allocation8 + $0x1c8] sm:$0xff] }
 0x772   :  { %3185 = vmatpush1.bf16.msra.mxu1 %v3184_v31  ;;  %3251 = vmatprep.subr.bf16.mxu0 %v3250_v57  ;;  %v2418_v31 = vld [vmem:[#allocation8 + $0x3b0] sm:$0xff] }
 0x773   :  { %3187 = vmatprep.subr.bf16.mxu1 %v3186_v4  ;;  %v2359_v4 = vld [vmem:[#allocation8 + $0x1d8] sm:$0xff]  ;;  %v3268_v57 = vpack.c.bf16 %v2418_v31, %v2416_v7 }
 0x774   :  { %v3206_v0 = vpack.c.bf16 %v2359_v4, %v2357_v29 }
 0x775   :  { %3253 = vmatpush1.bf16.msra.mxu0 %v3252_v18  ;;  %v2361_v18 = vld [vmem:[#allocation8 + $0x1e8] sm:$0xff] }
 0x776   :  { %3189 = vmatpush1.bf16.msra.mxu1 %v3188_v26  ;;  %3255 = vmatprep.subr.bf16.mxu0 %v3254_v45  ;;  %v2422_v26 = vld [vmem:[#allocation8 + $0x3d0] sm:$0xff] }
 0x777   :  { %3191 = vmatprep.subr.bf16.mxu1 %v3190_v9  ;;  %v2363_v9 = vld [vmem:[#allocation8 + $0x1f8] sm:$0xff]  ;;  %v3272_v45 = vpack.c.bf16 %v2422_v26, %v2420_v53 }
 0x778   :  { %v3210_v27 = vpack.c.bf16 %v2363_v9, %v2361_v18 }
 0x779   :  { %3257 = vmatpush1.bf16.msra.mxu0 %v3256_v8  ;;  %v3212_v8 = vpack.c.bf16 %v2362_v49, %v2360_v54 }
 0x77a   :  { %3193 = vmatpush1.bf16.msra.mxu1 %v3192_v48  ;;  %3259 = vmatprep.subr.bf16.mxu0 %v3258_v34  ;;  %v2426_v48 = vld [vmem:[#allocation8 + $0x3f0] sm:$0xff]  ;;  %v2105_v34 = vld [vmem:[%s4650_s12] sm:$0xf] }
 0x77b   :  { %3195 = vmatprep.subr.bf16.mxu1 %v3194_v58  ;;  %v3276_v58 = vpack.c.bf16 %v2426_v48, %v2424_v17  ;;  %v2154_v24 = vrot.slane %v2105_v34, %v4518_v35  ;;  %v2158_v62 = vrot.slane %v2105_v34, %v4521_v36  ;;  %v2150_v21 = vrot.slane %v2105_v34, %v4738_v39 }
 0x77c   :  { %v2146_v10 = vrot.slane %v2105_v34, %v4737_v60 }
 0x77d   :  { %3261 = vmatpush1.bf16.msra.mxu0 %v3260_v42  ;;  %v2175_v42 = vrot.slane %v2106_v14, %v4738_v39 }
 0x77e   :  { %3197 = vmatpush1.bf16.msra.mxu1 %v3196_v25  ;;  %3263 = vmatprep.subr.bf16.mxu0 %v3262_v43 }
 0x77f   :  { %3199 = vmatprep.subr.bf16.mxu1 %v3198_v5  ;;  %v2183_v5 = vrot.slane %v2106_v14, %v4521_v36 }
 0x781   :  { %3265 = vmatpush1.bf16.msra.mxu0 %v3264_v30 }
 0x782   :  { %3201 = vmatpush1.bf16.msra.mxu1 %v3200_v50  ;;  %3267 = vmatprep.subr.bf16.mxu0 %v3266_v46 }
 0x783   :  { %3203 = vmatprep.subr.bf16.mxu1 %v3202_v38 }
 0x785   :  { %3269 = vmatpush1.bf16.msra.mxu0 %v3268_v57 }
 0x786   :  { %3205 = vmatpush1.bf16.msra.mxu1 %v3204_v61  ;;  %3271 = vmatprep.subr.bf16.mxu0 %v3270_v59 }
 0x787   :  { %3207 = vmatprep.subr.bf16.mxu1 %v3206_v0 }
 0x789   :  { %3273 = vmatpush1.bf16.msra.mxu0 %v3272_v45 }
 0x78a   :  { %3209 = vmatpush1.bf16.msra.mxu1 %v3208_v1  ;;  %3275 = vmatprep.subr.bf16.mxu0 %v3274_v20 }
 0x78b   :  { %3211 = vmatprep.subr.bf16.mxu1 %v3210_v27 }
 0x78d   :  { %3277 = vmatpush1.bf16.msra.mxu0 %v3276_v58 }
 0x78e   :  { %3213 = vmatpush1.bf16.msra.mxu1 %v3212_v8 }
 0x7ec   :  { %v2134_v51 = vpop.xlane.xlu1 %2133 }
 0x7ed   :  { %v2135_v33 = vmul.f32 0.001953125, %v2134_v51 }
 0x7ef   :  { %v2136_v6 = vadd.f32 1e-05, %v2135_v33 }
 0x7f1   :  { %3397 = vrsqrt.f32 %v2136_v6 }
 0x7fb   :  { %v3398_v25 = vpop.eup %3397 }
 0x7fc   :  { %v2139_v11 = vmul.f32 %v3398_v25, %v4533_v44  ;;  %v2141_v40 = vmul.f32 %v3398_v25, %v4537_v2  ;;  %v2138_v43 = vmul.f32 %v3398_v25, %v4531_v15  ;;  %v2140_v41 = vmul.f32 %v3398_v25, %v4535_v52 }
 0x7fe   :  { %v2164_v37 = vmul.f32 %v2150_v21, %v2139_v11  ;;  %v2166_v22 = vmul.f32 %v2158_v62, %v2141_v40  ;;  %v2163_v28 = vmul.f32 %v2146_v10, %v2138_v43  ;;  %v2165_v50 = vmul.f32 %v2154_v24, %v2140_v41 }
 0x800   :  { %v4569_v30 = vadd.f32 %v2175_v42, %v2164_v37  ;;  %v4571_v38 = vadd.f32 %v2183_v5, %v2166_v22  ;;  %v4573_v36 = vadd.f32 %v2171_v23, %v2163_v28  ;;  %v4575_v12 = vadd.f32 %v2179_v3, %v2165_v50 }
 0x802   :  { %v4578_v44 = vmul.f32 0.70710677, %v4569_v30  ;;  %v4581_v15 = vmul.f32 0.70710677, %v4571_v38  ;;  %v4584_v35 = vmul.f32 0.70710677, %v4573_v36 }
 0x803   :  { %v4590_v7 = vmul.f32 0.70710677, %v4575_v12 }
 0x804   :  { %v2209_v52 = vand.u32 2147483647, %v4578_v44  ;;  %v2211_v2 = vand.u32 2147483647, %v4581_v15  ;;  %v2208_v63 = vand.u32 2147483647, %v4584_v35 }
 0x805   :  { %v2210_v56 = vand.u32 2147483647, %v4590_v7  ;;  %vm2201_vm3 = vcmp.ge.f32.partialorder %v4578_v44, 0.0  ;;  %vm2203_vm5 = vcmp.ge.f32.partialorder %v4581_v15, 0.0  ;;  %vm2200_vm6 = vcmp.ge.f32.partialorder %v4584_v35, 0.0 }
 0x806   :  { %v2213_v46 = vmul.f32 0.3275911, %v2209_v52  ;;  %v2215_v31 = vmul.f32 0.3275911, %v2211_v2  ;;  %v2212_v29 = vmul.f32 0.3275911, %v2208_v63 }
 0x807   :  { %v2214_v57 = vmul.f32 0.3275911, %v2210_v56  ;;  %v2265_v13 = vsub.f32 0.0, %v2209_v52  ;;  %v2267_v32 = vsub.f32 0.0, %v2211_v2  ;;  %v2264_v26 = vsub.f32 0.0, %v2208_v63 }
 0x808   :  { %v2217_v4 = vadd.f32 1.0, %v2213_v46  ;;  %v2219_v55 = vadd.f32 1.0, %v2215_v31  ;;  %v2216_v61 = vadd.f32 1.0, %v2212_v29  ;;  %v2266_v1 = vsub.f32 0.0, %v2210_v56 }
 0x809   :  { %v2218_v0 = vadd.f32 1.0, %v2214_v57  ;;  %v2269_v59 = vmul.f32 %v2265_v13, %v2209_v52  ;;  %v2271_v47 = vmul.f32 %v2267_v32, %v2211_v2  ;;  %v2268_v20 = vmul.f32 %v2264_v26, %v2208_v63 }
 0x80a   :  { %3399 = vrcp.f32 %v2217_v4  ;;  %v2270_v33 = vmul.f32 %v2266_v1, %v2210_v56  ;;  %v2193_v15 = vmul.f32 0.5, %v4569_v30  ;;  %vm2202_vm7 = vcmp.ge.f32.partialorder %v4590_v7, 0.0 }
 0x80b   :  { %3401 = vrcp.f32 %v2219_v55  ;;  %v2274_v54 = vmul.f32 1.442695, %v2269_v59  ;;  %v2278_v48 = vmul.f32 1.442695, %v2271_v47  ;;  %v2272_v62 = vmul.f32 1.442695, %v2268_v20 }
 0x80c   :  { %3403 = vrcp.f32 %v2216_v61  ;;  %v2276_v5 = vmul.f32 1.442695, %v2270_v33  ;;  %v2195_v20 = vmul.f32 0.5, %v4571_v38  ;;  %v2192_v30 = vmul.f32 0.5, %v4573_v36 }
 0x80d   :  { %3405 = vrcp.f32 %v2218_v0  ;;  %v2194_v7 = vmul.f32 0.5, %v4575_v12 }
 0x80e   :  { %3407 = vpow2.f32 %v2274_v54 }
 0x80f   :  { %3409 = vpow2.f32 %v2278_v48  ;;  %v2204_v48 = vsel %vm2200_vm6, 1.0, %v4712_v19 }
 0x810   :  { %3411 = vpow2.f32 %v2272_v62  ;;  %v2428_v62 = vld [vmem:[%s4653_s15] sm:$0x3] }
 0x811   :  { %3413 = vpow2.f32 %v2276_v5 }
 0x814   :  { %v3400_v53 = vpop.eup %3399 }
 0x815   :  { %v3402_v18 = vpop.eup %3401  ;;  %v2229_v9 = vmul.f32 1.0614054, %v3400_v53 }
 0x816   :  { %v2231_v16 = vmul.f32 1.0614054, %v3402_v18  ;;  %v3404_v27 = vpop.eup %3403 }
 0x817   :  { %v2719_v45 = vadd.f32 -1.4531521, %v2229_v9  ;;  %v2228_v8 = vmul.f32 1.0614054, %v3404_v27  ;;  %v3406_v58 = vpop.eup %3405  ;;  %v2205_v9 = vsel %vm2201_vm3, 1.0, %v4712_v19 }
 0x818   :  { %v2721_v49 = vadd.f32 -1.4531521, %v2231_v16  ;;  %v2230_v14 = vmul.f32 1.0614054, %v3406_v58  ;;  %v3408_v29 = vpop.eup %3407 }
 0x819   :  { %v2237_v17 = vmul.f32 %v3400_v53, %v2719_v45  ;;  %v2718_v34 = vadd.f32 -1.4531521, %v2228_v8  ;;  %v3410_v55 = vpop.eup %3409 }
 0x81a   :  { %v2239_v51 = vmul.f32 %v3402_v18, %v2721_v49  ;;  %v2720_v25 = vadd.f32 -1.4531521, %v2230_v14  ;;  %v3412_v26 = vpop.eup %3411 }
 0x81b   :  { %v2241_v6 = vadd.f32 1.4214138, %v2237_v17  ;;  %v2236_v10 = vmul.f32 %v3404_v27, %v2718_v34  ;;  %v3414_v1 = vpop.eup %3413 }
 0x81c   :  { %v2243_v24 = vadd.f32 1.4214138, %v2239_v51  ;;  %v2238_v40 = vmul.f32 %v3406_v58, %v2720_v25 }
 0x81d   :  { %v2245_v21 = vmul.f32 %v3400_v53, %v2241_v6  ;;  %v2240_v11 = vadd.f32 1.4214138, %v2236_v10 }
 0x81e   :  { %v2247_v42 = vmul.f32 %v3402_v18, %v2243_v24  ;;  %v2242_v37 = vadd.f32 1.4214138, %v2238_v40 }
 0x81f   :  { %v2723_v23 = vadd.f32 -0.28449672, %v2245_v21  ;;  %v2244_v3 = vmul.f32 %v3404_v27, %v2240_v11  ;;  %v2433_v21 = vrot.slane %v2428_v62, %v4737_v60 }
 0x820   :  { %v2725_v43 = vadd.f32 -0.28449672, %v2247_v42  ;;  %v2246_v52 = vmul.f32 %v3406_v58, %v2242_v37 }
 0x821   :  { %v2253_v41 = vmul.f32 %v3400_v53, %v2723_v23  ;;  %v2722_v50 = vadd.f32 -0.28449672, %v2244_v3 }
 0x822   :  { %v2255_v22 = vmul.f32 %v3402_v18, %v2725_v43  ;;  %v2724_v31 = vadd.f32 -0.28449672, %v2246_v52 }
 0x823   :  { %v2257_v28 = vadd.f32 0.2548296, %v2253_v41  ;;  %v2252_v46 = vmul.f32 %v3404_v27, %v2722_v50 }
 0x824   :  { %v2259_v2 = vadd.f32 0.2548296, %v2255_v22  ;;  %v2254_v57 = vmul.f32 %v3406_v58, %v2724_v31 }
 0x825   :  { %v2261_v63 = vmul.f32 %v3400_v53, %v2257_v28  ;;  %v2256_v61 = vadd.f32 0.2548296, %v2252_v46  ;;  %v2207_v53 = vsel %vm2203_vm5, 1.0, %v4712_v19 }
 0x826   :  { %v2263_v4 = vmul.f32 %v3402_v18, %v2259_v2  ;;  %v2258_v59 = vadd.f32 0.2548296, %v2254_v57 }
 0x827   :  { %v2281_v56 = vmul.f32 %v3408_v29, %v2261_v63  ;;  %v2260_v32 = vmul.f32 %v3404_v27, %v2256_v61 }
 0x828   :  { %v2283_v0 = vmul.f32 %v3410_v55, %v2263_v4  ;;  %v2262_v18 = vmul.f32 %v3406_v58, %v2258_v59  ;;  %v2206_v58 = vsel %vm2202_vm7, 1.0, %v4712_v19  ;;  %v2437_v19 = vrot.slane %v2428_v62, %v4738_v39  ;;  %v2582_v55 = vld [vmem:[%s4654_s16] sm:$0x3]  ;;  %s3553_s16 = smov [#allocation10]  }
 0x829   :  { %v2285_v13 = vsub.f32 1.0, %v2281_v56  ;;  %v2280_v44 = vmul.f32 %v3412_v26, %v2260_v32  ;;  %v2583_v56 = vld [vmem:[%s4655_s17] sm:$0x3]  ;;  %v2609_v61 = vrot.slane %v2582_v55, %v4737_v60  ;;  %v2613_v57 = vrot.slane %v2582_v55, %v4738_v39  ;;  %s2660_s17 = sshll.u32 %s3553_s16, 4  ;;  %s2661_s17 = int_to_ptr.vmem [resolvable:$true] %s2660_s17 }
 0x82a   :  { %v2287_v47 = vsub.f32 1.0, %v2283_v0  ;;  %v2282_v27 = vmul.f32 %v3414_v1, %v2262_v18  ;;  %v2622_v59 = vrot.slane %v2583_v56, %v4737_v60  ;;  %v2626_v26 = vrot.slane %v2583_v56, %v4738_v39  ;;  %s3507_s1 = scalar_lea.vmem %s2661_s17, 64  ;;  %p3512_p5 = scmp.lt.s32.totalorder %s2661_s17, %s2661_s17 }
 0x82b   :  { %v2289_v16 = vmul.f32 %v2285_v13, %v2205_v9  ;;  %v2284_v49 = vsub.f32 1.0, %v2280_v44  ;;  %p3508_p4 = scmp.ne.s32.totalorder %s2661_s17, %s3507_s1  ;;  %p3513_p6 = scmp.lt.s32.totalorder %s3507_s1, %s3507_s1 }
 0x82c   :  { %v2291_v45 = vmul.f32 %v2287_v47, %v2207_v53  ;;  %v2286_v33 = vsub.f32 1.0, %v2282_v27 }
 0x82d   :  { %v2293_v54 = vadd.f32 1.0, %v2289_v16  ;;  %v2288_v51 = vmul.f32 %v2284_v49, %v2204_v48  ;;  %p3514_p7 = por %p3513_p6, %p3512_p5 }
 0x82e   :  { %v2295_v17 = vadd.f32 1.0, %v2291_v45  ;;  %v2290_v34 = vmul.f32 %v2286_v33, %v2206_v58 }
 0x82f   :  { %v2297_v8 = vmul.f32 %v2293_v54, %v2193_v15  ;;  %v2292_v6 = vadd.f32 1.0, %v2288_v51  ;;  %p3515_p8 = pnand %p3514_p7, %p3508_p4 }
 0x830   :  { %v2299_v35 = vmul.f32 %v2295_v17, %v2195_v20  ;;  %v2294_v24 = vadd.f32 1.0, %v2290_v34 }
 0x831   :  { %2504 = vmatprep.mubr.f32.mxu1 %v2297_v8  ;;  %v2296_v14 = vmul.f32 %v2292_v6, %v2192_v30 }
 0x832   :  { %2575 = vmatprep.mubr.f32.mxu0 %v2299_v35  ;;  %v2298_v38 = vmul.f32 %v2294_v24, %v2194_v7 }
 0x833   :  { %2505 = vmatmul.mubr.f32.vlgmr.msra.gmra.mrb[12].mxu1 %v2296_v14 }
 0x834   :  { %2576 = vmatmul.mubr.f32.vlgmr.msra.gmra.mrb[34].mxu0 %v2298_v38 }
 0x906   :  { %v2506_v10 = vpop.f32.mrb[12].mxu1 }
 0x907   :  { %v2507_v36 = vadd.f32 %v2506_v10, %v2433_v21  ;;  %v2508_v25 = vpop.f32.mrb[13].mxu1  ;;  %v2577_v42 = vpop.f32.mrb[34].mxu0 }
 0x908   :  { %v2509_v5 = vadd.f32 %v2508_v25, %v2437_v19  ;;  %v2579_v11 = vpop.f32.mrb[35].mxu0 }
 0x909   :  { %v2578_v23 = vadd.f32 %v2577_v42, %v2507_v36 }
 0x90a   :  { %v2580_v12 = vadd.f32 %v2579_v11, %v2509_v5 }
 0x90b   :  { %v2584_v40 = vsel %vm186_vm2, %v2578_v23, 0.0 }
 0x90c   :  { %v2585_v43 = vsel %vm186_vm2, %v2580_v12, 0.0 }
 0x90d   :  { %v2586_v41 = vadd.f32 %v2585_v43, %v2584_v40 }
 0x90f   :  { %2587 = vadd.xlane.f32.xlu0 %v2586_v41 }
 0x99c   :  { %v2588_v3 = vpop.xlane.xlu0 %2587 }
 0x99d   :  { %v2590_v37 = vmul.f32 0.00390625, %v2588_v3 }
 0x99f   :  { %v2591_v22 = vsub.f32 %v2578_v23, %v2590_v37  ;;  %v2592_v28 = vsub.f32 %v2580_v12, %v2590_v37 }
 0x9a1   :  { %v2593_v50 = vmul.f32 %v2591_v22, %v2591_v22  ;;  %v2594_v52 = vmul.f32 %v2592_v28, %v2592_v28 }
 0x9a3   :  { %v2595_v2 = vsel %vm186_vm2, %v2593_v50, 0.0  ;;  %v2596_v63 = vsel %vm186_vm2, %v2594_v52, 0.0 }
 0x9a4   :  { %v2597_v46 = vadd.f32 %v2596_v63, %v2595_v2 }
 0x9a6   :  { %2598 = vadd.xlane.f32.xlu0 %v2597_v46 }
 0xa33   :  { %v2599_v31 = vpop.xlane.xlu0 %2598 }
 0xa34   :  { %v2600_v29 = vmul.f32 0.00390625, %v2599_v31 }
 0xa36   :  { %v2601_v4 = vadd.f32 1e-05, %v2600_v29 }
 0xa38   :  { %3415 = vrsqrt.f32 %v2601_v4 }
 0xa42   :  { %v3416_v0 = vpop.eup %3415 }
 0xa43   :  { %v2603_v13 = vmul.f32 %v3416_v0, %v2591_v22  ;;  %v2604_v32 = vmul.f32 %v3416_v0, %v2592_v28 }
 0xa45   :  { %v2616_v9 = vmul.f32 %v2609_v61, %v2603_v13  ;;  %v2617_v53 = vmul.f32 %v2613_v57, %v2604_v32 }
 0xa47   :  { %v2629_v47 = vadd.f32 %v2622_v59, %v2616_v9  ;;  %v2630_v16 = vadd.f32 %v2626_v26, %v2617_v53 }
 0xa49   :  { %v2631_v44 = vmul.f32 %v2629_v47, %v2629_v47  ;;  %v2632_v18 = vmul.f32 %v2630_v16, %v2630_v16 }
 0xa4b   :  { %v2633_v1 = vsel %vm186_vm2, %v2631_v44, 0.0  ;;  %v2634_v15 = vsel %vm186_vm2, %v2632_v18, 0.0 }
 0xa4c   :  { %v2635_v45 = vadd.f32 %v2634_v15, %v2633_v1 }
 0xa4e   :  { %2636 = vadd.xlane.f32.xlu1 %v2635_v45 }
 0xadb   :  { %v2637_v54 = vpop.xlane.xlu1 %2636 }
 0xadc   :  { %v2638_v49 = vmax.f32 %v2637_v54, 1e-24 }
 0xade   :  { %3417 = vrsqrt.f32 %v2638_v49 }
 0xae8   :  { %v3418_v27 = vpop.eup %3417 }
 0xae9   :  { %v2640_v60 = vmul.f32 %v3418_v27, %v2629_v47  ;;  %v2641_v39 = vmul.f32 %v3418_v27, %v2630_v16 }
 0xaeb   :  { %v2644_v20 = vcombine.low %v2640_v60, %v2641_v39 }
 0xaed   :  { %2726 = vst.sshfl [vmem:[#allocation10] sm:$0x33 pattern:$0x76325410] %v2644_v20 }
 0xaee   :  { %3518 = shalt.err (!%p3515_p8)
}
 0xaef   :  { %s3519_s25 = scalar_lea.hbm %s4656_s18, 64 }
 0xaf0   :  { %p3520_p9 = scmp.ne.s32.totalorder %s4656_s18, %s3519_s25  ;;  %p3523_p10 = scmp.lt.u32.totalorder %s3519_s25, %s4656_s18 }
 0xaf2   :  { %p3525_p11 = pnand %p3523_p10, %p3520_p9 }
 0xaf4   :  { %3528 = shalt.err (!%p3525_p11)
}
 0xaf5   :  { %2663 = dma.vmem_to_hbm [thread:$0]  %s2661_s17, 64, %s4656_s18, [#allocation4]  }
 0xaf6   :  { %3535 = dma.done.wait [#allocation4], 64  }
 0xaf7   :  { %3536 = vsyncadd [#allocation4], 4294967232 }
 0xaf8   :  { %2667 = vsyncpa [#allocation3], 1 }
 0xaf9   :  { %2668 = vsyncpa [#allocation6], 1 }
 0xafa   :  { %2669 = vsyncpa [#allocation9], 1 }
 0xafb   :  { %2670 = vsyncpa [#allocation4], 1 }

</bundles_post_ra>
